<compile_context>
chip_gen: v5e
topology: v5e:2x2
jax: 0.10.0
libtpu: 0.0.40
codegen_flags: <defaults>
</compile_context>

<pallas_src>
import math
import jax
import jax.numpy as jnp
from jax.experimental import pallas as pl
from jax.experimental.pallas import tpu as pltpu

# ---------------- config (small synthetic sizes) ----------------
NTYPES = ("A", "B")
ETYPES = (("A", "ab", "B"), ("B", "ba", "A"), ("B", "bb", "B"))
IN_DIMS = {"A": 12, "B": 16}
PAD_IN = 128                      # lane-pad raw inputs -> unmasked adapt-matmul loads
HIDDEN = 32
OUT_DIM = 8
NUM_HEADS = 4
D_K = HIDDEN // NUM_HEADS
NUM_LAYERS = 2
CATEGORY = "A"
N_NODES = {"A": 8, "B": 16}       # sublane (8) aligned
LN_EPS = 1e-5
NEG_INF = -1e30
INV_SQRT2 = 1.0 / math.sqrt(2.0)

RELS_BY_DST = {nt: tuple(et for (_s, et, d) in ETYPES if d == nt) for nt in NTYPES}


def _vmem():
    return pl.BlockSpec(memory_space=pltpu.MemorySpace.VMEM)


# ---------------- exact-erf GELU (in-kernel) ----------------
def _erf(x):
    # Abramowitz & Stegun 7.1.26 rational approximation, |abs err| < 1.5e-7
    # (f32-exact replacement for torch's default exact-erf GELU).
    a1, a2, a3, a4, a5 = (0.254829592, -0.284496736, 1.421413741,
                          -1.453152027, 1.061405429)
    p = 0.3275911
    sgn = jnp.where(x >= 0.0, 1.0, -1.0)
    ax = jnp.abs(x)
    t = 1.0 / (1.0 + p * ax)
    poly = ((((a5 * t + a4) * t + a3) * t + a2) * t + a1) * t
    return sgn * (1.0 - poly * jnp.exp(-ax * ax))


def _gelu_exact(x):
    return x * 0.5 * (1.0 + _erf(x * INV_SQRT2))


# ---------------- fused full-forward kernel ----------------
def _fused_forward_kernel_factory(resid_scale):
    # resid_scale: [layer][ntype] -> python float (1 - sigmoid(skip)), trace constant.
    def kernel(*refs):
        it = iter(refs)
        feat_in = {nt: next(it)[...] for nt in NTYPES}                 # (N, 128)
        adapt = {nt: (next(it)[...], next(it)[...]) for nt in NTYPES}  # (128,32),(1,32)
        bias_st, has_edge = {}, {}
        for _, et, _ in ETYPES:
            bias_st[et] = next(it)[...]        # (H*N_dst, N_src)  0 / -1e30
            has_edge[et] = next(it)[...]       # (N_dst, 1)        0 / 1
        layers = []
        for _ in range(NUM_LAYERS):
            lp = {"wq": {}, "bq": {}, "wk": {}, "bk": {}, "wv": {}, "bv": {},
                  "wa": {}, "ba": {}, "gamma": {}, "beta": {}}
            for nt in NTYPES:
                lp["wq"][nt] = next(it)[...]
                lp["bq"][nt] = next(it)[...]
            for _, et, _ in ETYPES:
                lp["wk"][et] = next(it)[...]   # W_k @ blockdiag(w_att * mu/sqrt(dk))
                lp["bk"][et] = next(it)[...]
                lp["wv"][et] = next(it)[...]   # W_v @ blockdiag(w_msg)
                lp["bv"][et] = next(it)[...]
            for nt in NTYPES:
                lp["wa"][nt] = next(it)[...]   # alpha already folded in
                lp["ba"][nt] = next(it)[...]
                lp["gamma"][nt] = next(it)[...]
                lp["beta"][nt] = next(it)[...]
            layers.append(lp)
        w_pred = next(it)[...]
        b_pred = next(it)[...]
        out_ref = next(it)

        # per-head lane masks, hoisted once (JAX does not CSE broadcasts)
        lane = jax.lax.broadcasted_iota(jnp.int32, (1, HIDDEN), 1)
        head_mask = [((lane >= h * D_K) & (lane < (h + 1) * D_K)).astype(jnp.float32)
                     for h in range(NUM_HEADS)]

        # 1) adapt projection + exact-erf GELU (EUP exp is otherwise idle here)
        hid = {}
        for nt in NTYPES:
            w, b = adapt[nt]
            z = jnp.dot(feat_in[nt], w, preferred_element_type=jnp.float32) + b
            hid[nt] = _gelu_exact(z)

        # 2) NUM_LAYERS fused HGT layers; activations stay resident
        for li in range(NUM_LAYERS):
            lp = layers[li]
            q = {nt: jnp.dot(hid[nt], lp["wq"][nt],
                             preferred_element_type=jnp.float32) + lp["bq"][nt]
                 for nt in NTYPES}
            rel_out = {}
            for stype, et, dtype in ETYPES:
                # composed projections: no fused-kqv lane slicing, no extra matmuls
                kp = jnp.dot(hid[stype], lp["wk"][et],
                             preferred_element_type=jnp.float32) + lp["bk"][et]
                vp = jnp.dot(hid[stype], lp["wv"][et],
                             preferred_element_type=jnp.float32) + lp["bv"][et]
                nd = N_NODES[dtype]
                # all 4 heads in ONE score matmul: head-masked q stacked on sublanes
                q_st = jnp.concatenate(
                    [q[dtype] * head_mask[h] for h in range(NUM_HEADS)], axis=0)
                s = jax.lax.dot_general(
                    q_st, kp, (((1,), (1,)), ((), ())),
                    preferred_element_type=jnp.float32) + bias_st[et]
                m = jnp.max(s, axis=-1, keepdims=True)
                e = jnp.exp(s - m)                       # masked entries underflow to 0
                denom = jnp.sum(e, axis=-1, keepdims=True)
                # approx=True: ~1e-3 rel error on EUP; use approx=False for tight
                # allclose validation against the PyTorch reference.
                attn = e * pl.reciprocal(denom, approx=True)
                # all 4 heads in ONE message matmul; recombine with sublane slices
                msg = jnp.dot(attn, vp, preferred_element_type=jnp.float32)
                o = msg[0:nd, :] * head_mask[0]
                for h in range(1, NUM_HEADS):
                    o = o + msg[h * nd:(h + 1) * nd, :] * head_mask[h]
                # zero-in-degree dst rows receive no messages (DGL fn.sum semantics)
                rel_out[et] = o * has_edge[et]

            new_hid = {}
            for nt in NTYPES:
                rels = RELS_BY_DST[nt]
                acc = rel_out[rels[0]]
                for et in rels[1:]:
                    acc = acc + rel_out[et]
                hmean = acc * (1.0 / len(rels))          # HeteroGraphConv 'mean'
                # skip gate alpha folded into wa/ba; dropout = identity (eval)
                trans = jnp.dot(hmean, lp["wa"][nt],
                                preferred_element_type=jnp.float32) + lp["ba"][nt]
                mixed = trans + resid_scale[li][nt] * hid[nt]
                mu_ = jnp.mean(mixed, axis=-1, keepdims=True)
                var = jnp.mean((mixed - mu_) ** 2, axis=-1, keepdims=True)
                new_hid[nt] = ((mixed - mu_) * jax.lax.rsqrt(var + LN_EPS)
                               * lp["gamma"][nt] + lp["beta"][nt])
            hid = new_hid

        # 3) predict head
        out_ref[...] = (jnp.dot(hid[CATEGORY], w_pred,
                                preferred_element_type=jnp.float32) + b_pred)

    return kernel


def hgt_forward(prep, resid_scale, graph, feats_pad):
    args = []
    for nt in NTYPES:
        args.append(feats_pad[nt])
    for nt in NTYPES:
        w, b = prep["adapt"][nt]
        args += [w, b]
    for _, et, _ in ETYPES:
        args += [graph["bias_st"][et], graph["has_edge"][et]]
    for lp in prep["layers"]:
        for nt in NTYPES:
            args += [lp["wq"][nt], lp["bq"][nt]]
        for _, et, _ in ETYPES:
            args += [lp["wk"][et], lp["bk"][et], lp["wv"][et], lp["bv"][et]]
        for nt in NTYPES:
            args += [lp["wa"][nt], lp["ba"][nt], lp["gamma"][nt], lp["beta"][nt]]
    wp, bp = prep["predict"]
    args += [wp, bp]

    return pl.pallas_call(
        _fused_forward_kernel_factory(resid_scale),
        out_shape=jax.ShapeDtypeStruct((N_NODES[CATEGORY], OUT_DIM), jnp.float32),
        in_specs=[_vmem() for _ in args],
        out_specs=_vmem(),
    )(*args)


# ---------------- deterministic parameter / graph construction ----------------
def init_linear(key, d_in, d_out):
    k1, k2 = jax.random.split(key)
    bound = 1.0 / math.sqrt(d_in)
    w = jax.random.uniform(k1, (d_in, d_out), jnp.float32, -bound, bound)
    b = jax.random.uniform(k2, (1, d_out), jnp.float32, -bound, bound)
    return w, b


def _block_diag(blocks):
    # (H, d_k, d_k) per-head maps -> (H*d_k, H*d_k) block-diagonal matrix
    h, dk, _ = blocks.shape
    out = jnp.zeros((h * dk, h * dk), jnp.float32)
    for i in range(h):
        out = out.at[i * dk:(i + 1) * dk, i * dk:(i + 1) * dk].set(blocks[i])
    return out


def prepare_params(key):
    keys = iter(jax.random.split(key, 512))
    prep = {"adapt": {}, "layers": [], "predict": None}
    for nt in NTYPES:
        w, b = init_linear(next(keys), IN_DIMS[nt], HIDDEN)
        w_pad = jnp.zeros((PAD_IN, HIDDEN), jnp.float32).at[:IN_DIMS[nt], :].set(w)
        prep["adapt"][nt] = (w_pad, b)

    xavier_bound = math.sqrt(6.0 / (D_K + D_K))
    alpha = 1.0 / (1.0 + math.exp(-1.0))          # sigmoid(skip=1.0), eval constant
    resid_scale = []
    for _ in range(NUM_LAYERS):
        # per-node-type k/q/v/a linears, shared across relations (as in reference)
        wk, bk, wq, bq, wv, bv, wa, ba = ({} for _ in range(8))
        for nt in NTYPES:
            wk[nt], bk[nt] = init_linear(next(keys), HIDDEN, HIDDEN)
            wq[nt], bq[nt] = init_linear(next(keys), HIDDEN, HIDDEN)
            wv[nt], bv[nt] = init_linear(next(keys), HIDDEN, HIDDEN)
            wa[nt], ba[nt] = init_linear(next(keys), HIDDEN, HIDDEN)
        lp = {"wq": {}, "bq": {}, "wk": {}, "bk": {}, "wv": {}, "bv": {},
              "wa": {}, "ba": {}, "gamma": {}, "beta": {}}
        rs = {}
        for nt in NTYPES:
            lp["wq"][nt] = wq[nt]
            lp["bq"][nt] = bq[nt]
            lp["wa"][nt] = alpha * wa[nt]          # skip gate folded into a_linear
            lp["ba"][nt] = alpha * ba[nt]
            lp["gamma"][nt] = jnp.ones((1, HIDDEN), jnp.float32)
            lp["beta"][nt] = jnp.zeros((1, HIDDEN), jnp.float32)
            rs[nt] = 1.0 - alpha
        for stype, et, _dtype in ETYPES:
            w_att = jax.random.uniform(next(keys), (NUM_HEADS, D_K, D_K), jnp.float32,
                                       -xavier_bound, xavier_bound)
            w_msg = jax.random.uniform(next(keys), (NUM_HEADS, D_K, D_K), jnp.float32,
                                       -xavier_bound, xavier_bound)
            mu = jnp.ones((NUM_HEADS,), jnp.float32)
            # fold mu[h]/sqrt(d_k) into w_att (exact: scores are linear in kp),
            # then compose w_att / w_msg into the shared k / v projections.
            bd_att = _block_diag(w_att * (mu / math.sqrt(D_K))[:, None, None])
            bd_msg = _block_diag(w_msg)
            lp["wk"][et] = wk[stype] @ bd_att
            lp["bk"][et] = bk[stype] @ bd_att
            lp["wv"][et] = wv[stype] @ bd_msg
            lp["bv"][et] = bv[stype] @ bd_msg
        prep["layers"].append(lp)
        resid_scale.append(rs)
    prep["predict"] = init_linear(next(keys), HIDDEN, OUT_DIM)
    return prep, resid_scale


def build_graph(key):
    # dense 0/1 adjacency per relation -> head-tiled additive mask bias + degree mask
    graph = {"bias_st": {}, "has_edge": {}}
    for (st, et, dt), k in zip(ETYPES, jax.random.split(key, len(ETYPES))):
        adj = (jax.random.uniform(k, (N_NODES[dt], N_NODES[st])) < 0.5).astype(jnp.float32)
        bias = jnp.where(adj > 0.0, 0.0, NEG_INF).astype(jnp.float32)
        graph["bias_st"][et] = jnp.tile(bias, (NUM_HEADS, 1))          # (H*N_dst, N_src)
        graph["has_edge"][et] = (jnp.max(adj, axis=1, keepdims=True) > 0.0
                                 ).astype(jnp.float32)                 # (N_dst, 1)
    return graph


if __name__ == "__main__":
    root = jax.random.PRNGKey(0)
    k_params, k_graph, k_feat = jax.random.split(root, 3)
    prep, resid_scale = prepare_params(k_params)
    graph = build_graph(k_graph)
    fkeys = jax.random.split(k_feat, len(NTYPES))
    feats = {nt: jax.random.normal(fk, (N_NODES[nt], IN_DIMS[nt]), jnp.float32)
             for nt, fk in zip(NTYPES, fkeys)}
    # lane-pad raw inputs host-side (zeros in extra lanes -> result unchanged)
    feats_pad = {nt: jnp.zeros((N_NODES[nt], PAD_IN), jnp.float32)
                 .at[:, :IN_DIMS[nt]].set(feats[nt]) for nt in NTYPES}

    out = hgt_forward(prep, resid_scale, graph, feats_pad)
    out = jax.block_until_ready(out)
    assert out.shape == (N_NODES[CATEGORY], OUT_DIM), out.shape
    assert bool(jnp.all(jnp.isfinite(out)))
    print("KERNEL_OK")
</pallas_src>

<mosaic_0001>
module attributes {stable_mosaic.version = 11 : i64} {
  func.func @kernel(%arg0: memref<8x128xf32, #tpu.memory_space<vmem>>, %arg1: memref<16x128xf32, #tpu.memory_space<vmem>>, %arg2: memref<128x32xf32, #tpu.memory_space<vmem>>, %arg3: memref<1x32xf32, #tpu.memory_space<vmem>>, %arg4: memref<128x32xf32, #tpu.memory_space<vmem>>, %arg5: memref<1x32xf32, #tpu.memory_space<vmem>>, %arg6: memref<64x8xf32, #tpu.memory_space<vmem>>, %arg7: memref<16x1xf32, #tpu.memory_space<vmem>>, %arg8: memref<32x16xf32, #tpu.memory_space<vmem>>, %arg9: memref<8x1xf32, #tpu.memory_space<vmem>>, %arg10: memref<64x16xf32, #tpu.memory_space<vmem>>, %arg11: memref<16x1xf32, #tpu.memory_space<vmem>>, %arg12: memref<32x32xf32, #tpu.memory_space<vmem>>, %arg13: memref<1x32xf32, #tpu.memory_space<vmem>>, %arg14: memref<32x32xf32, #tpu.memory_space<vmem>>, %arg15: memref<1x32xf32, #tpu.memory_space<vmem>>, %arg16: memref<32x32xf32, #tpu.memory_space<vmem>>, %arg17: memref<1x32xf32, #tpu.memory_space<vmem>>, %arg18: memref<32x32xf32, #tpu.memory_space<vmem>>, %arg19: memref<1x32xf32, #tpu.memory_space<vmem>>, %arg20: memref<32x32xf32, #tpu.memory_space<vmem>>, %arg21: memref<1x32xf32, #tpu.memory_space<vmem>>, %arg22: memref<32x32xf32, #tpu.memory_space<vmem>>, %arg23: memref<1x32xf32, #tpu.memory_space<vmem>>, %arg24: memref<32x32xf32, #tpu.memory_space<vmem>>, %arg25: memref<1x32xf32, #tpu.memory_space<vmem>>, %arg26: memref<32x32xf32, #tpu.memory_space<vmem>>, %arg27: memref<1x32xf32, #tpu.memory_space<vmem>>, %arg28: memref<32x32xf32, #tpu.memory_space<vmem>>, %arg29: memref<1x32xf32, #tpu.memory_space<vmem>>, %arg30: memref<1x32xf32, #tpu.memory_space<vmem>>, %arg31: memref<1x32xf32, #tpu.memory_space<vmem>>, %arg32: memref<32x32xf32, #tpu.memory_space<vmem>>, %arg33: memref<1x32xf32, #tpu.memory_space<vmem>>, %arg34: memref<1x32xf32, #tpu.memory_space<vmem>>, %arg35: memref<1x32xf32, #tpu.memory_space<vmem>>, %arg36: memref<32x32xf32, #tpu.memory_space<vmem>>, %arg37: memref<1x32xf32, #tpu.memory_space<vmem>>, %arg38: memref<32x32xf32, #tpu.memory_space<vmem>>, %arg39: memref<1x32xf32, #tpu.memory_space<vmem>>, %arg40: memref<32x32xf32, #tpu.memory_space<vmem>>, %arg41: memref<1x32xf32, #tpu.memory_space<vmem>>, %arg42: memref<32x32xf32, #tpu.memory_space<vmem>>, %arg43: memref<1x32xf32, #tpu.memory_space<vmem>>, %arg44: memref<32x32xf32, #tpu.memory_space<vmem>>, %arg45: memref<1x32xf32, #tpu.memory_space<vmem>>, %arg46: memref<32x32xf32, #tpu.memory_space<vmem>>, %arg47: memref<1x32xf32, #tpu.memory_space<vmem>>, %arg48: memref<32x32xf32, #tpu.memory_space<vmem>>, %arg49: memref<1x32xf32, #tpu.memory_space<vmem>>, %arg50: memref<32x32xf32, #tpu.memory_space<vmem>>, %arg51: memref<1x32xf32, #tpu.memory_space<vmem>>, %arg52: memref<32x32xf32, #tpu.memory_space<vmem>>, %arg53: memref<1x32xf32, #tpu.memory_space<vmem>>, %arg54: memref<1x32xf32, #tpu.memory_space<vmem>>, %arg55: memref<1x32xf32, #tpu.memory_space<vmem>>, %arg56: memref<32x32xf32, #tpu.memory_space<vmem>>, %arg57: memref<1x32xf32, #tpu.memory_space<vmem>>, %arg58: memref<1x32xf32, #tpu.memory_space<vmem>>, %arg59: memref<1x32xf32, #tpu.memory_space<vmem>>, %arg60: memref<32x8xf32, #tpu.memory_space<vmem>>, %arg61: memref<1x8xf32, #tpu.memory_space<vmem>>, %arg62: memref<8x8xf32, #tpu.memory_space<vmem>>) attributes {dimension_semantics = [], scalar_prefetch = 0 : i64, scratch_operands = 0 : i64, tpu.core_type = #tpu.core_type<tc>} {
    %c0 = arith.constant 0 : index
    %c0_0 = arith.constant 0 : index
    %0 = vector.load %arg0[%c0, %c0_0] : memref<8x128xf32, #tpu.memory_space<vmem>>, vector<8x128xf32>
    %c0_1 = arith.constant 0 : index
    %c0_2 = arith.constant 0 : index
    %1 = vector.load %arg1[%c0_1, %c0_2] : memref<16x128xf32, #tpu.memory_space<vmem>>, vector<16x128xf32>
    %c0_3 = arith.constant 0 : index
    %c0_4 = arith.constant 0 : index
    %2 = vector.load %arg2[%c0_3, %c0_4] : memref<128x32xf32, #tpu.memory_space<vmem>>, vector<128x32xf32>
    %c0_5 = arith.constant 0 : index
    %c0_6 = arith.constant 0 : index
    %3 = vector.load %arg3[%c0_5, %c0_6] : memref<1x32xf32, #tpu.memory_space<vmem>>, vector<1x32xf32>
    %c0_7 = arith.constant 0 : index
    %c0_8 = arith.constant 0 : index
    %4 = vector.load %arg4[%c0_7, %c0_8] : memref<128x32xf32, #tpu.memory_space<vmem>>, vector<128x32xf32>
    %c0_9 = arith.constant 0 : index
    %c0_10 = arith.constant 0 : index
    %5 = vector.load %arg5[%c0_9, %c0_10] : memref<1x32xf32, #tpu.memory_space<vmem>>, vector<1x32xf32>
    %c0_11 = arith.constant 0 : index
    %c0_12 = arith.constant 0 : index
    %6 = vector.load %arg6[%c0_11, %c0_12] : memref<64x8xf32, #tpu.memory_space<vmem>>, vector<64x8xf32>
    %c0_13 = arith.constant 0 : index
    %c0_14 = arith.constant 0 : index
    %7 = vector.load %arg7[%c0_13, %c0_14] : memref<16x1xf32, #tpu.memory_space<vmem>>, vector<16x1xf32>
    %c0_15 = arith.constant 0 : index
    %c0_16 = arith.constant 0 : index
    %8 = vector.load %arg8[%c0_15, %c0_16] : memref<32x16xf32, #tpu.memory_space<vmem>>, vector<32x16xf32>
    %c0_17 = arith.constant 0 : index
    %c0_18 = arith.constant 0 : index
    %9 = vector.load %arg9[%c0_17, %c0_18] : memref<8x1xf32, #tpu.memory_space<vmem>>, vector<8x1xf32>
    %c0_19 = arith.constant 0 : index
    %c0_20 = arith.constant 0 : index
    %10 = vector.load %arg10[%c0_19, %c0_20] : memref<64x16xf32, #tpu.memory_space<vmem>>, vector<64x16xf32>
    %c0_21 = arith.constant 0 : index
    %c0_22 = arith.constant 0 : index
    %11 = vector.load %arg11[%c0_21, %c0_22] : memref<16x1xf32, #tpu.memory_space<vmem>>, vector<16x1xf32>
    %c0_23 = arith.constant 0 : index
    %c0_24 = arith.constant 0 : index
    %12 = vector.load %arg12[%c0_23, %c0_24] : memref<32x32xf32, #tpu.memory_space<vmem>>, vector<32x32xf32>
    %c0_25 = arith.constant 0 : index
    %c0_26 = arith.constant 0 : index
    %13 = vector.load %arg13[%c0_25, %c0_26] : memref<1x32xf32, #tpu.memory_space<vmem>>, vector<1x32xf32>
    %c0_27 = arith.constant 0 : index
    %c0_28 = arith.constant 0 : index
    %14 = vector.load %arg14[%c0_27, %c0_28] : memref<32x32xf32, #tpu.memory_space<vmem>>, vector<32x32xf32>
    %c0_29 = arith.constant 0 : index
    %c0_30 = arith.constant 0 : index
    %15 = vector.load %arg15[%c0_29, %c0_30] : memref<1x32xf32, #tpu.memory_space<vmem>>, vector<1x32xf32>
    %c0_31 = arith.constant 0 : index
    %c0_32 = arith.constant 0 : index
    %16 = vector.load %arg16[%c0_31, %c0_32] : memref<32x32xf32, #tpu.memory_space<vmem>>, vector<32x32xf32>
    %c0_33 = arith.constant 0 : index
    %c0_34 = arith.constant 0 : index
    %17 = vector.load %arg17[%c0_33, %c0_34] : memref<1x32xf32, #tpu.memory_space<vmem>>, vector<1x32xf32>
    %c0_35 = arith.constant 0 : index
    %c0_36 = arith.constant 0 : index
    %18 = vector.load %arg18[%c0_35, %c0_36] : memref<32x32xf32, #tpu.memory_space<vmem>>, vector<32x32xf32>
    %c0_37 = arith.constant 0 : index
    %c0_38 = arith.constant 0 : index
    %19 = vector.load %arg19[%c0_37, %c0_38] : memref<1x32xf32, #tpu.memory_space<vmem>>, vector<1x32xf32>
    %c0_39 = arith.constant 0 : index
    %c0_40 = arith.constant 0 : index
    %20 = vector.load %arg20[%c0_39, %c0_40] : memref<32x32xf32, #tpu.memory_space<vmem>>, vector<32x32xf32>
    %c0_41 = arith.constant 0 : index
    %c0_42 = arith.constant 0 : index
    %21 = vector.load %arg21[%c0_41, %c0_42] : memref<1x32xf32, #tpu.memory_space<vmem>>, vector<1x32xf32>
    %c0_43 = arith.constant 0 : index
    %c0_44 = arith.constant 0 : index
    %22 = vector.load %arg22[%c0_43, %c0_44] : memref<32x32xf32, #tpu.memory_space<vmem>>, vector<32x32xf32>
    %c0_45 = arith.constant 0 : index
    %c0_46 = arith.constant 0 : index
    %23 = vector.load %arg23[%c0_45, %c0_46] : memref<1x32xf32, #tpu.memory_space<vmem>>, vector<1x32xf32>
    %c0_47 = arith.constant 0 : index
    %c0_48 = arith.constant 0 : index
    %24 = vector.load %arg24[%c0_47, %c0_48] : memref<32x32xf32, #tpu.memory_space<vmem>>, vector<32x32xf32>
    %c0_49 = arith.constant 0 : index
    %c0_50 = arith.constant 0 : index
    %25 = vector.load %arg25[%c0_49, %c0_50] : memref<1x32xf32, #tpu.memory_space<vmem>>, vector<1x32xf32>
    %c0_51 = arith.constant 0 : index
    %c0_52 = arith.constant 0 : index
    %26 = vector.load %arg26[%c0_51, %c0_52] : memref<32x32xf32, #tpu.memory_space<vmem>>, vector<32x32xf32>
    %c0_53 = arith.constant 0 : index
    %c0_54 = arith.constant 0 : index
    %27 = vector.load %arg27[%c0_53, %c0_54] : memref<1x32xf32, #tpu.memory_space<vmem>>, vector<1x32xf32>
    %c0_55 = arith.constant 0 : index
    %c0_56 = arith.constant 0 : index
    %28 = vector.load %arg28[%c0_55, %c0_56] : memref<32x32xf32, #tpu.memory_space<vmem>>, vector<32x32xf32>
    %c0_57 = arith.constant 0 : index
    %c0_58 = arith.constant 0 : index
    %29 = vector.load %arg29[%c0_57, %c0_58] : memref<1x32xf32, #tpu.memory_space<vmem>>, vector<1x32xf32>
    %c0_59 = arith.constant 0 : index
    %c0_60 = arith.constant 0 : index
    %30 = vector.load %arg30[%c0_59, %c0_60] : memref<1x32xf32, #tpu.memory_space<vmem>>, vector<1x32xf32>
    %c0_61 = arith.constant 0 : index
    %c0_62 = arith.constant 0 : index
    %31 = vector.load %arg31[%c0_61, %c0_62] : memref<1x32xf32, #tpu.memory_space<vmem>>, vector<1x32xf32>
    %c0_63 = arith.constant 0 : index
    %c0_64 = arith.constant 0 : index
    %32 = vector.load %arg32[%c0_63, %c0_64] : memref<32x32xf32, #tpu.memory_space<vmem>>, vector<32x32xf32>
    %c0_65 = arith.constant 0 : index
    %c0_66 = arith.constant 0 : index
    %33 = vector.load %arg33[%c0_65, %c0_66] : memref<1x32xf32, #tpu.memory_space<vmem>>, vector<1x32xf32>
    %c0_67 = arith.constant 0 : index
    %c0_68 = arith.constant 0 : index
    %34 = vector.load %arg34[%c0_67, %c0_68] : memref<1x32xf32, #tpu.memory_space<vmem>>, vector<1x32xf32>
    %c0_69 = arith.constant 0 : index
    %c0_70 = arith.constant 0 : index
    %35 = vector.load %arg35[%c0_69, %c0_70] : memref<1x32xf32, #tpu.memory_space<vmem>>, vector<1x32xf32>
    %c0_71 = arith.constant 0 : index
    %c0_72 = arith.constant 0 : index
    %36 = vector.load %arg36[%c0_71, %c0_72] : memref<32x32xf32, #tpu.memory_space<vmem>>, vector<32x32xf32>
    %c0_73 = arith.constant 0 : index
    %c0_74 = arith.constant 0 : index
    %37 = vector.load %arg37[%c0_73, %c0_74] : memref<1x32xf32, #tpu.memory_space<vmem>>, vector<1x32xf32>
    %c0_75 = arith.constant 0 : index
    %c0_76 = arith.constant 0 : index
    %38 = vector.load %arg44[%c0_75, %c0_76] : memref<32x32xf32, #tpu.memory_space<vmem>>, vector<32x32xf32>
    %c0_77 = arith.constant 0 : index
    %c0_78 = arith.constant 0 : index
    %39 = vector.load %arg45[%c0_77, %c0_78] : memref<1x32xf32, #tpu.memory_space<vmem>>, vector<1x32xf32>
    %c0_79 = arith.constant 0 : index
    %c0_80 = arith.constant 0 : index
    %40 = vector.load %arg46[%c0_79, %c0_80] : memref<32x32xf32, #tpu.memory_space<vmem>>, vector<32x32xf32>
    %c0_81 = arith.constant 0 : index
    %c0_82 = arith.constant 0 : index
    %41 = vector.load %arg47[%c0_81, %c0_82] : memref<1x32xf32, #tpu.memory_space<vmem>>, vector<1x32xf32>
    %c0_83 = arith.constant 0 : index
    %c0_84 = arith.constant 0 : index
    %42 = vector.load %arg52[%c0_83, %c0_84] : memref<32x32xf32, #tpu.memory_space<vmem>>, vector<32x32xf32>
    %c0_85 = arith.constant 0 : index
    %c0_86 = arith.constant 0 : index
    %43 = vector.load %arg53[%c0_85, %c0_86] : memref<1x32xf32, #tpu.memory_space<vmem>>, vector<1x32xf32>
    %c0_87 = arith.constant 0 : index
    %c0_88 = arith.constant 0 : index
    %44 = vector.load %arg54[%c0_87, %c0_88] : memref<1x32xf32, #tpu.memory_space<vmem>>, vector<1x32xf32>
    %c0_89 = arith.constant 0 : index
    %c0_90 = arith.constant 0 : index
    %45 = vector.load %arg55[%c0_89, %c0_90] : memref<1x32xf32, #tpu.memory_space<vmem>>, vector<1x32xf32>
    %c0_91 = arith.constant 0 : index
    %c0_92 = arith.constant 0 : index
    %46 = vector.load %arg60[%c0_91, %c0_92] : memref<32x8xf32, #tpu.memory_space<vmem>>, vector<32x8xf32>
    %c0_93 = arith.constant 0 : index
    %c0_94 = arith.constant 0 : index
    %47 = vector.load %arg61[%c0_93, %c0_94] : memref<1x8xf32, #tpu.memory_space<vmem>>, vector<1x8xf32>
    %48 = tpu.iota {dimensions = array<i32: 1>} : vector<1x32xi32>
    %c0_i32 = arith.constant 0 : i32
    %49 = vector.broadcast %c0_i32 : i32 to vector<1x32xi32>
    %50 = arith.cmpi sge, %48, %49 : vector<1x32xi32>
    %c8_i32 = arith.constant 8 : i32
    %51 = vector.broadcast %c8_i32 : i32 to vector<1x32xi32>
    %52 = arith.cmpi slt, %48, %51 : vector<1x32xi32>
    %53 = arith.andi %50, %52 : vector<1x32xi1>
    %54 = arith.extui %53 : vector<1x32xi1> to vector<1x32xi32>
    %55 = arith.sitofp %54 : vector<1x32xi32> to vector<1x32xf32>
    %c8_i32_95 = arith.constant 8 : i32
    %56 = vector.broadcast %c8_i32_95 : i32 to vector<1x32xi32>
    %57 = arith.cmpi sge, %48, %56 : vector<1x32xi32>
    %c16_i32 = arith.constant 16 : i32
    %58 = vector.broadcast %c16_i32 : i32 to vector<1x32xi32>
    %59 = arith.cmpi slt, %48, %58 : vector<1x32xi32>
    %60 = arith.andi %57, %59 : vector<1x32xi1>
    %61 = arith.extui %60 : vector<1x32xi1> to vector<1x32xi32>
    %62 = arith.sitofp %61 : vector<1x32xi32> to vector<1x32xf32>
    %c16_i32_96 = arith.constant 16 : i32
    %63 = vector.broadcast %c16_i32_96 : i32 to vector<1x32xi32>
    %64 = arith.cmpi sge, %48, %63 : vector<1x32xi32>
    %c24_i32 = arith.constant 24 : i32
    %65 = vector.broadcast %c24_i32 : i32 to vector<1x32xi32>
    %66 = arith.cmpi slt, %48, %65 : vector<1x32xi32>
    %67 = arith.andi %64, %66 : vector<1x32xi1>
    %68 = arith.extui %67 : vector<1x32xi1> to vector<1x32xi32>
    %69 = arith.sitofp %68 : vector<1x32xi32> to vector<1x32xf32>
    %c24_i32_97 = arith.constant 24 : i32
    %70 = vector.broadcast %c24_i32_97 : i32 to vector<1x32xi32>
    %71 = arith.cmpi sge, %48, %70 : vector<1x32xi32>
    %c32_i32 = arith.constant 32 : i32
    %72 = vector.broadcast %c32_i32 : i32 to vector<1x32xi32>
    %73 = arith.cmpi slt, %48, %72 : vector<1x32xi32>
    %74 = arith.andi %71, %73 : vector<1x32xi1>
    %75 = arith.extui %74 : vector<1x32xi1> to vector<1x32xi32>
    %76 = arith.sitofp %75 : vector<1x32xi32> to vector<1x32xf32>
    %cst = arith.constant dense<0.000000e+00> : vector<8x32xf32>
    %77 = tpu.matmul %0, %2, %cst {dimension_numbers = #tpu.dot_dimension_numbers<[1], [0], [0], [1], [0, 0, 1, 1], [], []>} : vector<8x128xf32>, vector<128x32xf32>, vector<8x32xf32> -> vector<8x32xf32>
    %78 = vector.broadcast %3 : vector<1x32xf32> to vector<8x32xf32>
    %79 = arith.addf %77, %78 : vector<8x32xf32>
    %cst_98 = arith.constant 5.000000e-01 : f32
    %80 = vector.broadcast %cst_98 : f32 to vector<8x32xf32>
    %81 = arith.mulf %79, %80 : vector<8x32xf32>
    %cst_99 = arith.constant 0.707106769 : f32
    %82 = vector.broadcast %cst_99 : f32 to vector<8x32xf32>
    %83 = arith.mulf %79, %82 : vector<8x32xf32>
    %cst_100 = arith.constant 0.000000e+00 : f32
    %84 = vector.broadcast %cst_100 : f32 to vector<8x32xf32>
    %85 = arith.cmpf oge, %83, %84 : vector<8x32xf32>
    %cst_101 = arith.constant 1.000000e+00 : f32
    %cst_102 = arith.constant -1.000000e+00 : f32
    %86 = vector.broadcast %cst_101 : f32 to vector<8x32xf32>
    %87 = vector.broadcast %cst_102 : f32 to vector<8x32xf32>
    %88 = arith.select %85, %86, %87 : vector<8x32xi1>, vector<8x32xf32>
    %89 = math.absf %83 : vector<8x32xf32>
    %cst_103 = arith.constant 0.327591091 : f32
    %90 = vector.broadcast %cst_103 : f32 to vector<8x32xf32>
    %91 = arith.mulf %90, %89 : vector<8x32xf32>
    %cst_104 = arith.constant 1.000000e+00 : f32
    %92 = vector.broadcast %cst_104 : f32 to vector<8x32xf32>
    %93 = arith.addf %92, %91 : vector<8x32xf32>
    %cst_105 = arith.constant 1.000000e+00 : f32
    %94 = vector.broadcast %cst_105 : f32 to vector<8x32xf32>
    %95 = arith.divf %94, %93 : vector<8x32xf32>
    %cst_106 = arith.constant 1.06140542 : f32
    %96 = vector.broadcast %cst_106 : f32 to vector<8x32xf32>
    %97 = arith.mulf %96, %95 : vector<8x32xf32>
    %cst_107 = arith.constant -1.45315206 : f32
    %98 = vector.broadcast %cst_107 : f32 to vector<8x32xf32>
    %99 = arith.addf %97, %98 : vector<8x32xf32>
    %100 = arith.mulf %99, %95 : vector<8x32xf32>
    %cst_108 = arith.constant 1.42141378 : f32
    %101 = vector.broadcast %cst_108 : f32 to vector<8x32xf32>
    %102 = arith.addf %100, %101 : vector<8x32xf32>
    %103 = arith.mulf %102, %95 : vector<8x32xf32>
    %cst_109 = arith.constant -0.284496725 : f32
    %104 = vector.broadcast %cst_109 : f32 to vector<8x32xf32>
    %105 = arith.addf %103, %104 : vector<8x32xf32>
    %106 = arith.mulf %105, %95 : vector<8x32xf32>
    %cst_110 = arith.constant 0.254829586 : f32
    %107 = vector.broadcast %cst_110 : f32 to vector<8x32xf32>
    %108 = arith.addf %106, %107 : vector<8x32xf32>
    %109 = arith.mulf %108, %95 : vector<8x32xf32>
    %cst_111 = arith.constant 0.000000e+00 : f32
    %110 = vector.broadcast %cst_111 : f32 to vector<8x32xf32>
    %111 = arith.subf %110, %89 : vector<8x32xf32>
    %112 = arith.mulf %111, %89 : vector<8x32xf32>
    %113 = math.exp %112 : vector<8x32xf32>
    %114 = arith.mulf %109, %113 : vector<8x32xf32>
    %cst_112 = arith.constant 1.000000e+00 : f32
    %115 = vector.broadcast %cst_112 : f32 to vector<8x32xf32>
    %116 = arith.subf %115, %114 : vector<8x32xf32>
    %117 = arith.mulf %88, %116 : vector<8x32xf32>
    %cst_113 = arith.constant 1.000000e+00 : f32
    %118 = vector.broadcast %cst_113 : f32 to vector<8x32xf32>
    %119 = arith.addf %118, %117 : vector<8x32xf32>
    %120 = arith.mulf %81, %119 : vector<8x32xf32>
    %cst_114 = arith.constant dense<0.000000e+00> : vector<16x32xf32>
    %121 = tpu.matmul %1, %4, %cst_114 {dimension_numbers = #tpu.dot_dimension_numbers<[1], [0], [0], [1], [0, 0, 1, 1], [], []>} : vector<16x128xf32>, vector<128x32xf32>, vector<16x32xf32> -> vector<16x32xf32>
    %122 = vector.broadcast %5 : vector<1x32xf32> to vector<16x32xf32>
    %123 = arith.addf %121, %122 : vector<16x32xf32>
    %cst_115 = arith.constant 5.000000e-01 : f32
    %124 = vector.broadcast %cst_115 : f32 to vector<16x32xf32>
    %125 = arith.mulf %123, %124 : vector<16x32xf32>
    %cst_116 = arith.constant 0.707106769 : f32
    %126 = vector.broadcast %cst_116 : f32 to vector<16x32xf32>
    %127 = arith.mulf %123, %126 : vector<16x32xf32>
    %cst_117 = arith.constant 0.000000e+00 : f32
    %128 = vector.broadcast %cst_117 : f32 to vector<16x32xf32>
    %129 = arith.cmpf oge, %127, %128 : vector<16x32xf32>
    %cst_118 = arith.constant 1.000000e+00 : f32
    %cst_119 = arith.constant -1.000000e+00 : f32
    %130 = vector.broadcast %cst_118 : f32 to vector<16x32xf32>
    %131 = vector.broadcast %cst_119 : f32 to vector<16x32xf32>
    %132 = arith.select %129, %130, %131 : vector<16x32xi1>, vector<16x32xf32>
    %133 = math.absf %127 : vector<16x32xf32>
    %cst_120 = arith.constant 0.327591091 : f32
    %134 = vector.broadcast %cst_120 : f32 to vector<16x32xf32>
    %135 = arith.mulf %134, %133 : vector<16x32xf32>
    %cst_121 = arith.constant 1.000000e+00 : f32
    %136 = vector.broadcast %cst_121 : f32 to vector<16x32xf32>
    %137 = arith.addf %136, %135 : vector<16x32xf32>
    %cst_122 = arith.constant 1.000000e+00 : f32
    %138 = vector.broadcast %cst_122 : f32 to vector<16x32xf32>
    %139 = arith.divf %138, %137 : vector<16x32xf32>
    %cst_123 = arith.constant 1.06140542 : f32
    %140 = vector.broadcast %cst_123 : f32 to vector<16x32xf32>
    %141 = arith.mulf %140, %139 : vector<16x32xf32>
    %cst_124 = arith.constant -1.45315206 : f32
    %142 = vector.broadcast %cst_124 : f32 to vector<16x32xf32>
    %143 = arith.addf %141, %142 : vector<16x32xf32>
    %144 = arith.mulf %143, %139 : vector<16x32xf32>
    %cst_125 = arith.constant 1.42141378 : f32
    %145 = vector.broadcast %cst_125 : f32 to vector<16x32xf32>
    %146 = arith.addf %144, %145 : vector<16x32xf32>
    %147 = arith.mulf %146, %139 : vector<16x32xf32>
    %cst_126 = arith.constant -0.284496725 : f32
    %148 = vector.broadcast %cst_126 : f32 to vector<16x32xf32>
    %149 = arith.addf %147, %148 : vector<16x32xf32>
    %150 = arith.mulf %149, %139 : vector<16x32xf32>
    %cst_127 = arith.constant 0.254829586 : f32
    %151 = vector.broadcast %cst_127 : f32 to vector<16x32xf32>
    %152 = arith.addf %150, %151 : vector<16x32xf32>
    %153 = arith.mulf %152, %139 : vector<16x32xf32>
    %cst_128 = arith.constant 0.000000e+00 : f32
    %154 = vector.broadcast %cst_128 : f32 to vector<16x32xf32>
    %155 = arith.subf %154, %133 : vector<16x32xf32>
    %156 = arith.mulf %155, %133 : vector<16x32xf32>
    %157 = math.exp %156 : vector<16x32xf32>
    %158 = arith.mulf %153, %157 : vector<16x32xf32>
    %cst_129 = arith.constant 1.000000e+00 : f32
    %159 = vector.broadcast %cst_129 : f32 to vector<16x32xf32>
    %160 = arith.subf %159, %158 : vector<16x32xf32>
    %161 = arith.mulf %132, %160 : vector<16x32xf32>
    %cst_130 = arith.constant 1.000000e+00 : f32
    %162 = vector.broadcast %cst_130 : f32 to vector<16x32xf32>
    %163 = arith.addf %162, %161 : vector<16x32xf32>
    %164 = arith.mulf %125, %163 : vector<16x32xf32>
    %cst_131 = arith.constant dense<0.000000e+00> : vector<8x32xf32>
    %165 = tpu.matmul %120, %12, %cst_131 {dimension_numbers = #tpu.dot_dimension_numbers<[1], [0], [0], [1], [0, 0, 1, 1], [], []>} : vector<8x32xf32>, vector<32x32xf32>, vector<8x32xf32> -> vector<8x32xf32>
    %166 = vector.broadcast %13 : vector<1x32xf32> to vector<8x32xf32>
    %167 = arith.addf %165, %166 : vector<8x32xf32>
    %cst_132 = arith.constant dense<0.000000e+00> : vector<16x32xf32>
    %168 = tpu.matmul %164, %14, %cst_132 {dimension_numbers = #tpu.dot_dimension_numbers<[1], [0], [0], [1], [0, 0, 1, 1], [], []>} : vector<16x32xf32>, vector<32x32xf32>, vector<16x32xf32> -> vector<16x32xf32>
    %169 = vector.broadcast %15 : vector<1x32xf32> to vector<16x32xf32>
    %170 = arith.addf %168, %169 : vector<16x32xf32>
    %cst_133 = arith.constant dense<0.000000e+00> : vector<8x32xf32>
    %171 = tpu.matmul %120, %16, %cst_133 {dimension_numbers = #tpu.dot_dimension_numbers<[1], [0], [0], [1], [0, 0, 1, 1], [], []>} : vector<8x32xf32>, vector<32x32xf32>, vector<8x32xf32> -> vector<8x32xf32>
    %172 = vector.broadcast %17 : vector<1x32xf32> to vector<8x32xf32>
    %173 = arith.addf %171, %172 : vector<8x32xf32>
    %cst_134 = arith.constant dense<0.000000e+00> : vector<8x32xf32>
    %174 = tpu.matmul %120, %18, %cst_134 {dimension_numbers = #tpu.dot_dimension_numbers<[1], [0], [0], [1], [0, 0, 1, 1], [], []>} : vector<8x32xf32>, vector<32x32xf32>, vector<8x32xf32> -> vector<8x32xf32>
    %175 = vector.broadcast %19 : vector<1x32xf32> to vector<8x32xf32>
    %176 = arith.addf %174, %175 : vector<8x32xf32>
    %177 = vector.broadcast %55 : vector<1x32xf32> to vector<16x32xf32>
    %178 = arith.mulf %170, %177 : vector<16x32xf32>
    %179 = vector.broadcast %62 : vector<1x32xf32> to vector<16x32xf32>
    %180 = arith.mulf %170, %179 : vector<16x32xf32>
    %181 = vector.broadcast %69 : vector<1x32xf32> to vector<16x32xf32>
    %182 = arith.mulf %170, %181 : vector<16x32xf32>
    %183 = vector.broadcast %76 : vector<1x32xf32> to vector<16x32xf32>
    %184 = arith.mulf %170, %183 : vector<16x32xf32>
    %185 = tpu.concatenate %178, %180, %182, %184 in 0 : vector<16x32xf32>, vector<16x32xf32>, vector<16x32xf32>, vector<16x32xf32> -> vector<64x32xf32>
    %cst_135 = arith.constant dense<0.000000e+00> : vector<64x8xf32>
    %186 = tpu.matmul %185, %173, %cst_135 {dimension_numbers = #tpu.dot_dimension_numbers<[1], [1], [0], [0], [0, 0, 1, 0], [], []>} : vector<64x32xf32>, vector<8x32xf32>, vector<64x8xf32> -> vector<64x8xf32>
    %187 = arith.addf %186, %6 : vector<64x8xf32>
    %cst_136 = arith.constant dense<0xFF800000> : vector<64xf32>
    %188 = vector.multi_reduction <maximumf>, %187, %cst_136 [1] : vector<64x8xf32> to vector<64xf32>
    %189 = vector.shape_cast %188 : vector<64xf32> to vector<64x1xf32>
    %190 = vector.broadcast %189 : vector<64x1xf32> to vector<64x8xf32>
    %191 = arith.subf %187, %190 : vector<64x8xf32>
    %192 = math.exp %191 : vector<64x8xf32>
    %cst_137 = arith.constant dense<0.000000e+00> : vector<64xf32>
    %193 = vector.multi_reduction <add>, %192, %cst_137 [1] : vector<64x8xf32> to vector<64xf32>
    %194 = vector.shape_cast %193 : vector<64xf32> to vector<64x1xf32>
    %195 = tpu.reciprocal %194 {approx = true} : vector<64x1xf32> -> vector<64x1xf32>
    %196 = vector.broadcast %195 : vector<64x1xf32> to vector<64x8xf32>
    %197 = arith.mulf %192, %196 : vector<64x8xf32>
    %cst_138 = arith.constant dense<0.000000e+00> : vector<64x32xf32>
    %198 = tpu.matmul %197, %176, %cst_138 {dimension_numbers = #tpu.dot_dimension_numbers<[1], [0], [0], [1], [0, 0, 1, 1], [], []>} : vector<64x8xf32>, vector<8x32xf32>, vector<64x32xf32> -> vector<64x32xf32>
    %199 = vector.extract_strided_slice %198 {offsets = [0, 0], sizes = [16, 32], strides = [1, 1]} : vector<64x32xf32> to vector<16x32xf32>
    %200 = vector.broadcast %55 : vector<1x32xf32> to vector<16x32xf32>
    %201 = arith.mulf %199, %200 : vector<16x32xf32>
    %202 = vector.extract_strided_slice %198 {offsets = [16, 0], sizes = [16, 32], strides = [1, 1]} : vector<64x32xf32> to vector<16x32xf32>
    %203 = vector.broadcast %62 : vector<1x32xf32> to vector<16x32xf32>
    %204 = arith.mulf %202, %203 : vector<16x32xf32>
    %205 = arith.addf %201, %204 : vector<16x32xf32>
    %206 = vector.extract_strided_slice %198 {offsets = [32, 0], sizes = [16, 32], strides = [1, 1]} : vector<64x32xf32> to vector<16x32xf32>
    %207 = vector.broadcast %69 : vector<1x32xf32> to vector<16x32xf32>
    %208 = arith.mulf %206, %207 : vector<16x32xf32>
    %209 = arith.addf %205, %208 : vector<16x32xf32>
    %210 = vector.extract_strided_slice %198 {offsets = [48, 0], sizes = [16, 32], strides = [1, 1]} : vector<64x32xf32> to vector<16x32xf32>
    %211 = vector.broadcast %76 : vector<1x32xf32> to vector<16x32xf32>
    %212 = arith.mulf %210, %211 : vector<16x32xf32>
    %213 = arith.addf %209, %212 : vector<16x32xf32>
    %214 = vector.broadcast %7 : vector<16x1xf32> to vector<16x32xf32>
    %215 = arith.mulf %213, %214 : vector<16x32xf32>
    %cst_139 = arith.constant dense<0.000000e+00> : vector<16x32xf32>
    %216 = tpu.matmul %164, %20, %cst_139 {dimension_numbers = #tpu.dot_dimension_numbers<[1], [0], [0], [1], [0, 0, 1, 1], [], []>} : vector<16x32xf32>, vector<32x32xf32>, vector<16x32xf32> -> vector<16x32xf32>
    %217 = vector.broadcast %21 : vector<1x32xf32> to vector<16x32xf32>
    %218 = arith.addf %216, %217 : vector<16x32xf32>
    %cst_140 = arith.constant dense<0.000000e+00> : vector<16x32xf32>
    %219 = tpu.matmul %164, %22, %cst_140 {dimension_numbers = #tpu.dot_dimension_numbers<[1], [0], [0], [1], [0, 0, 1, 1], [], []>} : vector<16x32xf32>, vector<32x32xf32>, vector<16x32xf32> -> vector<16x32xf32>
    %220 = vector.broadcast %23 : vector<1x32xf32> to vector<16x32xf32>
    %221 = arith.addf %219, %220 : vector<16x32xf32>
    %222 = vector.broadcast %55 : vector<1x32xf32> to vector<8x32xf32>
    %223 = arith.mulf %167, %222 : vector<8x32xf32>
    %224 = vector.broadcast %62 : vector<1x32xf32> to vector<8x32xf32>
    %225 = arith.mulf %167, %224 : vector<8x32xf32>
    %226 = vector.broadcast %69 : vector<1x32xf32> to vector<8x32xf32>
    %227 = arith.mulf %167, %226 : vector<8x32xf32>
    %228 = vector.broadcast %76 : vector<1x32xf32> to vector<8x32xf32>
    %229 = arith.mulf %167, %228 : vector<8x32xf32>
    %230 = tpu.concatenate %223, %225, %227, %229 in 0 : vector<8x32xf32>, vector<8x32xf32>, vector<8x32xf32>, vector<8x32xf32> -> vector<32x32xf32>
    %cst_141 = arith.constant dense<0.000000e+00> : vector<32x16xf32>
    %231 = tpu.matmul %230, %218, %cst_141 {dimension_numbers = #tpu.dot_dimension_numbers<[1], [1], [0], [0], [0, 0, 1, 0], [], []>} : vector<32x32xf32>, vector<16x32xf32>, vector<32x16xf32> -> vector<32x16xf32>
    %232 = arith.addf %231, %8 : vector<32x16xf32>
    %cst_142 = arith.constant dense<0xFF800000> : vector<32xf32>
    %233 = vector.multi_reduction <maximumf>, %232, %cst_142 [1] : vector<32x16xf32> to vector<32xf32>
    %234 = vector.shape_cast %233 : vector<32xf32> to vector<32x1xf32>
    %235 = vector.broadcast %234 : vector<32x1xf32> to vector<32x16xf32>
    %236 = arith.subf %232, %235 : vector<32x16xf32>
    %237 = math.exp %236 : vector<32x16xf32>
    %cst_143 = arith.constant dense<0.000000e+00> : vector<32xf32>
    %238 = vector.multi_reduction <add>, %237, %cst_143 [1] : vector<32x16xf32> to vector<32xf32>
    %239 = vector.shape_cast %238 : vector<32xf32> to vector<32x1xf32>
    %240 = tpu.reciprocal %239 {approx = true} : vector<32x1xf32> -> vector<32x1xf32>
    %241 = vector.broadcast %240 : vector<32x1xf32> to vector<32x16xf32>
    %242 = arith.mulf %237, %241 : vector<32x16xf32>
    %cst_144 = arith.constant dense<0.000000e+00> : vector<32x32xf32>
    %243 = tpu.matmul %242, %221, %cst_144 {dimension_numbers = #tpu.dot_dimension_numbers<[1], [0], [0], [1], [0, 0, 1, 1], [], []>} : vector<32x16xf32>, vector<16x32xf32>, vector<32x32xf32> -> vector<32x32xf32>
    %244 = vector.extract_strided_slice %243 {offsets = [0, 0], sizes = [8, 32], strides = [1, 1]} : vector<32x32xf32> to vector<8x32xf32>
    %245 = vector.broadcast %55 : vector<1x32xf32> to vector<8x32xf32>
    %246 = arith.mulf %244, %245 : vector<8x32xf32>
    %247 = vector.extract_strided_slice %243 {offsets = [8, 0], sizes = [8, 32], strides = [1, 1]} : vector<32x32xf32> to vector<8x32xf32>
    %248 = vector.broadcast %62 : vector<1x32xf32> to vector<8x32xf32>
    %249 = arith.mulf %247, %248 : vector<8x32xf32>
    %250 = arith.addf %246, %249 : vector<8x32xf32>
    %251 = vector.extract_strided_slice %243 {offsets = [16, 0], sizes = [8, 32], strides = [1, 1]} : vector<32x32xf32> to vector<8x32xf32>
    %252 = vector.broadcast %69 : vector<1x32xf32> to vector<8x32xf32>
    %253 = arith.mulf %251, %252 : vector<8x32xf32>
    %254 = arith.addf %250, %253 : vector<8x32xf32>
    %255 = vector.extract_strided_slice %243 {offsets = [24, 0], sizes = [8, 32], strides = [1, 1]} : vector<32x32xf32> to vector<8x32xf32>
    %256 = vector.broadcast %76 : vector<1x32xf32> to vector<8x32xf32>
    %257 = arith.mulf %255, %256 : vector<8x32xf32>
    %258 = arith.addf %254, %257 : vector<8x32xf32>
    %259 = vector.broadcast %9 : vector<8x1xf32> to vector<8x32xf32>
    %260 = arith.mulf %258, %259 : vector<8x32xf32>
    %cst_145 = arith.constant dense<0.000000e+00> : vector<16x32xf32>
    %261 = tpu.matmul %164, %24, %cst_145 {dimension_numbers = #tpu.dot_dimension_numbers<[1], [0], [0], [1], [0, 0, 1, 1], [], []>} : vector<16x32xf32>, vector<32x32xf32>, vector<16x32xf32> -> vector<16x32xf32>
    %262 = vector.broadcast %25 : vector<1x32xf32> to vector<16x32xf32>
    %263 = arith.addf %261, %262 : vector<16x32xf32>
    %cst_146 = arith.constant dense<0.000000e+00> : vector<16x32xf32>
    %264 = tpu.matmul %164, %26, %cst_146 {dimension_numbers = #tpu.dot_dimension_numbers<[1], [0], [0], [1], [0, 0, 1, 1], [], []>} : vector<16x32xf32>, vector<32x32xf32>, vector<16x32xf32> -> vector<16x32xf32>
    %265 = vector.broadcast %27 : vector<1x32xf32> to vector<16x32xf32>
    %266 = arith.addf %264, %265 : vector<16x32xf32>
    %267 = vector.broadcast %55 : vector<1x32xf32> to vector<16x32xf32>
    %268 = arith.mulf %170, %267 : vector<16x32xf32>
    %269 = vector.broadcast %62 : vector<1x32xf32> to vector<16x32xf32>
    %270 = arith.mulf %170, %269 : vector<16x32xf32>
    %271 = vector.broadcast %69 : vector<1x32xf32> to vector<16x32xf32>
    %272 = arith.mulf %170, %271 : vector<16x32xf32>
    %273 = vector.broadcast %76 : vector<1x32xf32> to vector<16x32xf32>
    %274 = arith.mulf %170, %273 : vector<16x32xf32>
    %275 = tpu.concatenate %268, %270, %272, %274 in 0 : vector<16x32xf32>, vector<16x32xf32>, vector<16x32xf32>, vector<16x32xf32> -> vector<64x32xf32>
    %cst_147 = arith.constant dense<0.000000e+00> : vector<64x16xf32>
    %276 = tpu.matmul %275, %263, %cst_147 {dimension_numbers = #tpu.dot_dimension_numbers<[1], [1], [0], [0], [0, 0, 1, 0], [], []>} : vector<64x32xf32>, vector<16x32xf32>, vector<64x16xf32> -> vector<64x16xf32>
    %277 = arith.addf %276, %10 : vector<64x16xf32>
    %cst_148 = arith.constant dense<0xFF800000> : vector<64xf32>
    %278 = vector.multi_reduction <maximumf>, %277, %cst_148 [1] : vector<64x16xf32> to vector<64xf32>
    %279 = vector.shape_cast %278 : vector<64xf32> to vector<64x1xf32>
    %280 = vector.broadcast %279 : vector<64x1xf32> to vector<64x16xf32>
    %281 = arith.subf %277, %280 : vector<64x16xf32>
    %282 = math.exp %281 : vector<64x16xf32>
    %cst_149 = arith.constant dense<0.000000e+00> : vector<64xf32>
    %283 = vector.multi_reduction <add>, %282, %cst_149 [1] : vector<64x16xf32> to vector<64xf32>
    %284 = vector.shape_cast %283 : vector<64xf32> to vector<64x1xf32>
    %285 = tpu.reciprocal %284 {approx = true} : vector<64x1xf32> -> vector<64x1xf32>
    %286 = vector.broadcast %285 : vector<64x1xf32> to vector<64x16xf32>
    %287 = arith.mulf %282, %286 : vector<64x16xf32>
    %cst_150 = arith.constant dense<0.000000e+00> : vector<64x32xf32>
    %288 = tpu.matmul %287, %266, %cst_150 {dimension_numbers = #tpu.dot_dimension_numbers<[1], [0], [0], [1], [0, 0, 1, 1], [], []>} : vector<64x16xf32>, vector<16x32xf32>, vector<64x32xf32> -> vector<64x32xf32>
    %289 = vector.extract_strided_slice %288 {offsets = [0, 0], sizes = [16, 32], strides = [1, 1]} : vector<64x32xf32> to vector<16x32xf32>
    %290 = vector.broadcast %55 : vector<1x32xf32> to vector<16x32xf32>
    %291 = arith.mulf %289, %290 : vector<16x32xf32>
    %292 = vector.extract_strided_slice %288 {offsets = [16, 0], sizes = [16, 32], strides = [1, 1]} : vector<64x32xf32> to vector<16x32xf32>
    %293 = vector.broadcast %62 : vector<1x32xf32> to vector<16x32xf32>
    %294 = arith.mulf %292, %293 : vector<16x32xf32>
    %295 = arith.addf %291, %294 : vector<16x32xf32>
    %296 = vector.extract_strided_slice %288 {offsets = [32, 0], sizes = [16, 32], strides = [1, 1]} : vector<64x32xf32> to vector<16x32xf32>
    %297 = vector.broadcast %69 : vector<1x32xf32> to vector<16x32xf32>
    %298 = arith.mulf %296, %297 : vector<16x32xf32>
    %299 = arith.addf %295, %298 : vector<16x32xf32>
    %300 = vector.extract_strided_slice %288 {offsets = [48, 0], sizes = [16, 32], strides = [1, 1]} : vector<64x32xf32> to vector<16x32xf32>
    %301 = vector.broadcast %76 : vector<1x32xf32> to vector<16x32xf32>
    %302 = arith.mulf %300, %301 : vector<16x32xf32>
    %303 = arith.addf %299, %302 : vector<16x32xf32>
    %304 = vector.broadcast %11 : vector<16x1xf32> to vector<16x32xf32>
    %305 = arith.mulf %303, %304 : vector<16x32xf32>
    %cst_151 = arith.constant 1.000000e+00 : f32
    %306 = vector.broadcast %cst_151 : f32 to vector<8x32xf32>
    %307 = arith.mulf %260, %306 : vector<8x32xf32>
    %cst_152 = arith.constant dense<0.000000e+00> : vector<8x32xf32>
    %308 = tpu.matmul %307, %28, %cst_152 {dimension_numbers = #tpu.dot_dimension_numbers<[1], [0], [0], [1], [0, 0, 1, 1], [], []>} : vector<8x32xf32>, vector<32x32xf32>, vector<8x32xf32> -> vector<8x32xf32>
    %309 = vector.broadcast %29 : vector<1x32xf32> to vector<8x32xf32>
    %310 = arith.addf %308, %309 : vector<8x32xf32>
    %cst_153 = arith.constant 0.268941432 : f32
    %311 = vector.broadcast %cst_153 : f32 to vector<8x32xf32>
    %312 = arith.mulf %311, %120 : vector<8x32xf32>
    %313 = arith.addf %310, %312 : vector<8x32xf32>
    %cst_154 = arith.constant dense<0.000000e+00> : vector<8xf32>
    %314 = vector.multi_reduction <add>, %313, %cst_154 [1] : vector<8x32xf32> to vector<8xf32>
    %315 = vector.shape_cast %314 : vector<8xf32> to vector<8x1xf32>
    %cst_155 = arith.constant 3.200000e+01 : f32
    %316 = vector.broadcast %cst_155 : f32 to vector<8x1xf32>
    %317 = arith.divf %315, %316 : vector<8x1xf32>
    %318 = vector.broadcast %317 : vector<8x1xf32> to vector<8x32xf32>
    %319 = arith.subf %313, %318 : vector<8x32xf32>
    %320 = arith.mulf %319, %319 : vector<8x32xf32>
    %cst_156 = arith.constant dense<0.000000e+00> : vector<8xf32>
    %321 = vector.multi_reduction <add>, %320, %cst_156 [1] : vector<8x32xf32> to vector<8xf32>
    %322 = vector.shape_cast %321 : vector<8xf32> to vector<8x1xf32>
    %cst_157 = arith.constant 3.200000e+01 : f32
    %323 = vector.broadcast %cst_157 : f32 to vector<8x1xf32>
    %324 = arith.divf %322, %323 : vector<8x1xf32>
    %325 = vector.broadcast %317 : vector<8x1xf32> to vector<8x32xf32>
    %326 = arith.subf %313, %325 : vector<8x32xf32>
    %cst_158 = arith.constant 9.99999974E-6 : f32
    %327 = vector.broadcast %cst_158 : f32 to vector<8x1xf32>
    %328 = arith.addf %324, %327 : vector<8x1xf32>
    %329 = math.rsqrt %328 : vector<8x1xf32>
    %330 = vector.broadcast %329 : vector<8x1xf32> to vector<8x32xf32>
    %331 = arith.mulf %326, %330 : vector<8x32xf32>
    %332 = vector.broadcast %30 : vector<1x32xf32> to vector<8x32xf32>
    %333 = arith.mulf %331, %332 : vector<8x32xf32>
    %334 = vector.broadcast %31 : vector<1x32xf32> to vector<8x32xf32>
    %335 = arith.addf %333, %334 : vector<8x32xf32>
    %336 = arith.addf %215, %305 : vector<16x32xf32>
    %cst_159 = arith.constant 5.000000e-01 : f32
    %337 = vector.broadcast %cst_159 : f32 to vector<16x32xf32>
    %338 = arith.mulf %336, %337 : vector<16x32xf32>
    %cst_160 = arith.constant dense<0.000000e+00> : vector<16x32xf32>
    %339 = tpu.matmul %338, %32, %cst_160 {dimension_numbers = #tpu.dot_dimension_numbers<[1], [0], [0], [1], [0, 0, 1, 1], [], []>} : vector<16x32xf32>, vector<32x32xf32>, vector<16x32xf32> -> vector<16x32xf32>
    %340 = vector.broadcast %33 : vector<1x32xf32> to vector<16x32xf32>
    %341 = arith.addf %339, %340 : vector<16x32xf32>
    %cst_161 = arith.constant 0.268941432 : f32
    %342 = vector.broadcast %cst_161 : f32 to vector<16x32xf32>
    %343 = arith.mulf %342, %164 : vector<16x32xf32>
    %344 = arith.addf %341, %343 : vector<16x32xf32>
    %cst_162 = arith.constant dense<0.000000e+00> : vector<16xf32>
    %345 = vector.multi_reduction <add>, %344, %cst_162 [1] : vector<16x32xf32> to vector<16xf32>
    %346 = vector.shape_cast %345 : vector<16xf32> to vector<16x1xf32>
    %cst_163 = arith.constant 3.200000e+01 : f32
    %347 = vector.broadcast %cst_163 : f32 to vector<16x1xf32>
    %348 = arith.divf %346, %347 : vector<16x1xf32>
    %349 = vector.broadcast %348 : vector<16x1xf32> to vector<16x32xf32>
    %350 = arith.subf %344, %349 : vector<16x32xf32>
    %351 = arith.mulf %350, %350 : vector<16x32xf32>
    %cst_164 = arith.constant dense<0.000000e+00> : vector<16xf32>
    %352 = vector.multi_reduction <add>, %351, %cst_164 [1] : vector<16x32xf32> to vector<16xf32>
    %353 = vector.shape_cast %352 : vector<16xf32> to vector<16x1xf32>
    %cst_165 = arith.constant 3.200000e+01 : f32
    %354 = vector.broadcast %cst_165 : f32 to vector<16x1xf32>
    %355 = arith.divf %353, %354 : vector<16x1xf32>
    %356 = vector.broadcast %348 : vector<16x1xf32> to vector<16x32xf32>
    %357 = arith.subf %344, %356 : vector<16x32xf32>
    %cst_166 = arith.constant 9.99999974E-6 : f32
    %358 = vector.broadcast %cst_166 : f32 to vector<16x1xf32>
    %359 = arith.addf %355, %358 : vector<16x1xf32>
    %360 = math.rsqrt %359 : vector<16x1xf32>
    %361 = vector.broadcast %360 : vector<16x1xf32> to vector<16x32xf32>
    %362 = arith.mulf %357, %361 : vector<16x32xf32>
    %363 = vector.broadcast %34 : vector<1x32xf32> to vector<16x32xf32>
    %364 = arith.mulf %362, %363 : vector<16x32xf32>
    %365 = vector.broadcast %35 : vector<1x32xf32> to vector<16x32xf32>
    %366 = arith.addf %364, %365 : vector<16x32xf32>
    %cst_167 = arith.constant dense<0.000000e+00> : vector<8x32xf32>
    %367 = tpu.matmul %335, %36, %cst_167 {dimension_numbers = #tpu.dot_dimension_numbers<[1], [0], [0], [1], [0, 0, 1, 1], [], []>} : vector<8x32xf32>, vector<32x32xf32>, vector<8x32xf32> -> vector<8x32xf32>
    %368 = vector.broadcast %37 : vector<1x32xf32> to vector<8x32xf32>
    %369 = arith.addf %367, %368 : vector<8x32xf32>
    %cst_168 = arith.constant dense<0.000000e+00> : vector<16x32xf32>
    %370 = tpu.matmul %366, %38, %cst_168 {dimension_numbers = #tpu.dot_dimension_numbers<[1], [0], [0], [1], [0, 0, 1, 1], [], []>} : vector<16x32xf32>, vector<32x32xf32>, vector<16x32xf32> -> vector<16x32xf32>
    %371 = vector.broadcast %39 : vector<1x32xf32> to vector<16x32xf32>
    %372 = arith.addf %370, %371 : vector<16x32xf32>
    %cst_169 = arith.constant dense<0.000000e+00> : vector<16x32xf32>
    %373 = tpu.matmul %366, %40, %cst_169 {dimension_numbers = #tpu.dot_dimension_numbers<[1], [0], [0], [1], [0, 0, 1, 1], [], []>} : vector<16x32xf32>, vector<32x32xf32>, vector<16x32xf32> -> vector<16x32xf32>
    %374 = vector.broadcast %41 : vector<1x32xf32> to vector<16x32xf32>
    %375 = arith.addf %373, %374 : vector<16x32xf32>
    %376 = vector.broadcast %55 : vector<1x32xf32> to vector<8x32xf32>
    %377 = arith.mulf %369, %376 : vector<8x32xf32>
    %378 = vector.broadcast %62 : vector<1x32xf32> to vector<8x32xf32>
    %379 = arith.mulf %369, %378 : vector<8x32xf32>
    %380 = vector.broadcast %69 : vector<1x32xf32> to vector<8x32xf32>
    %381 = arith.mulf %369, %380 : vector<8x32xf32>
    %382 = vector.broadcast %76 : vector<1x32xf32> to vector<8x32xf32>
    %383 = arith.mulf %369, %382 : vector<8x32xf32>
    %384 = tpu.concatenate %377, %379, %381, %383 in 0 : vector<8x32xf32>, vector<8x32xf32>, vector<8x32xf32>, vector<8x32xf32> -> vector<32x32xf32>
    %cst_170 = arith.constant dense<0.000000e+00> : vector<32x16xf32>
    %385 = tpu.matmul %384, %372, %cst_170 {dimension_numbers = #tpu.dot_dimension_numbers<[1], [1], [0], [0], [0, 0, 1, 0], [], []>} : vector<32x32xf32>, vector<16x32xf32>, vector<32x16xf32> -> vector<32x16xf32>
    %386 = arith.addf %385, %8 : vector<32x16xf32>
    %cst_171 = arith.constant dense<0xFF800000> : vector<32xf32>
    %387 = vector.multi_reduction <maximumf>, %386, %cst_171 [1] : vector<32x16xf32> to vector<32xf32>
    %388 = vector.shape_cast %387 : vector<32xf32> to vector<32x1xf32>
    %389 = vector.broadcast %388 : vector<32x1xf32> to vector<32x16xf32>
    %390 = arith.subf %386, %389 : vector<32x16xf32>
    %391 = math.exp %390 : vector<32x16xf32>
    %cst_172 = arith.constant dense<0.000000e+00> : vector<32xf32>
    %392 = vector.multi_reduction <add>, %391, %cst_172 [1] : vector<32x16xf32> to vector<32xf32>
    %393 = vector.shape_cast %392 : vector<32xf32> to vector<32x1xf32>
    %394 = tpu.reciprocal %393 {approx = true} : vector<32x1xf32> -> vector<32x1xf32>
    %395 = vector.broadcast %394 : vector<32x1xf32> to vector<32x16xf32>
    %396 = arith.mulf %391, %395 : vector<32x16xf32>
    %cst_173 = arith.constant dense<0.000000e+00> : vector<32x32xf32>
    %397 = tpu.matmul %396, %375, %cst_173 {dimension_numbers = #tpu.dot_dimension_numbers<[1], [0], [0], [1], [0, 0, 1, 1], [], []>} : vector<32x16xf32>, vector<16x32xf32>, vector<32x32xf32> -> vector<32x32xf32>
    %398 = vector.extract_strided_slice %397 {offsets = [0, 0], sizes = [8, 32], strides = [1, 1]} : vector<32x32xf32> to vector<8x32xf32>
    %399 = vector.broadcast %55 : vector<1x32xf32> to vector<8x32xf32>
    %400 = arith.mulf %398, %399 : vector<8x32xf32>
    %401 = vector.extract_strided_slice %397 {offsets = [8, 0], sizes = [8, 32], strides = [1, 1]} : vector<32x32xf32> to vector<8x32xf32>
    %402 = vector.broadcast %62 : vector<1x32xf32> to vector<8x32xf32>
    %403 = arith.mulf %401, %402 : vector<8x32xf32>
    %404 = arith.addf %400, %403 : vector<8x32xf32>
    %405 = vector.extract_strided_slice %397 {offsets = [16, 0], sizes = [8, 32], strides = [1, 1]} : vector<32x32xf32> to vector<8x32xf32>
    %406 = vector.broadcast %69 : vector<1x32xf32> to vector<8x32xf32>
    %407 = arith.mulf %405, %406 : vector<8x32xf32>
    %408 = arith.addf %404, %407 : vector<8x32xf32>
    %409 = vector.extract_strided_slice %397 {offsets = [24, 0], sizes = [8, 32], strides = [1, 1]} : vector<32x32xf32> to vector<8x32xf32>
    %410 = vector.broadcast %76 : vector<1x32xf32> to vector<8x32xf32>
    %411 = arith.mulf %409, %410 : vector<8x32xf32>
    %412 = arith.addf %408, %411 : vector<8x32xf32>
    %413 = vector.broadcast %9 : vector<8x1xf32> to vector<8x32xf32>
    %414 = arith.mulf %412, %413 : vector<8x32xf32>
    %cst_174 = arith.constant 1.000000e+00 : f32
    %415 = vector.broadcast %cst_174 : f32 to vector<8x32xf32>
    %416 = arith.mulf %414, %415 : vector<8x32xf32>
    %cst_175 = arith.constant dense<0.000000e+00> : vector<8x32xf32>
    %417 = tpu.matmul %416, %42, %cst_175 {dimension_numbers = #tpu.dot_dimension_numbers<[1], [0], [0], [1], [0, 0, 1, 1], [], []>} : vector<8x32xf32>, vector<32x32xf32>, vector<8x32xf32> -> vector<8x32xf32>
    %418 = vector.broadcast %43 : vector<1x32xf32> to vector<8x32xf32>
    %419 = arith.addf %417, %418 : vector<8x32xf32>
    %cst_176 = arith.constant 0.268941432 : f32
    %420 = vector.broadcast %cst_176 : f32 to vector<8x32xf32>
    %421 = arith.mulf %420, %335 : vector<8x32xf32>
    %422 = arith.addf %419, %421 : vector<8x32xf32>
    %cst_177 = arith.constant dense<0.000000e+00> : vector<8xf32>
    %423 = vector.multi_reduction <add>, %422, %cst_177 [1] : vector<8x32xf32> to vector<8xf32>
    %424 = vector.shape_cast %423 : vector<8xf32> to vector<8x1xf32>
    %cst_178 = arith.constant 3.200000e+01 : f32
    %425 = vector.broadcast %cst_178 : f32 to vector<8x1xf32>
    %426 = arith.divf %424, %425 : vector<8x1xf32>
    %427 = vector.broadcast %426 : vector<8x1xf32> to vector<8x32xf32>
    %428 = arith.subf %422, %427 : vector<8x32xf32>
    %429 = arith.mulf %428, %428 : vector<8x32xf32>
    %cst_179 = arith.constant dense<0.000000e+00> : vector<8xf32>
    %430 = vector.multi_reduction <add>, %429, %cst_179 [1] : vector<8x32xf32> to vector<8xf32>
    %431 = vector.shape_cast %430 : vector<8xf32> to vector<8x1xf32>
    %cst_180 = arith.constant 3.200000e+01 : f32
    %432 = vector.broadcast %cst_180 : f32 to vector<8x1xf32>
    %433 = arith.divf %431, %432 : vector<8x1xf32>
    %434 = vector.broadcast %426 : vector<8x1xf32> to vector<8x32xf32>
    %435 = arith.subf %422, %434 : vector<8x32xf32>
    %cst_181 = arith.constant 9.99999974E-6 : f32
    %436 = vector.broadcast %cst_181 : f32 to vector<8x1xf32>
    %437 = arith.addf %433, %436 : vector<8x1xf32>
    %438 = math.rsqrt %437 : vector<8x1xf32>
    %439 = vector.broadcast %438 : vector<8x1xf32> to vector<8x32xf32>
    %440 = arith.mulf %435, %439 : vector<8x32xf32>
    %441 = vector.broadcast %44 : vector<1x32xf32> to vector<8x32xf32>
    %442 = arith.mulf %440, %441 : vector<8x32xf32>
    %443 = vector.broadcast %45 : vector<1x32xf32> to vector<8x32xf32>
    %444 = arith.addf %442, %443 : vector<8x32xf32>
    %cst_182 = arith.constant dense<0.000000e+00> : vector<8x8xf32>
    %445 = tpu.matmul %444, %46, %cst_182 {dimension_numbers = #tpu.dot_dimension_numbers<[1], [0], [0], [1], [0, 0, 1, 1], [], []>} : vector<8x32xf32>, vector<32x8xf32>, vector<8x8xf32> -> vector<8x8xf32>
    %446 = vector.broadcast %47 : vector<1x8xf32> to vector<8x8xf32>
    %447 = arith.addf %445, %446 : vector<8x8xf32>
    %c0_183 = arith.constant 0 : index
    %c0_184 = arith.constant 0 : index
    %448 = vector.load %arg62[%c0_183, %c0_184] : memref<8x8xf32, #tpu.memory_space<vmem>>, vector<8x8xf32>
    tpu.vector_store %arg62[%c0_183, %c0_184], %447 {strides = array<i32>} : memref<8x8xf32, #tpu.memory_space<vmem>>, vector<8x8xf32>,
    return
  }
}

</mosaic_0001>

<bundles_post_ra>
// kernel: tpu_custom_call.1
= control target key start
LH: loop header
LB: loop body
LE: loop exit
PB: predicated region body
PF: predicated region fallthrough
CT: control target
= control target key end

     0   :  { %s3219_s6 = smov 1   ;;  %s3220_s10 = smov 2   ;;  %s4267_s0 = inlined_call_operand.smem [shape: u32[63], index: -1, kind: input, shape index: {}] }
   0x1   :  { %s3310_s5 = sld [smem:[%s4267_s0]]   ;;  %s3221_s14 = smov 3  }
   0x2   :  { %s3315_s9 = sld [smem:[%s4267_s0 + %s3219_s6]]   ;;  %s3222_s18 = smov 4  }
   0x3   :  { %s3320_s13 = sld [smem:[%s4267_s0 + %s3220_s10]]   ;;  %s3223_s22 = smov 5  }
   0x4   :  { %s3325_s17 = sld [smem:[%s4267_s0 + %s3221_s14]]   ;;  %s3224_s26 = smov 6  }
   0x5   :  { %s3330_s21 = sld [smem:[%s4267_s0 + %s3222_s18]]   ;;  %s3225_s30 = smov 7  }
   0x6   :  { %s3335_s25 = sld [smem:[%s4267_s0 + %s3223_s22]]   ;;  %s3226_s4 = smov 8  }
   0x7   :  { %4296 = sst [smem:[#allocation52_spill]] %s3310_s5  ;;  %s3227_s10 = smov 9  }
   0x8   :  { %s3340_s29 = sld [smem:[%s4267_s0 + %s3224_s26]]   ;;  %s3228_s15 = smov 10  }
   0x9   :  { %4297 = sst [smem:[#allocation53_spill]] %s3320_s13  ;;  %s3229_s20 = smov 11  }
   0xa   :  { %4298 = sst [smem:[#allocation54_spill]] %s3325_s17  ;;  %s3230_s26 = smov 12  }
   0xb   :  { %4299 = sst [smem:[#allocation55_spill]] %s3330_s21  ;;  %s3231_s1 = smov 13  }
   0xc   :  { %s3345_s3 = sld [smem:[%s4267_s0 + %s3225_s30]]   ;;  %s3232_s7 = smov 14  }
   0xd   :  { %s3350_s8 = sld [smem:[%s4267_s0 + %s3226_s4]]   ;;  %s3234_s22 = smov 16  }
   0xe   :  { %4300 = sst [smem:[#allocation56_spill]] %s3340_s29  ;;  %s3235_s28 = smov 17  }
   0xf   :  { %s3355_s14 = sld [smem:[%s4267_s0 + %s3227_s10]]  }
  0x10   :  { %s3360_s19 = sld [smem:[%s4267_s0 + %s3228_s15]]   ;;  %s3233_s15 = smov 15  }
  0x11   :  { %s3365_s24 = sld [smem:[%s4267_s0 + %s3229_s20]]  }
  0x12   :  { %4301 = sst [smem:[#allocation57_spill]] %s3345_s3 }
  0x13   :  { %4302 = sst [smem:[#allocation58_spill]] %s3350_s8 }
  0x14   :  { %s3370_s30 = sld [smem:[%s4267_s0 + %s3230_s26]]  }
  0x15   :  { %4303 = sst [smem:[#allocation59_spill]] %s3355_s14 }
  0x16   :  { %4304 = sst [smem:[#allocation60_spill]] %s3360_s19 }
  0x17   :  { %4305 = sst [smem:[#allocation61_spill]] %s3365_s24 }
  0x18   :  { %s3375_s6 = sld [smem:[%s4267_s0 + %s3231_s1]]  }
  0x19   :  { %s3380_s12 = sld [smem:[%s4267_s0 + %s3232_s7]]   ;;  %s3236_s7 = smov 18  }
  0x1a   :  { %4306 = sst [smem:[#allocation62_spill]] %s3370_s30 }
  0x1b   :  { %s3385_s20 = sld [smem:[%s4267_s0 + %s3233_s15]]   ;;  %s3237_s15 = smov 19  }
  0x1c   :  { %s3390_s27 = sld [smem:[%s4267_s0 + %s3234_s22]]   ;;  %s3238_s22 = smov 20  }
  0x1d   :  { %s3395_s4 = sld [smem:[%s4267_s0 + %s3235_s28]]   ;;  %s3239_s28 = smov 21  }
  0x1e   :  { %s3400_s14 = sld [smem:[%s4267_s0 + %s3236_s7]]   ;;  %s3240_s7 = smov 22  }
  0x1f   :  { %4307 = sst [smem:[#allocation63_spill]] %s3380_s12 }
  0x20   :  { %s3405_s24 = sld [smem:[%s4267_s0 + %s3237_s15]]   ;;  %s3241_s15 = smov 23  }
  0x21   :  { %s3410_s3 = sld [smem:[%s4267_s0 + %s3238_s22]]   ;;  %s3242_s22 = smov 24  }
  0x22   :  { %4308 = sst [smem:[#allocation64_spill]] %s3390_s27 }
  0x23   :  { %s3415_s19 = sld [smem:[%s4267_s0 + %s3239_s28]]   ;;  %s3243_s28 = smov 25  }
  0x24   :  { %4309 = sst [smem:[#allocation65_spill]] %s3400_s14 }
  0x25   :  { %s3420_s29 = sld [smem:[%s4267_s0 + %s3240_s7]]   ;;  %s3244_s7 = smov 26  }
  0x26   :  { %s3425_s8 = sld [smem:[%s4267_s0 + %s3241_s15]]   ;;  %s3245_s15 = smov 27  }
  0x27   :  { %4310 = sst [smem:[#allocation66_spill]] %s3410_s3 }
  0x28   :  { %s3430_s14 = sld [smem:[%s4267_s0 + %s3242_s22]]   ;;  %s3246_s22 = smov 28  }
  0x29   :  { %4311 = sst [smem:[#allocation67_spill]] %s3415_s19 }
  0x2a   :  { %s3435_s27 = sld [smem:[%s4267_s0 + %s3243_s28]]   ;;  %s3247_s28 = smov 29  }
  0x2b   :  { %4312 = sst [smem:[#allocation68_spill]] %s3420_s29 }
  0x2c   :  { %s3440_s29 = sld [smem:[%s4267_s0 + %s3244_s7]]   ;;  %s3248_s7 = smov 30  }
  0x2d   :  { %s3445_s3 = sld [smem:[%s4267_s0 + %s3245_s15]]   ;;  %s3249_s15 = smov 31  }
  0x2e   :  { %4313 = sst [smem:[#allocation69_spill]] %s3430_s14 }
  0x2f   :  { %s3450_s14 = sld [smem:[%s4267_s0 + %s3246_s22]]   ;;  %s3250_s22 = smov 32  }
  0x30   :  { %4314 = sst [smem:[#allocation70_spill]] %s3435_s27 }
  0x31   :  { %s3455_s12 = sld [smem:[%s4267_s0 + %s3247_s28]]   ;;  %s3251_s28 = smov 33  }
  0x32   :  { %4315 = sst [smem:[#allocation71_spill]] %s3440_s29 }
  0x33   :  { %s3460_s29 = sld [smem:[%s4267_s0 + %s3248_s7]]   ;;  %s3252_s7 = smov 34  }
  0x34   :  { %s3465_s30 = sld [smem:[%s4267_s0 + %s3249_s15]]   ;;  %s3253_s15 = smov 35  }
  0x35   :  { %4316 = sst [smem:[#allocation72_spill]] %s3450_s14 }
  0x36   :  { %s3470_s14 = sld [smem:[%s4267_s0 + %s3250_s22]]   ;;  %s3254_s22 = smov 36  }
  0x37   :  { %4317 = sst [smem:[#allocation73_spill]] %s3455_s12 }
  0x38   :  { %s3475_s17 = sld [smem:[%s4267_s0 + %s3251_s28]]   ;;  %s3255_s28 = smov 37  }
  0x39   :  { %s3480_s5 = sld [smem:[%s4267_s0 + %s3252_s7]]   ;;  %s3256_s7 = smov 39  }
  0x3a   :  { %4318 = sst [smem:[#allocation74_spill]] %s3465_s30 }
  0x3b   :  { %s3485_s21 = sld [smem:[%s4267_s0 + %s3253_s15]]   ;;  %s3257_s15 = smov 41  }
  0x3c   :  { %4319 = sst [smem:[#allocation75_spill]] %s3470_s14 }
  0x3d   :  { %s3490_s14 = sld [smem:[%s4267_s0 + %s3254_s22]]   ;;  %s3258_s22 = smov 44  }
  0x3e   :  { %s3495_s13 = sld [smem:[%s4267_s0 + %s3255_s28]]   ;;  %s3259_s28 = smov 45  }
  0x3f   :  { %4320 = sst [smem:[#allocation76_spill]] %s3480_s5 }
  0x40   :  { %s3500_s5 = sld [smem:[%s4267_s0 + %s3256_s7]]   ;;  %s3260_s7 = smov 46  }
  0x41   :  { %s3505_s30 = sld [smem:[%s4267_s0 + %s3257_s15]]   ;;  %s3261_s15 = smov 47  }
  0x42   :  { %s3520_s12 = sld [smem:[%s4267_s0 + %s3260_s7]]   ;;  %s3264_s7 = smov 52  }
  0x43   :  { %4321 = sst [smem:[#allocation77_spill]] %s3490_s14 }
  0x44   :  { %4322 = sst [smem:[#allocation78_spill]] %s3495_s13 }
  0x45   :  { %s3510_s14 = sld [smem:[%s4267_s0 + %s3258_s22]]   ;;  %s3262_s22 = smov 48  }
  0x46   :  { %s3515_s13 = sld [smem:[%s4267_s0 + %s3259_s28]]   ;;  %s3263_s28 = smov 50  }
  0x47   :  { %4323 = sst [smem:[#allocation79_spill]] %s3505_s30 }
  0x48   :  { %4326 = sst [smem:[#allocation82_spill]] %s3520_s12 }
  0x49   :  { %s3525_s30 = sld [smem:[%s4267_s0 + %s3261_s15]]   ;;  %s3265_s15 = smov 53  }
  0x4a   :  { %s3540_s12 = sld [smem:[%s4267_s0 + %s3264_s7]]   ;;  %s3268_s7 = smov 56  }
  0x4b   :  { %4324 = sst [smem:[#allocation80_spill]] %s3510_s14 }
  0x4c   :  { %4325 = sst [smem:[#allocation81_spill]] %s3515_s13 }
  0x4d   :  { %s3530_s14 = sld [smem:[%s4267_s0 + %s3262_s22]]   ;;  %s3266_s22 = smov 54  }
  0x4e   :  { %s3535_s13 = sld [smem:[%s4267_s0 + %s3263_s28]]   ;;  %s3267_s28 = smov 55  }
  0x4f   :  { %4327 = sst [smem:[#allocation83_spill]] %s3525_s30 }
  0x50   :  { %s3545_s30 = sld [smem:[%s4267_s0 + %s3265_s15]]   ;;  %s3269_s15 = smov 60  }
  0x51   :  { %s3550_s27 = sld [smem:[%s4267_s0 + %s3266_s22]]   ;;  %s3270_s22 = smov 61  }
  0x52   :  { %s3560_s19 = sld [smem:[%s4267_s0 + %s3268_s7]]  }
  0x54   :  { %4328 = sst [smem:[#allocation84_spill]] %s3535_s13 }
  0x55   :  { %s3555_s13 = sld [smem:[%s4267_s0 + %s3267_s28]]   ;;  %s3271_s28 = smov 62  }
  0x56   :  { %4329 = sst [smem:[#allocation85_spill]] %s3545_s30 }
  0x57   :  { %4330 = sst [smem:[#allocation86_spill]] %s3550_s27 }
  0x58   :  { %s3565_s30 = sld [smem:[%s4267_s0 + %s3269_s15]]  }
  0x59   :  { %s3570_s27 = sld [smem:[%s4267_s0 + %s3270_s22]]  }
  0x5b   :  { %4331 = sst [smem:[#allocation87_spill]] %s3555_s13 }
  0x5c   :  { %s3575_s13 = sld [smem:[%s4267_s0 + %s3271_s28]]  }
  0x5d   :  { %130 = vsyncpa [#allocation3], 0 }
  0x5e   :  { %131 = vsyncpa [#allocation6], 0 }
  0x5f   :  { %132 = vsyncpa [#allocation9], 0 }
  0x60   :  { %133 = vsyncpa [#allocation12], 0 }
  0x61   :  { %134 = vsyncpa [#allocation15], 0 }
  0x62   :  { %135 = vsyncpa [#allocation18], 0 }
  0x63   :  { %136 = vsyncpa [#allocation21], 0 }
  0x64   :  { %137 = vsyncpa [#allocation24], 0 }
  0x65   :  { %138 = vsyncpa [#allocation27], 0 }
  0x66   :  { %139 = vsyncpa [#allocation30], 0 }
  0x67   :  { %140 = vsyncpa [#allocation33], 0 }
  0x68   :  { %141 = vsyncpa [#allocation36], 0  ;;  %s169_s7 = sshll.u32 %s3335_s25, 4  ;;  %s170_s7 = int_to_ptr.hbm [resolvable:$true] %s169_s7 }
  0x69   :  { %142 = vsyncpa [#allocation4], 0  ;;  %s3272_s0 = smov [#allocation5]   ;;  %s207_s11 = sshll.u32 %s3385_s20, 4  ;;  %s208_s11 = int_to_ptr.hbm [resolvable:$true] %s207_s11 }
  0x6a   :  { %s171_s10 = sshll.u32 %s3272_s0, 4  ;;  %s2617_s15 = sshra.s32 %s170_s7, 4  ;;  %s172_s10 = int_to_ptr.vmem [resolvable:$true] %s171_s10  ;;  %s2618_s15 = int_to_ptr.hbm [resolvable:$true] %s2617_s15 }
  0x6b   :  { %s2619_s16 = scalar_lea.hbm %s2618_s15, 1  ;;  %s2621_s18 = scalar_lea.hbm %s3335_s25, 1 }
  0x6c   :  { %p2620_p0 = scmp.ne.s32.totalorder %s2618_s15, %s2619_s16  ;;  %p2622_p1 = scmp.lt.s32.totalorder %s2618_s15, %s3335_s25 }
  0x6d   :  { %p2623_p2 = scmp.lt.s32.totalorder %s2621_s18, %s2619_s16 }
  0x6f   :  { %p2624_p3 = por %p2623_p2, %p2622_p1 }
  0x71   :  { %p2625_p4 = pnand %p2624_p3, %p2620_p0 }
  0x73   :  { %2628 = shalt.err (!%p2625_p4)
}
  0x74   :  { %174 = dma.hbm_to_vmem [thread:$0]  %s170_s7, 16, %s172_s10, [#allocation6]  }
  0x75   :  { %s3273_s22 = smov [#allocation8]   ;;  %s233_s26 = sshll.u32 %s3405_s24, 4  ;;  %s234_s26 = int_to_ptr.hbm [resolvable:$true] %s233_s26 }
  0x76   :  { %s209_s23 = sshll.u32 %s3273_s22, 4  ;;  %s2641_s28 = sshra.s32 %s208_s11, 4  ;;  %s210_s23 = int_to_ptr.vmem [resolvable:$true] %s209_s23  ;;  %s2642_s28 = int_to_ptr.hbm [resolvable:$true] %s2641_s28 }
  0x77   :  { %s2643_s1 = scalar_lea.hbm %s2642_s28, 1  ;;  %s2645_s2 = scalar_lea.hbm %s3385_s20, 1 }
  0x78   :  { %p2644_p5 = scmp.ne.s32.totalorder %s2642_s28, %s2643_s1  ;;  %p2646_p6 = scmp.lt.s32.totalorder %s2642_s28, %s3385_s20 }
  0x79   :  { %p2647_p7 = scmp.lt.s32.totalorder %s2645_s2, %s2643_s1 }
  0x7b   :  { %p2648_p8 = por %p2647_p7, %p2646_p6 }
  0x7d   :  { %p2649_p9 = pnand %p2648_p8, %p2644_p5 }
  0x7f   :  { %2652 = shalt.err (!%p2649_p9)
}
  0x80   :  { %212 = dma.hbm_to_vmem [thread:$0]  %s208_s11, 16, %s210_s23, [#allocation9]  }
  0x81   :  { %s259_s25 = sshll.u32 %s3425_s8, 4  ;;  %s3274_s7 = smov [#allocation11]   ;;  %s260_s25 = int_to_ptr.hbm [resolvable:$true] %s259_s25 }
  0x82   :  { %s235_s0 = sshll.u32 %s3274_s7, 4  ;;  %s2665_s10 = sshra.s32 %s234_s26, 4  ;;  %s236_s0 = int_to_ptr.vmem [resolvable:$true] %s235_s0  ;;  %s2666_s10 = int_to_ptr.hbm [resolvable:$true] %s2665_s10 }
  0x83   :  { %s2667_s15 = scalar_lea.hbm %s2666_s10, 1  ;;  %s2669_s16 = scalar_lea.hbm %s3405_s24, 1 }
  0x84   :  { %p2668_p10 = scmp.ne.s32.totalorder %s2666_s10, %s2667_s15  ;;  %p2670_p11 = scmp.lt.s32.totalorder %s2666_s10, %s3405_s24 }
  0x85   :  { %p2671_p12 = scmp.lt.s32.totalorder %s2669_s16, %s2667_s15 }
  0x87   :  { %p2672_p13 = por %p2671_p12, %p2670_p11 }
  0x89   :  { %p2673_p0 = pnand %p2672_p13, %p2668_p10 }
  0x8b   :  { %2676 = shalt.err (!%p2673_p0)
}
  0x8c   :  { %238 = dma.hbm_to_vmem [thread:$0]  %s234_s26, 16, %s236_s0, [#allocation12]  }
  0x8d   :  { %s3275_s20 = smov [#allocation14]   ;;  %s285_s18 = sshll.u32 %s3445_s3, 4  ;;  %s286_s18 = int_to_ptr.hbm [resolvable:$true] %s285_s18 }
  0x8e   :  { %s261_s11 = sshll.u32 %s3275_s20, 4  ;;  %s2689_s22 = sshra.s32 %s260_s25, 4  ;;  %s262_s11 = int_to_ptr.vmem [resolvable:$true] %s261_s11  ;;  %s2690_s22 = int_to_ptr.hbm [resolvable:$true] %s2689_s22 }
  0x8f   :  { %s2691_s23 = scalar_lea.hbm %s2690_s22, 1  ;;  %s2693_s28 = scalar_lea.hbm %s3425_s8, 1 }
  0x90   :  { %p2692_p1 = scmp.ne.s32.totalorder %s2690_s22, %s2691_s23  ;;  %p2694_p2 = scmp.lt.s32.totalorder %s2690_s22, %s3425_s8 }
  0x91   :  { %p2695_p3 = scmp.lt.s32.totalorder %s2693_s28, %s2691_s23 }
  0x93   :  { %p2696_p4 = por %p2695_p3, %p2694_p2 }
  0x95   :  { %p2697_p5 = pnand %p2696_p4, %p2692_p1 }
  0x97   :  { %2700 = shalt.err (!%p2697_p5)
}
  0x98   :  { %264 = dma.hbm_to_vmem [thread:$0]  %s260_s25, 16, %s262_s11, [#allocation15]  }
  0x99   :  { %s309_s24 = sshll.u32 %s3460_s29, 4  ;;  %s3276_s26 = smov [#allocation17]   ;;  %s310_s24 = int_to_ptr.hbm [resolvable:$true] %s309_s24 }
  0x9a   :  { %s287_s1 = sshll.u32 %s3276_s26, 4  ;;  %s2713_s2 = sshra.s32 %s286_s18, 4  ;;  %s288_s1 = int_to_ptr.vmem [resolvable:$true] %s287_s1  ;;  %s2714_s2 = int_to_ptr.hbm [resolvable:$true] %s2713_s2 }
  0x9b   :  { %s2715_s7 = scalar_lea.hbm %s2714_s2, 1  ;;  %s2717_s0 = scalar_lea.hbm %s3445_s3, 1 }
  0x9c   :  { %p2716_p6 = scmp.ne.s32.totalorder %s2714_s2, %s2715_s7  ;;  %p2718_p7 = scmp.lt.s32.totalorder %s2714_s2, %s3445_s3 }
  0x9d   :  { %p2719_p8 = scmp.lt.s32.totalorder %s2717_s0, %s2715_s7 }
  0x9f   :  { %p2720_p9 = por %p2719_p8, %p2718_p7 }
  0xa1   :  { %p2721_p10 = pnand %p2720_p9, %p2716_p6 }
  0xa3   :  { %2724 = shalt.err (!%p2721_p10)
}
  0xa4   :  { %290 = dma.hbm_to_vmem [thread:$0]  %s286_s18, 16, %s288_s1, [#allocation18]  }
  0xa5   :  { %s3277_s8 = smov [#allocation20]   ;;  %s333_s10 = sshll.u32 %s3475_s17, 4  ;;  %s334_s10 = int_to_ptr.hbm [resolvable:$true] %s333_s10 }
  0xa6   :  { %s311_s25 = sshll.u32 %s3277_s8, 4  ;;  %s2737_s15 = sshra.s32 %s310_s24, 4  ;;  %s312_s25 = int_to_ptr.vmem [resolvable:$true] %s311_s25  ;;  %s2738_s15 = int_to_ptr.hbm [resolvable:$true] %s2737_s15 }
  0xa7   :  { %s2739_s16 = scalar_lea.hbm %s2738_s15, 1  ;;  %s2741_s20 = scalar_lea.hbm %s3460_s29, 1 }
  0xa8   :  { %p2740_p11 = scmp.ne.s32.totalorder %s2738_s15, %s2739_s16  ;;  %p2742_p12 = scmp.lt.s32.totalorder %s2738_s15, %s3460_s29 }
  0xa9   :  { %p2743_p13 = scmp.lt.s32.totalorder %s2741_s20, %s2739_s16 }
  0xab   :  { %p2744_p0 = por %p2743_p13, %p2742_p12 }
  0xad   :  { %p2745_p1 = pnand %p2744_p0, %p2740_p11 }
  0xaf   :  { %2748 = shalt.err (!%p2745_p1)
}
  0xb0   :  { %314 = dma.hbm_to_vmem [thread:$0]  %s310_s24, 16, %s312_s25, [#allocation21]  }
  0xb1   :  { %s355_s3 = sshll.u32 %s3485_s21, 4  ;;  %s3278_s11 = smov [#allocation23]   ;;  %s356_s3 = int_to_ptr.hbm [resolvable:$true] %s355_s3 }
  0xb2   :  { %s335_s18 = sshll.u32 %s3278_s11, 4  ;;  %s2761_s22 = sshra.s32 %s334_s10, 4  ;;  %s336_s18 = int_to_ptr.vmem [resolvable:$true] %s335_s18  ;;  %s2762_s22 = int_to_ptr.hbm [resolvable:$true] %s2761_s22 }
  0xb3   :  { %s2763_s23 = scalar_lea.hbm %s2762_s22, 1  ;;  %s2765_s28 = scalar_lea.hbm %s3475_s17, 1 }
  0xb4   :  { %p2764_p2 = scmp.ne.s32.totalorder %s2762_s22, %s2763_s23  ;;  %p2766_p3 = scmp.lt.s32.totalorder %s2762_s22, %s3475_s17 }
  0xb5   :  { %p2767_p4 = scmp.lt.s32.totalorder %s2765_s28, %s2763_s23 }
  0xb7   :  { %p2768_p5 = por %p2767_p4, %p2766_p3 }
  0xb9   :  { %p2769_p6 = pnand %p2768_p5, %p2764_p2 }
  0xbb   :  { %2772 = shalt.err (!%p2769_p6)
}
  0xbc   :  { %338 = dma.hbm_to_vmem [thread:$0]  %s334_s10, 16, %s336_s18, [#allocation24]  }
  0xbd   :  { %s3279_s29 = smov [#allocation26]   ;;  %s381_s26 = sshll.u32 %s3500_s5, 4  ;;  %s382_s26 = int_to_ptr.hbm [resolvable:$true] %s381_s26 }
  0xbe   :  { %s357_s24 = sshll.u32 %s3279_s29, 4  ;;  %s2785_s1 = sshra.s32 %s356_s3, 4  ;;  %s358_s24 = int_to_ptr.vmem [resolvable:$true] %s357_s24  ;;  %s2786_s1 = int_to_ptr.hbm [resolvable:$true] %s2785_s1 }
  0xbf   :  { %s2787_s2 = scalar_lea.hbm %s2786_s1, 1  ;;  %s2789_s7 = scalar_lea.hbm %s3485_s21, 1 }
  0xc0   :  { %p2788_p7 = scmp.ne.s32.totalorder %s2786_s1, %s2787_s2  ;;  %p2790_p8 = scmp.lt.s32.totalorder %s2786_s1, %s3485_s21 }
  0xc1   :  { %p2791_p9 = scmp.lt.s32.totalorder %s2789_s7, %s2787_s2 }
  0xc3   :  { %p2792_p10 = por %p2791_p9, %p2790_p8 }
  0xc5   :  { %p2793_p11 = pnand %p2792_p10, %p2788_p7 }
  0xc7   :  { %2796 = shalt.err (!%p2793_p11)
}
  0xc8   :  { %360 = dma.hbm_to_vmem [thread:$0]  %s356_s3, 16, %s358_s24, [#allocation27]  }
  0xc9   :  { %s3280_s17 = smov [#allocation29]   ;;  %s416_s8 = sshll.u32 %s3530_s14, 4  ;;  %s417_s8 = int_to_ptr.hbm [resolvable:$true] %s416_s8 }
  0xca   :  { %s383_s0 = sshll.u32 %s3280_s17, 4  ;;  %s2809_s25 = sshra.s32 %s382_s26, 4  ;;  %s384_s0 = int_to_ptr.vmem [resolvable:$true] %s383_s0  ;;  %s2810_s25 = int_to_ptr.hbm [resolvable:$true] %s2809_s25 }
  0xcb   :  { %s2811_s10 = scalar_lea.hbm %s2810_s25, 1  ;;  %s2813_s15 = scalar_lea.hbm %s3500_s5, 1 }
  0xcc   :  { %p2812_p12 = scmp.ne.s32.totalorder %s2810_s25, %s2811_s10  ;;  %p2814_p13 = scmp.lt.s32.totalorder %s2810_s25, %s3500_s5 }
  0xcd   :  { %p2815_p0 = scmp.lt.s32.totalorder %s2813_s15, %s2811_s10 }
  0xcf   :  { %p2816_p1 = por %p2815_p0, %p2814_p13 }
  0xd1   :  { %p2817_p2 = pnand %p2816_p1, %p2812_p12 }
  0xd3   :  { %2820 = shalt.err (!%p2817_p2)
}
  0xd4   :  { %386 = dma.hbm_to_vmem [thread:$0]  %s382_s26, 16, %s384_s0, [#allocation30]  }
  0xd5   :  { %s3281_s21 = smov [#allocation32]   ;;  %s446_s20 = sshll.u32 %s3540_s12, 4  ;;  %s3606_s20 = int_to_ptr.hbm [resolvable:$true] %s446_s20 }
  0xd6   :  { %s418_s16 = sshll.u32 %s3281_s21, 4  ;;  %s2833_s3 = sshra.s32 %s417_s8, 4  ;;  %s419_s16 = int_to_ptr.vmem [resolvable:$true] %s418_s16  ;;  %s2834_s3 = int_to_ptr.hbm [resolvable:$true] %s2833_s3 }
  0xd7   :  { %s2835_s11 = scalar_lea.hbm %s2834_s3, 32  ;;  %s2837_s5 = scalar_lea.hbm %s3530_s14, 32 }
  0xd8   :  { %p2836_p3 = scmp.ne.s32.totalorder %s2834_s3, %s2835_s11  ;;  %p2838_p4 = scmp.lt.s32.totalorder %s2834_s3, %s3530_s14 }
  0xd9   :  { %p2839_p5 = scmp.lt.s32.totalorder %s2837_s5, %s2835_s11 }
  0xdb   :  { %p2840_p6 = por %p2839_p5, %p2838_p4 }
  0xdd   :  { %p2841_p7 = pnand %p2840_p6, %p2836_p3 }
  0xdf   :  { %2844 = shalt.err (!%p2841_p7)
}
  0xe0   :  { %s3282_s18 = smov 128   ;;  %s3283_s22 = smov 8  }
  0xe1   :  { %424 = dma.hbm_to_vmem [thread:$0]  %s417_s8, 512, %s419_s16, [#allocation33], %s3282_s18, %s3282_s18, %s3283_s22  }
  0xe2   :  { %s149_s23 = sshll.u32 %s3315_s9, 4  ;;  %s3284_s28 = smov [#allocation35]   ;;  %s3614_s23 = int_to_ptr.hbm [resolvable:$true] %s149_s23 }
  0xe3   :  { %s448_s29 = sshll.u32 %s3284_s28, 4  ;;  %s2857_s14 = sshra.s32 %s3606_s20, 4  ;;  %s449_s29 = int_to_ptr.vmem [resolvable:$true] %s448_s29  ;;  %s2858_s14 = int_to_ptr.hbm [resolvable:$true] %s2857_s14 }
  0xe4   :  { %s2859_s24 = scalar_lea.hbm %s2858_s14, 32  ;;  %s2861_s26 = scalar_lea.hbm %s3540_s12, 32 }
  0xe5   :  { %p2860_p8 = scmp.ne.s32.totalorder %s2858_s14, %s2859_s24  ;;  %p2862_p9 = scmp.lt.s32.totalorder %s2858_s14, %s3540_s12 }
  0xe6   :  { %p2863_p10 = scmp.lt.s32.totalorder %s2861_s26, %s2859_s24 }
  0xe8   :  { %p2864_p11 = por %p2863_p10, %p2862_p9 }
  0xea   :  { %p2865_p12 = pnand %p2864_p11, %p2860_p8 }
  0xec   :  { %2868 = shalt.err (!%p2865_p12)
}
  0xed   :  { %454 = dma.hbm_to_vmem [thread:$0]  %s3606_s20, 512, %s449_s29, [#allocation36], %s3282_s18, %s3282_s18, %s3283_s22  }
  0xee   :  { %s3285_s1 = smov [#allocation2]   ;;  %s194_s7 = sshll.u32 %s3375_s6, 4  ;;  %s195_s7 = int_to_ptr.hbm [resolvable:$true] %s194_s7 }
  0xef   :  { %s151_s2 = sshll.u32 %s3285_s1, 4  ;;  %s2881_s17 = sshra.s32 %s3614_s23, 4  ;;  %s152_s2 = int_to_ptr.vmem [resolvable:$true] %s151_s2  ;;  %s2882_s17 = int_to_ptr.hbm [resolvable:$true] %s2881_s17 }
  0xf0   :  { %s2883_s12 = scalar_lea.hbm %s2882_s17, 16  ;;  %s2885_s0 = scalar_lea.hbm %s3315_s9, 16 }
  0xf1   :  { %p2884_p13 = scmp.ne.s32.totalorder %s2882_s17, %s2883_s12  ;;  %p2886_p0 = scmp.lt.s32.totalorder %s2882_s17, %s3315_s9 }
  0xf2   :  { %p2887_p1 = scmp.lt.s32.totalorder %s2885_s0, %s2883_s12 }
  0xf4   :  { %p2888_p2 = por %p2887_p1, %p2886_p0 }
  0xf6   :  { %p2889_p3 = pnand %p2888_p2, %p2884_p13 }
  0xf8   :  { %2892 = shalt.err (!%p2889_p3)
}
  0xf9   :  { %157 = dma.hbm_to_vmem [thread:$0]  %s3614_s23, 256, %s152_s2, [#allocation3], %s3282_s18, %s3282_s18, %s3283_s22  }
  0xfa   :  { %s220_s8 = sshll.u32 %s3395_s4, 4  ;;  %s3286_s25 = smov [#allocation7]   ;;  %s221_s8 = int_to_ptr.hbm [resolvable:$true] %s220_s8 }
  0xfb   :  { %s196_s10 = sshll.u32 %s3286_s25, 4  ;;  %s2905_s15 = sshra.s32 %s195_s7, 4  ;;  %s197_s10 = int_to_ptr.vmem [resolvable:$true] %s196_s10  ;;  %s2906_s15 = int_to_ptr.hbm [resolvable:$true] %s2905_s15 }
  0xfc   :  { %s2907_s9 = scalar_lea.hbm %s2906_s15, 1  ;;  %s2909_s21 = scalar_lea.hbm %s3375_s6, 1 }
  0xfd   :  { %p2908_p4 = scmp.ne.s32.totalorder %s2906_s15, %s2907_s9  ;;  %p2910_p5 = scmp.lt.s32.totalorder %s2906_s15, %s3375_s6 }
  0xfe   :  { %p2911_p6 = scmp.lt.s32.totalorder %s2909_s21, %s2907_s9 }
 0x100   :  { %p2912_p7 = por %p2911_p6, %p2910_p5 }
 0x102   :  { %p2913_p8 = pnand %p2912_p7, %p2908_p4 }
 0x104   :  { %2916 = shalt.err (!%p2913_p8)
}
 0x105   :  { %199 = dma.hbm_to_vmem [thread:$0]  %s195_s7, 16, %s197_s10, [#allocation6]  }
 0x106   :  { %s4332_s16 = sld [smem:[#allocation67_spill]]  ;;  %s3287_s20 = smov [#allocation10]  }
 0x107   :  { %s222_s3 = sshll.u32 %s3287_s20, 4  ;;  %s2929_s5 = sshra.s32 %s221_s8, 4  ;;  %s223_s3 = int_to_ptr.vmem [resolvable:$true] %s222_s3  ;;  %s2930_s5 = int_to_ptr.hbm [resolvable:$true] %s2929_s5 }
 0x108   :  { %s2931_s23 = scalar_lea.hbm %s2930_s5, 1  ;;  %s2933_s28 = scalar_lea.hbm %s3395_s4, 1 }
 0x109   :  { %p2932_p9 = scmp.ne.s32.totalorder %s2930_s5, %s2931_s23  ;;  %p2934_p10 = scmp.lt.s32.totalorder %s2930_s5, %s3395_s4 }
 0x10a   :  { %p2935_p11 = scmp.lt.s32.totalorder %s2933_s28, %s2931_s23 }
 0x10c   :  { %s246_s11 = sshll.u32 %s4332_s16, 4  ;;  %p2936_p12 = por %p2935_p11, %p2934_p10  ;;  %s247_s11 = int_to_ptr.hbm [resolvable:$true] %s246_s11 }
 0x10e   :  { %p2937_p13 = pnand %p2936_p12, %p2932_p9 }
 0x110   :  { %2940 = shalt.err (!%p2937_p13)
}
 0x111   :  { %225 = dma.hbm_to_vmem [thread:$0]  %s221_s8, 16, %s223_s3, [#allocation9]  }
 0x112   :  { %s4333_s6 = sld [smem:[#allocation70_spill]]  ;;  %s3288_s14 = smov [#allocation13]  }
 0x113   :  { %s248_s24 = sshll.u32 %s3288_s14, 4  ;;  %s2953_s26 = sshra.s32 %s247_s11, 4  ;;  %s249_s24 = int_to_ptr.vmem [resolvable:$true] %s248_s24  ;;  %s2954_s26 = int_to_ptr.hbm [resolvable:$true] %s2953_s26 }
 0x114   :  { %s2955_s1 = scalar_lea.hbm %s2954_s26, 1  ;;  %s2957_s2 = scalar_lea.hbm %s4332_s16, 1 }
 0x115   :  { %p2956_p0 = scmp.ne.s32.totalorder %s2954_s26, %s2955_s1  ;;  %p2958_p1 = scmp.lt.s32.totalorder %s2954_s26, %s4332_s16 }
 0x116   :  { %p2959_p2 = scmp.lt.s32.totalorder %s2957_s2, %s2955_s1 }
 0x118   :  { %s272_s29 = sshll.u32 %s4333_s6, 4  ;;  %p2960_p3 = por %p2959_p2, %p2958_p1  ;;  %s273_s29 = int_to_ptr.hbm [resolvable:$true] %s272_s29 }
 0x11a   :  { %p2961_p4 = pnand %p2960_p3, %p2956_p0 }
 0x11c   :  { %2964 = shalt.err (!%p2961_p4)
}
 0x11d   :  { %251 = dma.hbm_to_vmem [thread:$0]  %s247_s11, 16, %s249_s24, [#allocation12]  }
 0x11e   :  { %s4334_s4 = sld [smem:[#allocation73_spill]]  ;;  %s3289_s7 = smov [#allocation16]  }
 0x11f   :  { %s274_s17 = sshll.u32 %s3289_s7, 4  ;;  %s2977_s0 = sshra.s32 %s273_s29, 4  ;;  %s275_s17 = int_to_ptr.vmem [resolvable:$true] %s274_s17  ;;  %s2978_s0 = int_to_ptr.hbm [resolvable:$true] %s2977_s0 }
 0x120   :  { %s2979_s8 = scalar_lea.hbm %s2978_s0, 1  ;;  %s2981_s25 = scalar_lea.hbm %s4333_s6, 1 }
 0x121   :  { %p2980_p5 = scmp.ne.s32.totalorder %s2978_s0, %s2979_s8  ;;  %p2982_p6 = scmp.lt.s32.totalorder %s2978_s0, %s4333_s6 }
 0x122   :  { %p2983_p7 = scmp.lt.s32.totalorder %s2981_s25, %s2979_s8 }
 0x124   :  { %s298_s12 = sshll.u32 %s4334_s4, 4  ;;  %p2984_p8 = por %p2983_p7, %p2982_p6  ;;  %s299_s12 = int_to_ptr.hbm [resolvable:$true] %s298_s12 }
 0x126   :  { %p2985_p9 = pnand %p2984_p8, %p2980_p5 }
 0x128   :  { %2988 = shalt.err (!%p2985_p9)
}
 0x129   :  { %277 = dma.hbm_to_vmem [thread:$0]  %s273_s29, 16, %s275_s17, [#allocation15]  }
 0x12a   :  { %s4335_s10 = sld [smem:[#allocation74_spill]]  ;;  %s3290_s9 = smov [#allocation19]  }
 0x12b   :  { %s300_s21 = sshll.u32 %s3290_s9, 4  ;;  %s3001_s16 = sshra.s32 %s299_s12, 4  ;;  %s301_s21 = int_to_ptr.vmem [resolvable:$true] %s300_s21  ;;  %s3002_s16 = int_to_ptr.hbm [resolvable:$true] %s3001_s16 }
 0x12c   :  { %s3003_s20 = scalar_lea.hbm %s3002_s16, 1  ;;  %s3005_s3 = scalar_lea.hbm %s4334_s4, 1 }
 0x12d   :  { %p3004_p10 = scmp.ne.s32.totalorder %s3002_s16, %s3003_s20  ;;  %p3006_p11 = scmp.lt.s32.totalorder %s3002_s16, %s4334_s4 }
 0x12e   :  { %p3007_p12 = scmp.lt.s32.totalorder %s3005_s3, %s3003_s20 }
 0x130   :  { %s320_s15 = sshll.u32 %s4335_s10, 4  ;;  %p3008_p13 = por %p3007_p12, %p3006_p11  ;;  %s321_s15 = int_to_ptr.hbm [resolvable:$true] %s320_s15 }
 0x132   :  { %p3009_p0 = pnand %p3008_p13, %p3004_p10 }
 0x134   :  { %3012 = shalt.err (!%p3009_p0)
}
 0x135   :  { %303 = dma.hbm_to_vmem [thread:$0]  %s299_s12, 16, %s301_s21, [#allocation18]  }
 0x136   :  { %s4336_s11 = sld [smem:[#allocation76_spill]]  ;;  %s3291_s5 = smov [#allocation22]  }
 0x137   :  { %s322_s23 = sshll.u32 %s3291_s5, 4  ;;  %s3025_s6 = sshra.s32 %s321_s15, 4  ;;  %s323_s23 = int_to_ptr.vmem [resolvable:$true] %s322_s23  ;;  %s3026_s6 = int_to_ptr.hbm [resolvable:$true] %s3025_s6 }
 0x138   :  { %s3027_s29 = scalar_lea.hbm %s3026_s6, 1  ;;  %s3029_s14 = scalar_lea.hbm %s4335_s10, 1 }
 0x139   :  { %p3028_p1 = scmp.ne.s32.totalorder %s3026_s6, %s3027_s29  ;;  %p3030_p2 = scmp.lt.s32.totalorder %s3026_s6, %s4335_s10 }
 0x13a   :  { %p3031_p3 = scmp.lt.s32.totalorder %s3029_s14, %s3027_s29 }
 0x13c   :  { %s344_s28 = sshll.u32 %s4336_s11, 4  ;;  %p3032_p4 = por %p3031_p3, %p3030_p2  ;;  %s345_s28 = int_to_ptr.hbm [resolvable:$true] %s344_s28 }
 0x13e   :  { %p3033_p5 = pnand %p3032_p4, %p3028_p1 }
 0x140   :  { %3036 = shalt.err (!%p3033_p5)
}
 0x141   :  { %325 = dma.hbm_to_vmem [thread:$0]  %s321_s15, 16, %s323_s23, [#allocation21]  }
 0x142   :  { %s4337_s24 = sld [smem:[#allocation78_spill]]  ;;  %s3292_s1 = smov [#allocation25]  }
 0x143   :  { %s346_s2 = sshll.u32 %s3292_s1, 4  ;;  %s3049_s4 = sshra.s32 %s345_s28, 4  ;;  %s347_s2 = int_to_ptr.vmem [resolvable:$true] %s346_s2  ;;  %s3050_s4 = int_to_ptr.hbm [resolvable:$true] %s3049_s4 }
 0x144   :  { %s3051_s7 = scalar_lea.hbm %s3050_s4, 1  ;;  %s3053_s17 = scalar_lea.hbm %s4336_s11, 1 }
 0x145   :  { %p3052_p6 = scmp.ne.s32.totalorder %s3050_s4, %s3051_s7  ;;  %p3054_p7 = scmp.lt.s32.totalorder %s3050_s4, %s4336_s11 }
 0x146   :  { %p3055_p8 = scmp.lt.s32.totalorder %s3053_s17, %s3051_s7 }
 0x148   :  { %s368_s26 = sshll.u32 %s4337_s24, 4  ;;  %p3056_p9 = por %p3055_p8, %p3054_p7  ;;  %s369_s26 = int_to_ptr.hbm [resolvable:$true] %s368_s26 }
 0x14a   :  { %p3057_p10 = pnand %p3056_p9, %p3052_p6 }
 0x14c   :  { %3060 = shalt.err (!%p3057_p10)
}
 0x14d   :  { %349 = dma.hbm_to_vmem [thread:$0]  %s345_s28, 16, %s347_s2, [#allocation24]  }
 0x14e   :  { %s4338_s12 = sld [smem:[#allocation79_spill]]  ;;  %s3293_s0 = smov [#allocation28]  }
 0x14f   :  { %s370_s8 = sshll.u32 %s3293_s0, 4  ;;  %s3073_s10 = sshra.s32 %s369_s26, 4  ;;  %s371_s8 = int_to_ptr.vmem [resolvable:$true] %s370_s8  ;;  %s3074_s10 = int_to_ptr.hbm [resolvable:$true] %s3073_s10 }
 0x150   :  { %s3075_s15 = scalar_lea.hbm %s3074_s10, 1  ;;  %s3077_s9 = scalar_lea.hbm %s4337_s24, 1 }
 0x151   :  { %p3076_p11 = scmp.ne.s32.totalorder %s3074_s10, %s3075_s15  ;;  %p3078_p12 = scmp.lt.s32.totalorder %s3074_s10, %s4337_s24 }
 0x152   :  { %p3079_p13 = scmp.lt.s32.totalorder %s3077_s9, %s3075_s15 }
 0x154   :  { %s394_s25 = sshll.u32 %s4338_s12, 4  ;;  %p3080_p0 = por %p3079_p13, %p3078_p12  ;;  %s395_s25 = int_to_ptr.hbm [resolvable:$true] %s394_s25 }
 0x156   :  { %p3081_p1 = pnand %p3080_p0, %p3076_p11 }
 0x158   :  { %3084 = shalt.err (!%p3081_p1)
}
 0x159   :  { %373 = dma.hbm_to_vmem [thread:$0]  %s369_s26, 16, %s371_s8, [#allocation27]  }
 0x15a   :  { %s4339_s21 = sld [smem:[#allocation84_spill]]  ;;  %s3294_s20 = smov [#allocation31]  }
 0x15b   :  { %s396_s3 = sshll.u32 %s3294_s20, 4  ;;  %s3097_s11 = sshra.s32 %s395_s25, 4  ;;  %s397_s3 = int_to_ptr.vmem [resolvable:$true] %s396_s3  ;;  %s3098_s11 = int_to_ptr.hbm [resolvable:$true] %s3097_s11 }
 0x15c   :  { %s3099_s5 = scalar_lea.hbm %s3098_s11, 1  ;;  %s3101_s23 = scalar_lea.hbm %s4338_s12, 1 }
 0x15d   :  { %p3100_p2 = scmp.ne.s32.totalorder %s3098_s11, %s3099_s5  ;;  %p3102_p3 = scmp.lt.s32.totalorder %s3098_s11, %s4338_s12 }
 0x15e   :  { %p3103_p4 = scmp.lt.s32.totalorder %s3101_s23, %s3099_s5 }
 0x160   :  { %s431_s16 = sshll.u32 %s4339_s21, 4  ;;  %p3104_p5 = por %p3103_p4, %p3102_p3  ;;  %s3656_s16 = int_to_ptr.hbm [resolvable:$true] %s431_s16 }
 0x162   :  { %p3105_p6 = pnand %p3104_p5, %p3100_p2 }
 0x164   :  { %3108 = shalt.err (!%p3105_p6)
}
 0x165   :  { %399 = dma.hbm_to_vmem [thread:$0]  %s395_s25, 16, %s397_s3, [#allocation30]  }
 0x166   :  { %s3295_s28 = smov [#allocation34]   ;;  %s465_s29 = sshll.u32 %s3560_s19, 4  ;;  %s466_s29 = int_to_ptr.hbm [resolvable:$true] %s465_s29 }
 0x167   :  { %s433_s6 = sshll.u32 %s3295_s28, 4  ;;  %s3121_s14 = sshra.s32 %s3656_s16, 4  ;;  %s434_s6 = int_to_ptr.vmem [resolvable:$true] %s433_s6  ;;  %s3122_s14 = int_to_ptr.hbm [resolvable:$true] %s3121_s14 }
 0x168   :  { %s3123_s24 = scalar_lea.hbm %s3122_s14, 32  ;;  %s3125_s26 = scalar_lea.hbm %s4339_s21, 32 }
 0x169   :  { %p3124_p7 = scmp.ne.s32.totalorder %s3122_s14, %s3123_s24  ;;  %p3126_p8 = scmp.lt.s32.totalorder %s3122_s14, %s4339_s21 }
 0x16a   :  { %p3127_p9 = scmp.lt.s32.totalorder %s3125_s26, %s3123_s24 }
 0x16c   :  { %p3128_p10 = por %p3127_p9, %p3126_p8 }
 0x16e   :  { %p3129_p11 = pnand %p3128_p10, %p3124_p7 }
 0x170   :  { %3132 = shalt.err (!%p3129_p11)
}
 0x171   :  { %439 = dma.hbm_to_vmem [thread:$0]  %s3656_s16, 512, %s434_s6, [#allocation33], %s3282_s18, %s3282_s18, %s3283_s22  }
 0x172   :  { %s3296_s1 = smov [#allocation37]   ;;  %s3145_s4 = sshra.s32 %s466_s29, 4  ;;  %s3146_s4 = int_to_ptr.hbm [resolvable:$true] %s3145_s4 }
 0x173   :  { %s467_s2 = sshll.u32 %s3296_s1, 4  ;;  %s3147_s7 = scalar_lea.hbm %s3146_s4, 32  ;;  %s468_s2 = int_to_ptr.vmem [resolvable:$true] %s467_s2 }
 0x174   :  { %p3148_p12 = scmp.ne.s32.totalorder %s3146_s4, %s3147_s7  ;;  %s3149_s17 = scalar_lea.hbm %s3560_s19, 32 }
 0x175   :  { %p3150_p13 = scmp.lt.s32.totalorder %s3146_s4, %s3560_s19  ;;  %p3151_p0 = scmp.lt.s32.totalorder %s3149_s17, %s3147_s7 }
 0x177   :  { %p3152_p1 = por %p3151_p0, %p3150_p13 }
 0x179   :  { %p3153_p2 = pnand %p3152_p1, %p3148_p12 }
 0x17b   :  { %3156 = shalt.err (!%p3153_p2)
}
 0x17c   :  { %473 = dma.hbm_to_vmem [thread:$0]  %s466_s29, 512, %s468_s2, [#allocation36], %s3282_s18, %s3282_s18, %s3283_s22  }
 0x17d   :  { %3193 = dma.done.wait [#allocation3], 256  }
 0x17e   :  { %3194 = vsyncadd [#allocation3], 4294967040 }
 0x17f   :  { %3195 = dma.done.wait [#allocation6], 32  }
 0x180   :  { %3196 = vsyncadd [#allocation6], 4294967264 }
 0x181   :  { %3197 = dma.done.wait [#allocation9], 32  }
 0x182   :  { %3198 = vsyncadd [#allocation9], 4294967264 }
 0x183   :  { %3199 = dma.done.wait [#allocation12], 32  }
 0x184   :  { %3200 = vsyncadd [#allocation12], 4294967264 }
 0x185   :  { %3201 = dma.done.wait [#allocation15], 32  }
 0x186   :  { %3202 = vsyncadd [#allocation15], 4294967264 }
 0x187   :  { %3203 = dma.done.wait [#allocation18], 32  }
 0x188   :  { %3204 = vsyncadd [#allocation18], 4294967264 }
 0x189   :  { %3205 = dma.done.wait [#allocation21], 32  }
 0x18a   :  { %3206 = vsyncadd [#allocation21], 4294967264 }
 0x18b   :  { %3207 = dma.done.wait [#allocation24], 32  }
 0x18c   :  { %3208 = vsyncadd [#allocation24], 4294967264 }
 0x18d   :  { %3209 = dma.done.wait [#allocation27], 32  }
 0x18e   :  { %3210 = vsyncadd [#allocation27], 4294967264 }
 0x18f   :  { %3211 = dma.done.wait [#allocation30], 32  }
 0x190   :  { %3212 = vsyncadd [#allocation30], 4294967264 }
 0x191   :  { %3213 = dma.done.wait [#allocation33], 1024  }
 0x192   :  { %3214 = vsyncadd [#allocation33], 4294966272 }
 0x193   :  { %3215 = dma.done.wait [#allocation36], 1024  }
 0x194   :  { %3216 = vsyncadd [#allocation36], 4294966272  ;;  %s4340_s19 = sld [smem:[#allocation53_spill]]  ;;  %v577_v33 = vld [vmem:[#allocation2] sm:$0xff]  ;;  %v578_v34 = vld [vmem:[#allocation2 + $0x8] sm:$0xff]  ;;  %vm913_vm14 = vcmask 261120  }
 0x195   :  { %s4341_s18 = sld [smem:[#allocation55_spill]]  ;;  %v2473_v36 = vld [vmem:[#allocation5] ss:$0 sm:$0xff] }
 0x196   :  { %s4342_s22 = sld [smem:[#allocation52_spill]] }
 0x197   :  { %s4343_s12 = sld [smem:[#allocation54_spill]] }
 0x198   :  { %s4344_s0 = sld [smem:[#allocation62_spill]] }
 0x199   :  { %s4345_s8 = sld [smem:[#allocation63_spill]] }
 0x19a   :  { %v594_v0 = vld [vmem:[%s4340_s19 + $0x78] sm:$0xff]  ;;  %v593_v2 = vld [vmem:[%s4340_s19 + $0x70] sm:$0xff]  ;;  %v592_v4 = vld [vmem:[%s4340_s19 + $0x68] sm:$0xff]  ;;  %s4346_s25 = sld [smem:[#allocation66_spill]] }
 0x19b   :  { %v611_v1 = vld [vmem:[%s4341_s18 + $0x78] sm:$0xff]  ;;  %744 = vmatpush.msra.mxu0 %v594_v0  ;;  %v610_v3 = vld [vmem:[%s4341_s18 + $0x70] sm:$0xff]  ;;  %v609_v5 = vld [vmem:[%s4341_s18 + $0x68] sm:$0xff]  ;;  %s4347_s10 = sld [smem:[#allocation68_spill]] }
 0x19c   :  { %807 = vmatpush.msra.mxu1 %v611_v1  ;;  %v591_v6 = vld [vmem:[%s4340_s19 + $0x60] sm:$0xff]  ;;  %v590_v8 = vld [vmem:[%s4340_s19 + $0x58] sm:$0xff]  ;;  %v589_v10 = vld [vmem:[%s4340_s19 + $0x50] sm:$0xff]  ;;  %s4352_s15 = sld [smem:[#allocation64_spill]] }
 0x19d   :  { %745 = vmatpush.msra.mxu0 %v593_v2  ;;  %v608_v7 = vld [vmem:[%s4341_s18 + $0x60] sm:$0xff]  ;;  %v607_v9 = vld [vmem:[%s4341_s18 + $0x58] sm:$0xff]  ;;  %v606_v11 = vld [vmem:[%s4341_s18 + $0x50] sm:$0xff]  ;;  %s4353_s9 = sld [smem:[#allocation65_spill]] }
 0x19e   :  { %808 = vmatpush.msra.mxu1 %v610_v3  ;;  %v588_v12 = vld [vmem:[%s4340_s19 + $0x48] sm:$0xff]  ;;  %v587_v14 = vld [vmem:[%s4340_s19 + $0x40] sm:$0xff]  ;;  %v586_v16 = vld [vmem:[%s4340_s19 + $0x38] sm:$0xff]  ;;  %s4354_s21 = sld [smem:[#allocation69_spill]] }
 0x19f   :  { %746 = vmatpush.msra.mxu0 %v592_v4  ;;  %v605_v13 = vld [vmem:[%s4341_s18 + $0x48] sm:$0xff]  ;;  %v604_v15 = vld [vmem:[%s4341_s18 + $0x40] sm:$0xff]  ;;  %v603_v17 = vld [vmem:[%s4341_s18 + $0x38] sm:$0xff]  ;;  %s4355_s16 = sld [smem:[#allocation71_spill]] }
 0x1a0   :  { %809 = vmatpush.msra.mxu1 %v609_v5  ;;  %v585_v18 = vld [vmem:[%s4340_s19 + $0x30] sm:$0xff]  ;;  %v584_v20 = vld [vmem:[%s4340_s19 + $0x28] sm:$0xff]  ;;  %v583_v22 = vld [vmem:[%s4340_s19 + $0x20] sm:$0xff]  ;;  %s4356_s20 = sld [smem:[#allocation58_spill]] }
 0x1a1   :  { %747 = vmatpush.msra.mxu0 %v591_v6  ;;  %v602_v19 = vld [vmem:[%s4341_s18 + $0x30] sm:$0xff]  ;;  %v601_v21 = vld [vmem:[%s4341_s18 + $0x28] sm:$0xff]  ;;  %v600_v23 = vld [vmem:[%s4341_s18 + $0x20] sm:$0xff]  ;;  %s4357_s3 = sld [smem:[#allocation56_spill]] }
 0x1a2   :  { %810 = vmatpush.msra.mxu1 %v608_v7  ;;  %v582_v24 = vld [vmem:[%s4340_s19 + $0x18] sm:$0xff]  ;;  %v581_v26 = vld [vmem:[%s4340_s19 + $0x10] sm:$0xff]  ;;  %v580_v28 = vld [vmem:[%s4340_s19 + $0x8] sm:$0xff]  ;;  %s4358_s11 = sld [smem:[#allocation60_spill]] }
 0x1a3   :  { %748 = vmatpush.msra.mxu0 %v590_v8  ;;  %v599_v25 = vld [vmem:[%s4341_s18 + $0x18] sm:$0xff]  ;;  %v598_v27 = vld [vmem:[%s4341_s18 + $0x10] sm:$0xff]  ;;  %v597_v29 = vld [vmem:[%s4341_s18 + $0x8] sm:$0xff]  ;;  %s4359_s5 = sld [smem:[#allocation57_spill]] }
 0x1a4   :  { %811 = vmatpush.msra.mxu1 %v607_v9  ;;  %v579_v30 = vld [vmem:[%s4340_s19] sm:$0xff]  ;;  %v641_v60 = vld [vmem:[%s4344_s0 + $0x18] sm:$0xff]  ;;  %v640_v5 = vld [vmem:[%s4344_s0 + $0x10] sm:$0xff]  ;;  %s4360_s23 = sld [smem:[#allocation61_spill]] }
 0x1a5   :  { %749 = vmatpush.msra.mxu0 %v589_v10  ;;  %v596_v31 = vld [vmem:[%s4341_s18] sm:$0xff]  ;;  %v646_v61 = vld [vmem:[%s4345_s8 + $0x18] sm:$0xff]  ;;  %929 = vmatpush.msra.mxu2 %v641_v60  ;;  %v645_v6 = vld [vmem:[%s4345_s8 + $0x10] sm:$0xff]  ;;  %s4361_s28 = sld [smem:[#allocation59_spill]]  ;;  %s2230_s18 = sshll.u32 %s3575_s13, 4  ;;  %s2231_s18 = int_to_ptr.hbm [resolvable:$true] %s2230_s18 }
 0x1a6   :  { %812 = vmatpush.msra.mxu1 %v606_v11  ;;  %v576_v32 = vld [vmem:[%s4342_s22] sm:$0xff]  ;;  %958 = vmatpush.msra.mxu3 %v646_v61  ;;  %v661_v1 = vld [vmem:[%s4346_s25 + $0x18] sm:$0xff]  ;;  %v660_v7 = vld [vmem:[%s4346_s25 + $0x10] sm:$0xff]  ;;  %s4362_s6 = sld [smem:[#allocation72_spill]]  ;;  %s3181_s22 = sshra.s32 %s2231_s18, 4  ;;  %s3182_s22 = int_to_ptr.hbm [resolvable:$true] %s3181_s22 }
 0x1a7   :  { %750 = vmatpush.msra.mxu0 %v588_v12  ;;  %v2472_v35 = vld [vmem:[%s4343_s12] ss:$0 sm:$0xff]  ;;  %v666_v2 = vld [vmem:[%s4347_s10 + $0x18] sm:$0xff]  ;;  %930 = vmatpush.msra.mxu2 %v640_v5  ;;  %v665_v11 = vld [vmem:[%s4347_s10 + $0x10] sm:$0xff]  ;;  %s4363_s29 = sld [smem:[#allocation75_spill]]  ;;  %s3183_s12 = scalar_lea.hbm %s3182_s22, 8 }
 0x1a8   :  { %813 = vmatpush.msra.mxu1 %v605_v13  ;;  %959 = vmatpush.msra.mxu3 %v645_v6  ;;  %v639_v13 = vld [vmem:[%s4344_s0 + $0x8] sm:$0xff]  ;;  %s4364_s14 = sld [smem:[#allocation77_spill]]  ;;  %p3184_p3 = scmp.ne.s32.totalorder %s3182_s22, %s3183_s12 }
 0x1a9   :  { %751 = vmatpush.msra.mxu0 %v587_v14  ;;  %v644_v14 = vld [vmem:[%s4345_s8 + $0x8] sm:$0xff]  ;;  %931 = vmatpush.msra.mxu2 %v639_v13  ;;  %s4365_s24 = sld [smem:[#allocation80_spill]]  ;;  %p3186_p4 = scmp.lt.s32.totalorder %s3182_s22, %s3575_s13 }
 0x1aa   :  { %814 = vmatpush.msra.mxu1 %v604_v15  ;;  %v659_v15 = vld [vmem:[%s4346_s25 + $0x8] sm:$0xff]  ;;  %960 = vmatpush.msra.mxu3 %v644_v14  ;;  %s4366_s26 = sld [smem:[#allocation82_spill]] }
 0x1ab   :  { %752 = vmatpush.msra.mxu0 %v586_v16  ;;  %s4367_s1 = sld [smem:[#allocation81_spill]] }
 0x1ac   :  { %815 = vmatpush.msra.mxu1 %v603_v17  ;;  %s4368_s2 = sld [smem:[#allocation83_spill]] }
 0x1ad   :  { %753 = vmatpush.msra.mxu0 %v585_v18  ;;  %s4369_s4 = sld [smem:[#allocation85_spill]] }
 0x1ae   :  { %816 = vmatpush.msra.mxu1 %v602_v19  ;;  %v664_v19 = vld [vmem:[%s4347_s10 + $0x8] sm:$0xff]  ;;  %s4370_s7 = sld [smem:[#allocation86_spill]] }
 0x1af   :  { %754 = vmatpush.msra.mxu0 %v584_v20  ;;  %s4371_s17 = sld [smem:[#allocation87_spill]] }
 0x1b0   :  { %817 = vmatpush.msra.mxu1 %v601_v21 }
 0x1b1   :  { %755 = vmatpush.msra.mxu0 %v583_v22  ;;  %v638_v22 = vld [vmem:[%s4344_s0] sm:$0xff]  ;;  %s3185_s0 = scalar_lea.hbm %s3575_s13, 8 }
 0x1b2   :  { %818 = vmatpush.msra.mxu1 %v600_v23  ;;  %v643_v23 = vld [vmem:[%s4345_s8] sm:$0xff]  ;;  %932 = vmatpush.msra.mxu2 %v638_v22  ;;  %p3187_p5 = scmp.lt.s32.totalorder %s3185_s0, %s3183_s12 }
 0x1b3   :  { %756 = vmatpush.msra.mxu0 %v582_v24  ;;  %v658_v24 = vld [vmem:[%s4346_s25] sm:$0xff]  ;;  %961 = vmatpush.msra.mxu3 %v643_v23  ;;  %v3297_v23 = vmov -1.0  }
 0x1b4   :  { %819 = vmatpush.msra.mxu1 %v599_v25  ;;  %p3188_p6 = por %p3187_p5, %p3186_p4 }
 0x1b5   :  { %757 = vmatpush.msra.mxu0 %v581_v26 }
 0x1b6   :  { %820 = vmatpush.msra.mxu1 %v598_v27  ;;  %p3189_p7 = pnand %p3188_p6, %p3184_p3 }
 0x1b7   :  { %758 = vmatpush.msra.mxu0 %v580_v28  ;;  %v663_v28 = vld [vmem:[%s4347_s10] sm:$0xff] }
 0x1b8   :  { %821 = vmatpush.msra.mxu1 %v597_v29 }
 0x1b9   :  { %759 = vmatpush.msra.mxu0 %v579_v30 }
 0x1ba   :  { %822 = vmatpush.msra.mxu1 %v596_v31  ;;  %760 = vmatmul.f32.vlgmr.msra.gmra.mxu0 %v576_v32 }
 0x1bb   :  { %823 = vmatmul.f32.vlgmr.msra.gmra.mxu1 %v577_v33  ;;  %1286 = vmatpush.msrb.mxu0 %v661_v1  ;;  %v651_v33 = vld [vmem:[%s4352_s15 + $0x18] sm:$0xff] }
 0x1bc   :  { %1312 = vmatpush.msrb.mxu1 %v666_v2  ;;  %984 = vmatpush.msrb.mxu2 %v651_v33 }
 0x1bd   :  { %1287 = vmatpush.msrb.mxu0 %v660_v7 }
 0x1be   :  { %1313 = vmatpush.msrb.mxu1 %v665_v11 }
 0x1bf   :  { %1288 = vmatpush.msrb.mxu0 %v659_v15 }
 0x1c0   :  { %1314 = vmatpush.msrb.mxu1 %v664_v19 }
 0x1c1   :  { %1289 = vmatpush.msrb.mxu0 %v658_v24 }
 0x1c2   :  { %1315 = vmatpush.msrb.mxu1 %v663_v28 }
 0x1c3   :  { %826 = vmatmul.f32.gmra.mxu1 %v578_v34 }
 0x237   :  { %v761_v37 = vpop.f32.mrf.mxu0 }
 0x238   :  { %v824_v38 = vpop.f32.mrf.mxu1  ;;  %v3707_v39 = vadd.f32 %v2472_v35, %v761_v37  ;;  %v650_v37 = vld [vmem:[%s4352_s15 + $0x10] sm:$0xff] }
 0x239   :  { %v3709_v40 = vadd.f32 %v2473_v36, %v824_v38  ;;  %985 = vmatpush.msrb.mxu2 %v650_v37 }
 0x23a   :  { %v3712_v41 = vmul.f32 0.70710677, %v3707_v39 }
 0x23b   :  { %v3715_v42 = vmul.f32 0.70710677, %v3709_v40 }
 0x23c   :  { %v3718_v43 = vand.u32 2147483647, %v3712_v41  ;;  %vm766_vm12 = vcmp.ge.f32.partialorder %v3712_v41, 0.0 }
 0x23d   :  { %v3721_v44 = vand.u32 2147483647, %v3715_v42  ;;  %vm834_vm13 = vcmp.ge.f32.partialorder %v3715_v42, 0.0  ;;  %v767_v24 = vsel %vm766_vm12, 1.0, %v3297_v23 }
 0x23e   :  { %v769_v45 = vmul.f32 0.3275911, %v3718_v43  ;;  %v795_v26 = vsub.f32 0.0, %v3718_v43 }
 0x23f   :  { %v840_v46 = vmul.f32 0.3275911, %v3721_v44  ;;  %v892_v32 = vsub.f32 0.0, %v3721_v44 }
 0x240   :  { %v827_v47 = vpop.f32.mrf.mxu1  ;;  %v770_v48 = vadd.f32 1.0, %v769_v45  ;;  %v796_v38 = vmul.f32 %v795_v26, %v3718_v43 }
 0x241   :  { %v3725_v49 = vadd.f32 1.0, %v840_v46  ;;  %v3727_v50 = vadd.f32 %v2473_v36, %v827_v47 }
 0x242   :  { %2495 = vrcp.f32 %v770_v48  ;;  %vm776_vm0 = vweird.f32 %v770_v48  ;;  %v780_v62 = vand.u32 2147483647, %v770_v48  ;;  %v782_v63 = vand.u32 2147483648, %v770_v48 }
 0x243   :  { %2497 = vrcp.f32 %v3725_v49  ;;  %v3731_v51 = vmul.f32 0.70710677, %v3727_v50  ;;  %v855_v4 = vand.u32 2147483648, %v3725_v49  ;;  %v853_v10 = vand.u32 2147483647, %v3725_v49 }
 0x244   :  { %vm849_vm4 = vweird.f32 %v3725_v49  ;;  %v783_v16 = vor.u32 1.1754944e-38, %v782_v63  ;;  %vm781_vm6 = vcmp.eq.f32.partialorder %v780_v62, 8.507059e+37  ;;  %v797_v60 = vmul.f32 1.442695, %v796_v38 }
 0x245   :  { %v3734_v52 = vand.u32 2147483647, %v3731_v51  ;;  %v856_v21 = vor.u32 1.1754944e-38, %v855_v4  ;;  %vm854_vm7 = vcmp.eq.f32.partialorder %v853_v10, 8.507059e+37  ;;  %vm835_vm15 = vcmp.ge.f32.partialorder %v3731_v51, 0.0 }
 0x246   :  { %v831_v51 = vmul.f32 0.5, %v3727_v50 }
 0x247   :  { %v841_v56 = vmul.f32 0.3275911, %v3734_v52  ;;  %v893_v4 = vsub.f32 0.0, %v3734_v52 }
 0x248   :  { %v2496_v53 = vpop.eup %2495 }
 0x249   :  { %v3736_v54 = vpop.eup %2497  ;;  %v772_v55 = vmul.f32 %v2496_v53, %v770_v48  ;;  %vm777_vm1 = vweird.f32 %v2496_v53  ;;  %v3741_v59 = vadd.f32 1.0, %v841_v56  ;;  %v894_v48 = vmul.f32 %v892_v32, %v3721_v44 }
 0x24a   :  { %v845_v57 = vmul.f32 %v3736_v54, %v3725_v49  ;;  %vm850_vm2 = vweird.f32 %v3736_v54  ;;  %vm3755_vm3 = vmor %vm776_vm0, %vm777_vm1  ;;  %v895_v10 = vmul.f32 %v893_v4, %v3734_v52 }
 0x24b   :  { %v773_v58 = vsub.f32 1.0, %v772_v55  ;;  %2499 = vrcp.f32 %v3741_v59  ;;  %vm3769_vm5 = vmor %vm849_vm4, %vm850_vm2  ;;  %v870_v49 = vand.u32 2147483648, %v3741_v59  ;;  %v868_v56 = vand.u32 2147483647, %v3741_v59 }
 0x24c   :  { %v846_v0 = vsub.f32 1.0, %v845_v57  ;;  %v648_v57 = vld [vmem:[%s4352_s15] sm:$0xff]  ;;  %vm864_vm9 = vweird.f32 %v3741_v59  ;;  %v896_v63 = vmul.f32 1.442695, %v894_v48  ;;  %2501 = vpow2.f32 %v797_v60  ;;  %v2474_v60 = vld [vmem:[#allocation13] ss:$0 sm:$0xff] }
 0x24d   :  { %v774_v3 = vmul.f32 %v2496_v53, %v773_v58  ;;  %v871_v44 = vor.u32 1.1754944e-38, %v870_v49  ;;  %vm869_vm11 = vcmp.eq.f32.partialorder %v868_v56, 8.507059e+37  ;;  %v898_v19 = vmul.f32 1.442695, %v895_v10  ;;  %v653_v48 = vld [vmem:[%s4353_s9] sm:$0xff]  ;;  %v671_v10 = vld [vmem:[%s4354_s21 + $0x18] sm:$0xff] }
 0x24e   :  { %v847_v9 = vmul.f32 %v3736_v54, %v846_v0  ;;  %2503 = vpow2.f32 %v896_v63 }
 0x24f   :  { %v775_v12 = vadd.f32 %v2496_v53, %v774_v3  ;;  %2505 = vpow2.f32 %v898_v19 }
 0x250   :  { %v848_v17 = vadd.f32 %v3736_v54, %v847_v9 }
 0x251   :  { %v779_v20 = vsel %vm3755_vm3, %v2496_v53, %v775_v12  ;;  %v2500_v29 = vpop.eup %2499  ;;  %v649_v53 = vld [vmem:[%s4352_s15 + $0x8] sm:$0xff] }
 0x252   :  { %v784_v25 = vsel %vm781_vm6, %v783_v16, %v779_v20  ;;  %v852_v27 = vsel %vm3769_vm5, %v3736_v54, %v848_v17  ;;  %v860_v35 = vmul.f32 %v2500_v29, %v3741_v59  ;;  %vm865_vm8 = vweird.f32 %v2500_v29  ;;  %986 = vmatpush.msrb.mxu2 %v649_v53  ;;  %v2502_v14 = vpop.eup %2501 }
 0x253   :  { %v786_v30 = vmul.f32 1.0614054, %v784_v25  ;;  %v857_v31 = vsel %vm854_vm7, %v856_v21, %v852_v27  ;;  %vm866_vm10 = vmor %vm864_vm9, %vm865_vm8 }
 0x254   :  { %v874_v34 = vmul.f32 1.0614054, %v857_v31  ;;  %v861_v46 = vsub.f32 1.0, %v860_v35  ;;  %987 = vmatpush.msrb.mxu2 %v648_v57  ;;  %v2504_v17 = vpop.eup %2503 }
 0x255   :  { %v787_v36 = vadd.f32 -1.4531521, %v786_v30  ;;  %v764_v30 = vmul.f32 0.5, %v3707_v39  ;;  %v2506_v37 = vpop.eup %2505 }
 0x256   :  { %v876_v45 = vadd.f32 -1.4531521, %v874_v34  ;;  %v862_v55 = vmul.f32 %v2500_v29, %v861_v46  ;;  %v837_v46 = vsel %vm835_vm15, 1.0, %v3297_v23 }
 0x257   :  { %v788_v47 = vmul.f32 %v787_v36, %v784_v25  ;;  %v656_v36 = vld [vmem:[%s4353_s9 + $0x18] sm:$0xff] }
 0x258   :  { %v878_v54 = vmul.f32 %v876_v45, %v857_v31  ;;  %v863_v43 = vadd.f32 %v2500_v29, %v862_v55  ;;  %v654_v45 = vld [vmem:[%s4353_s9 + $0x8] sm:$0xff]  ;;  %v719_v55 = vlaneseq }
 0x259   :  { %v789_v58 = vadd.f32 1.4214138, %v788_v47 }
 0x25a   :  { %v880_v61 = vadd.f32 1.4214138, %v878_v54  ;;  %v867_v1 = vsel %vm866_vm10, %v2500_v29, %v863_v43  ;;  %v720_v57 = vand.u32 127, %v719_v55  ;;  %v2475_v43 = vld [vmem:[#allocation14] ss:$0 sm:$0xff]  ;;  %vm1374_vm10 = vcmask 130048  }
 0x25b   :  { %v790_v62 = vmul.f32 %v789_v58, %v784_v25  ;;  %v872_v3 = vsel %vm869_vm11, %v871_v44, %v867_v1  ;;  %v2478_v44 = vld [vmem:[#allocation10] ss:$0 sm:$0xff]  ;;  %vm1091_vm11 = vcmask 64512  }
 0x25c   :  { %v882_v0 = vmul.f32 %v880_v61, %v857_v31  ;;  %v875_v6 = vmul.f32 1.0614054, %v872_v3  ;;  %v2477_v61 = vld [vmem:[#allocation8] ss:$0 sm:$0xff]  ;;  %vm722_vm0 = vcmp.lt.s32.totalorder %v720_v57, 8  ;;  %vm726_vm1 = vcmp.ge.s32.totalorder %v720_v57, 8 }
 0x25d   :  { %v791_v2 = vadd.f32 -0.28449672, %v790_v62  ;;  %v2476_v62 = vld [vmem:[#allocation7] ss:$0 sm:$0xff]  ;;  %vm727_vm2 = vcmp.lt.s32.totalorder %v720_v57, 16  ;;  %vm731_vm4 = vcmp.ge.s32.totalorder %v720_v57, 16 }
 0x25e   :  { %v884_v5 = vadd.f32 -0.28449672, %v882_v0  ;;  %v877_v9 = vadd.f32 -1.4531521, %v875_v6  ;;  %v3298_v6 = vmov 0.0   ;;  %vm728_vm3 = vmand %vm726_vm1, %vm727_vm2  ;;  %vm732_vm5 = vcmp.lt.s32.totalorder %v720_v57, 24 }
 0x25f   :  { %v792_v7 = vmul.f32 %v791_v2, %v784_v25  ;;  %vm733_vm6 = vmand %vm731_vm4, %vm732_vm5  ;;  %vm736_vm7 = vcmp.ge.s32.totalorder %v720_v57, 24  ;;  %vm737_vm8 = vcmp.lt.s32.totalorder %v720_v57, 32 }
 0x260   :  { %v886_v8 = vmul.f32 %v884_v5, %v857_v31  ;;  %v879_v12 = vmul.f32 %v877_v9, %v872_v3  ;;  %vm738_vm9 = vmand %vm736_vm7, %vm737_vm8 }
 0x261   :  { %v793_v59 = vadd.f32 0.2548296, %v792_v7  ;;  %v3834_v7 = vsel %vm722_vm0, 1.0, %v3298_v6 }
 0x262   :  { %v888_v11 = vadd.f32 0.2548296, %v886_v8  ;;  %v881_v16 = vadd.f32 1.4214138, %v879_v12 }
 0x263   :  { %v794_v13 = vmul.f32 %v793_v59, %v784_v25  ;;  %v836_v25 = vsel %vm834_vm13, 1.0, %v3297_v23 }
 0x264   :  { %v890_v15 = vmul.f32 %v888_v11, %v857_v31  ;;  %v883_v21 = vmul.f32 %v881_v16, %v872_v3  ;;  %v830_v31 = vmul.f32 0.5, %v3709_v40  ;;  %v655_v40 = vld [vmem:[%s4353_s9 + $0x10] sm:$0xff]  ;;  %v669_v16 = vld [vmem:[%s4354_s21 + $0x8] sm:$0xff] }
 0x265   :  { %v799_v18 = vmul.f32 %v2502_v14, %v794_v13  ;;  %v2479_v14 = vld [vmem:[#allocation11] ss:$0 sm:$0xff] }
 0x266   :  { %v900_v20 = vmul.f32 %v2504_v17, %v890_v15  ;;  %v885_v52 = vadd.f32 -0.28449672, %v883_v21  ;;  %v670_v15 = vld [vmem:[%s4354_s21 + $0x10] sm:$0xff]  ;;  %v3850_v21 = vsel %vm728_vm3, 1.0, %v3298_v6 }
 0x267   :  { %v800_v22 = vsub.f32 1.0, %v799_v18 }
 0x268   :  { %v902_v26 = vsub.f32 1.0, %v900_v20  ;;  %v887_v29 = vmul.f32 %v885_v52, %v872_v3  ;;  %v668_v20 = vld [vmem:[%s4354_s21] sm:$0xff] }
 0x269   :  { %v801_v27 = vmul.f32 %v800_v22, %v767_v24  ;;  %v3859_v24 = vsel %vm733_vm6, 1.0, %v3298_v6 }
 0x26a   :  { %v904_v28 = vmul.f32 %v902_v26, %v836_v25  ;;  %v889_v32 = vadd.f32 0.2548296, %v887_v29  ;;  %v676_v29 = vld [vmem:[%s4355_s16 + $0x18] sm:$0xff] }
 0x26b   :  { %v802_v41 = vadd.f32 1.0, %v801_v27  ;;  %v3869_v27 = vsel %vm738_vm9, 1.0, %v3298_v6 }
 0x26c   :  { %v906_v42 = vadd.f32 1.0, %v904_v28  ;;  %v891_v35 = vmul.f32 %v889_v32, %v872_v3 }
 0x26d   :  { %v3801_v33 = vmul.f32 %v802_v41, %v764_v30  ;;  %v675_v30 = vld [vmem:[%s4355_s16 + $0x10] sm:$0xff]  ;;  %v674_v41 = vld [vmem:[%s4355_s16 + $0x8] sm:$0xff] }
 0x26e   :  { %v3803_v34 = vmul.f32 %v906_v42, %v830_v31  ;;  %v901_v39 = vmul.f32 %v2506_v37, %v891_v35  ;;  %v673_v31 = vld [vmem:[%s4355_s16] sm:$0xff] }
 0x26f   :  { %2308 = vmatmul.msk.f32.vlgmr.msra.gmra.mxu2 %vm913_vm14, %v3801_v33  ;;  %v623_v37 = vld [vmem:[%s4356_s20] sm:$0xff] }
 0x270   :  { %2309 = vmatmul.msk.f32.vlgmr.msra.gmra.mxu3 %vm913_vm14, %v3803_v34  ;;  %2330 = vmatmul.msk.f32.vlgmr.msrb.gmra.mxu0 %vm913_vm14, %v3803_v34  ;;  %v903_v38 = vsub.f32 1.0, %v901_v39 }
 0x271   :  { %2332 = vmatmul.msk.f32.vlgmr.msrb.gmra.mxu1 %vm913_vm14, %v3803_v34  ;;  %1007 = vmatpush.msra.mxu2 %v656_v36 }
 0x272   :  { %v905_v47 = vmul.f32 %v903_v38, %v837_v46  ;;  %v624_v46 = vld [vmem:[%s4356_s20 + $0x8] sm:$0xff] }
 0x273   :  { %1008 = vmatpush.msra.mxu2 %v655_v40 }
 0x274   :  { %v907_v49 = vadd.f32 1.0, %v905_v47 }
 0x275   :  { %1009 = vmatpush.msra.mxu2 %v654_v45 }
 0x276   :  { %v3821_v53 = vmul.f32 %v907_v49, %v831_v51 }
 0x277   :  { %2311 = vmatmul.msk.f32.vlgmr.msrb.gmra.mxu2 %vm913_vm14, %v3801_v33 }
 0x278   :  { %1010 = vmatpush.msra.mxu2 %v653_v48  ;;  %2310 = vmatmul.msk.f32.gmra.mxu3 %vm913_vm14, %v3821_v53 }
 0x279   :  { %2331 = vmatmul.msk.f32.gmra.mxu0 %vm913_vm14, %v3821_v53  ;;  %2333 = vmatmul.msk.f32.gmra.mxu1 %vm913_vm14, %v3821_v53 }
 0x27f   :  { %2312 = vmatmul.msk.f32.vlgmr.msra.gmra.mxu2 %vm913_vm14, %v3801_v33 }
 0x2ed   :  { %v1291_v50 = vpop.f32.mrf.mxu0 }
 0x2ee   :  { %v1317_v54 = vpop.f32.mrf.mxu1  ;;  %v1292_v59 = vadd.f32 %v2474_v60, %v1291_v50  ;;  %v625_v50 = vld [vmem:[%s4356_s20 + $0x10] sm:$0xff] }
 0x2ef   :  { %v1318_v5 = vadd.f32 %v2475_v43, %v1317_v54 }
 0x2f2   :  { %v934_v56 = vpop.f32.mrf.mxu2 }
 0x2f3   :  { %v963_v58 = vpop.f32.mrf.mxu3  ;;  %v935_v8 = vadd.f32 %v2476_v62, %v934_v56 }
 0x2f4   :  { %v3831_v3 = vadd.f32 %v2477_v61, %v963_v58  ;;  %v626_v58 = vld [vmem:[%s4356_s20 + $0x18] sm:$0xff] }
 0x2f5   :  { %v1323_v12 = vmul.f32 %v3834_v7, %v935_v8  ;;  %v1324_v23 = vmul.f32 %v3850_v21, %v935_v8  ;;  %v1325_v52 = vmul.f32 %v3859_v24, %v935_v8  ;;  %v1326_v28 = vmul.f32 %v3869_v27, %v935_v8 }
 0x2f6   :  { %v1294_v63 = vpop.f32.mrf.mxu0  ;;  %v1320_v1 = vpop.f32.mrf.mxu1  ;;  %v3841_v11 = vmul.f32 %v3834_v7, %v3831_v3  ;;  %v3863_v26 = vmul.f32 %v3850_v21, %v3831_v3  ;;  %v3884_v42 = vmul.f32 %v3859_v24, %v3831_v3  ;;  %v3899_v35 = vmul.f32 %v3869_v27, %v3831_v3 }
 0x2f7   :  { %v1295_v0 = vadd.f32 %v2474_v60, %v1294_v63  ;;  %v1321_v2 = vadd.f32 %v2475_v43, %v1320_v1 }
 0x2f9   :  { %2334 = vmatpush.xpose.msk.msra.mxu0 %vm913_vm14, %v1295_v0  ;;  %1445 = vmatpush.msra.mxu1 %v1321_v2  ;;  %v2480_v0 = vld [vmem:[#allocation16] ss:$0 sm:$0xff] }
 0x2fa   :  { %v989_v4 = vpop.f32.mrf.mxu2 }
 0x2fb   :  { %v990_v9 = vadd.f32 %v2478_v44, %v989_v4  ;;  %1446 = vmatpush.msra.mxu1 %v1318_v5  ;;  %v966_v13 = vpop.f32.mrf.mxu3 }
 0x2fc   :  { %v967_v17 = vadd.f32 %v2477_v61, %v966_v13 }
 0x2fd   :  { %2313 = vmatpush.xpose.msk.msrb.mxu3 %vm913_vm14, %v990_v9  ;;  %2335 = vmatpush.xpose.msk.msra.mxu0 %vm913_vm14, %v1292_v59  ;;  %v2481_v9 = vld [vmem:[#allocation17] ss:$0 sm:$0xff] }
 0x2fe   :  { %v3853_v22 = vmul.f32 %v3834_v7, %v967_v17  ;;  %v3872_v25 = vmul.f32 %v3850_v21, %v967_v17  ;;  %v3891_v32 = vmul.f32 %v3859_v24, %v967_v17  ;;  %v3904_v36 = vmul.f32 %v3869_v27, %v967_v17 }
 0x300   :  { %2314 = vmatmul.msk.f32.vlgmr.msrb.gmra.mxu3 %vm913_vm14, %v3841_v11  ;;  %2336 = vmatmul.msk.f32.vlgmr.msra.gmra.mxu0 %vm913_vm14, %v1323_v12 }
 0x301   :  { %1488 = vmatpush.msrb.mxu0 %v671_v10  ;;  %1514 = vmatpush.msra.mxu3 %v676_v29 }
 0x302   :  { %v1012_v18 = vpop.f32.mrf.mxu2 }
 0x303   :  { %1489 = vmatpush.msrb.mxu0 %v670_v15  ;;  %v1013_v19 = vadd.f32 %v2479_v14, %v1012_v18  ;;  %1515 = vmatpush.msra.mxu3 %v675_v30 }
 0x305   :  { %1490 = vmatpush.msrb.mxu0 %v669_v16  ;;  %1219 = vmatpush.msrb.mxu2 %v1013_v19 }
 0x306   :  { %1516 = vmatpush.msra.mxu3 %v674_v41  ;;  %v613_v41 = vld [vmem:[%s4357_s3] sm:$0xff] }
 0x307   :  { %1491 = vmatpush.msrb.mxu0 %v668_v20 }
 0x308   :  { %2315 = vmatmul.msk.f32.gmra.mxu3 %vm913_vm14, %v3853_v22  ;;  %2337 = vmatmul.msk.f32.gmra.mxu0 %vm913_vm14, %v1324_v23 }
 0x309   :  { %1517 = vmatpush.msra.mxu3 %v673_v31 }
 0x310   :  { %2316 = vmatmul.msk.f32.gmra.mxu3 %vm913_vm14, %v3863_v26  ;;  %2338 = vmatmul.msk.f32.gmra.mxu0 %vm913_vm14, %v1325_v52 }
 0x318   :  { %2317 = vmatmul.msk.f32.gmra.mxu3 %vm913_vm14, %v3872_v25  ;;  %2339 = vmatmul.msk.f32.gmra.mxu0 %vm913_vm14, %v1326_v28 }
 0x320   :  { %2318 = vmatmul.msk.f32.gmra.mxu3 %vm913_vm14, %v3884_v42  ;;  %2344 = vmatmul.msk.f32.vlgmr.msrb.gmra.mxu0 %vm913_vm14, %v3803_v34 }
 0x328   :  { %2319 = vmatmul.msk.f32.gmra.mxu3 %vm913_vm14, %v3891_v32  ;;  %2345 = vmatmul.msk.f32.gmra.mxu0 %vm913_vm14, %v3821_v53 }
 0x330   :  { %2320 = vmatmul.msk.f32.gmra.mxu3 %vm913_vm14, %v3899_v35 }
 0x338   :  { %2321 = vmatmul.msk.f32.gmra.mxu3 %vm913_vm14, %v3904_v36 }
 0x340   :  { %2346 = vmatmul.msk.f32.vlgmr.msra.gmra.mxu3 %vm913_vm14, %v3803_v34 }
 0x348   :  { %2347 = vmatmul.msk.f32.gmra.mxu3 %vm913_vm14, %v3821_v53 }
 0x37d   :  { %v1362_v39 = vpop.f32.mrf.mxu0 }
 0x37e   :  { %v1363_v40 = vadd.f32 %v1362_v39, %v623_v37 }
 0x380   :  { %v1375_v38 = vsel %vm1374_vm10, %v1363_v40, -inf }
 0x381   :  { %1376 = vmax.xlane.f32.xlu0 %v1375_v38 }
 0x383   :  { %v1067_v45 = vpop.f32.mrf.mxu3 }
 0x384   :  { %v1068_v31 = vadd.f32 %v1067_v45, %v613_v41 }
 0x385   :  { %v1365_v47 = vpop.f32.mrf.mxu0 }
 0x386   :  { %v1366_v48 = vadd.f32 %v1365_v47, %v624_v46  ;;  %v1092_v47 = vsel %vm1091_vm11, %v1068_v31, -inf }
 0x388   :  { %v1378_v51 = vsel %vm1374_vm10, %v1366_v48, -inf }
 0x389   :  { %1379 = vmax.xlane.f32.xlu0 %v1378_v51  ;;  %v616_v51 = vld [vmem:[%s4357_s3 + $0x18] sm:$0xff] }
 0x38b   :  { %v3916_v49 = vpop.f32.mrf.mxu3 }
 0x38d   :  { %v1368_v54 = vpop.f32.mrf.mxu0 }
 0x38e   :  { %v1369_v55 = vadd.f32 %v1368_v54, %v625_v50 }
 0x390   :  { %v1381_v56 = vsel %vm1374_vm10, %v1369_v55, -inf }
 0x391   :  { %1382 = vmax.xlane.f32.xlu1 %v1381_v56 }
 0x393   :  { %v3920_v57 = vpop.f32.mrf.mxu3 }
 0x395   :  { %v1371_v60 = vpop.f32.mrf.mxu0 }
 0x396   :  { %v1372_v61 = vadd.f32 %v1371_v60, %v626_v58  ;;  %v615_v58 = vld [vmem:[%s4357_s3 + $0x10] sm:$0xff]  ;;  %v617_v60 = vld [vmem:[%s4357_s3 + $0x20] sm:$0xff] }
 0x398   :  { %v1384_v43 = vsel %vm1374_vm10, %v1372_v61, -inf }
 0x399   :  { %1385 = vmax.xlane.f32.xlu1 %v1384_v43  ;;  %v619_v43 = vld [vmem:[%s4357_s3 + $0x30] sm:$0xff] }
 0x39b   :  { %v1076_v62 = vpop.f32.mrf.mxu3 }
 0x39c   :  { %v3938_v45 = vadd.f32 %v1076_v62, %v616_v51 }
 0x39d   :  { %v1493_v63 = vpop.f32.mrf.mxu0 }
 0x39e   :  { %v1494_v3 = vadd.f32 %v2480_v0, %v1493_v63 }
 0x3a3   :  { %v1079_v44 = vpop.f32.mrf.mxu3 }
 0x3a4   :  { %v3948_v62 = vadd.f32 %v1079_v44, %v617_v60  ;;  %v620_v44 = vld [vmem:[%s4357_s3 + $0x38] sm:$0xff] }
 0x3a5   :  { %v1496_v1 = vpop.f32.mrf.mxu0 }
 0x3a6   :  { %v1497_v2 = vadd.f32 %v2480_v0, %v1496_v1  ;;  %v1104_v1 = vsel %vm1091_vm11, %v3948_v62, -inf }
 0x3a8   :  { %2348 = vmatpush.xpose.msk.msrb.mxu1 %vm913_vm14, %v1497_v2  ;;  %v618_v2 = vld [vmem:[%s4357_s3 + $0x28] sm:$0xff] }
 0x3ab   :  { %v3925_v4 = vpop.f32.mrf.mxu3 }
 0x3ac   :  { %2349 = vmatpush.xpose.msk.msrb.mxu1 %vm913_vm14, %v1494_v3 }
 0x3b3   :  { %v1085_v5 = vpop.f32.mrf.mxu3 }
 0x3b4   :  { %v3950_v63 = vadd.f32 %v1085_v5, %v619_v43 }
 0x3b6   :  { %v1110_v3 = vsel %vm1091_vm11, %v3950_v63, -inf }
 0x3bb   :  { %v3928_v6 = vpop.f32.mrf.mxu3 }
 0x3bc   :  { %v3965_v5 = vadd.f32 %v3928_v6, %v620_v44 }
 0x3c3   :  { %v1519_v8 = vpop.f32.mrf.mxu3 }
 0x3c4   :  { %v1520_v12 = vadd.f32 %v2481_v9, %v1519_v8  ;;  %v3959_v8 = vadd.f32 %v3925_v4, %v618_v2 }
 0x3cb   :  { %v1522_v59 = vpop.f32.mrf.mxu3 }
 0x3cc   :  { %v1523_v10 = vadd.f32 %v2481_v9, %v1522_v59  ;;  %v1113_v9 = vsel %vm1091_vm11, %v3965_v5, -inf }
 0x3ce   :  { %1698 = vmatpush.msra.mxu2 %v1523_v10 }
 0x3d0   :  { %1699 = vmatpush.msra.mxu2 %v1520_v12 }
 0x3f4   :  { %v1377_v13 = vpop.xlane.xlu0 %1376 }
 0x3f5   :  { %v1387_v14 = vsub.f32 %v1363_v40, %v1377_v13 }
 0x3f7   :  { %v1391_v15 = vmul.f32 1.442695, %v1387_v14 }
 0x3f9   :  { %2507 = vpow2.f32 %v1391_v15 }
 0x3fc   :  { %v1380_v16 = vpop.xlane.xlu0 %1379 }
 0x3fd   :  { %v1388_v17 = vsub.f32 %v1366_v48, %v1380_v16  ;;  %v614_v48 = vld [vmem:[%s4357_s3 + $0x8] sm:$0xff] }
 0x3fe   :  { %v1071_v50 = vadd.f32 %v3916_v49, %v614_v48  ;;  %v1074_v49 = vadd.f32 %v3920_v57, %v615_v58  ;;  %v1107_v57 = vsel %vm1091_vm11, %v3959_v8, -inf }
 0x3ff   :  { %v2508_v18 = vpop.eup %2507  ;;  %v1393_v19 = vmul.f32 1.442695, %v1388_v17 }
 0x400   :  { %v1399_v20 = vsel %vm1374_vm10, %v2508_v18, 0.0  ;;  %v1095_v56 = vsel %vm1091_vm11, %v1071_v50, -inf  ;;  %v1098_v0 = vsel %vm1091_vm11, %v1074_v49, -inf }
 0x401   :  { %2509 = vpow2.f32 %v1393_v19  ;;  %1400 = vadd.xlane.f32.xlu2 %v1399_v20 }
 0x404   :  { %v1383_v23 = vpop.xlane.xlu1 %1382 }
 0x405   :  { %v1389_v52 = vsub.f32 %v1369_v55, %v1383_v23 }
 0x407   :  { %v2510_v28 = vpop.eup %2509  ;;  %v1395_v29 = vmul.f32 1.442695, %v1389_v52 }
 0x408   :  { %v1402_v30 = vsel %vm1374_vm10, %v2510_v28, 0.0 }
 0x409   :  { %2511 = vpow2.f32 %v1395_v29  ;;  %1403 = vadd.xlane.f32.xlu2 %v1402_v30 }
 0x40c   :  { %v1386_v37 = vpop.xlane.xlu1 %1385 }
 0x40d   :  { %v1390_v39 = vsub.f32 %v1372_v61, %v1386_v37  ;;  %v1101_v61 = vsel %vm1091_vm11, %v3938_v45, -inf }
 0x40f   :  { %v2512_v40 = vpop.eup %2511  ;;  %v1397_v38 = vmul.f32 1.442695, %v1390_v39 }
 0x410   :  { %v1405_v46 = vsel %vm1374_vm10, %v2512_v40, 0.0 }
 0x411   :  { %2513 = vpow2.f32 %v1397_v38  ;;  %1406 = vadd.xlane.f32.xlu0 %v1405_v46  ;;  %1093 = vmax.xlane.f32.xlu2 %v1092_v47 }
 0x417   :  { %v2514_v54 = vpop.eup %2513 }
 0x418   :  { %v1408_v55 = vsel %vm1374_vm10, %v2514_v54, 0.0 }
 0x419   :  { %1409 = vadd.xlane.f32.xlu1 %v1408_v55  ;;  %1096 = vmax.xlane.f32.xlu0 %v1095_v56 }
 0x41a   :  { %1102 = vmax.xlane.f32.xlu2 %v1101_v61 }
 0x421   :  { %1099 = vmax.xlane.f32.xlu1 %v1098_v0  ;;  %1105 = vmax.xlane.f32.xlu0 %v1104_v1 }
 0x422   :  { %1111 = vmax.xlane.f32.xlu2 %v1110_v3 }
 0x429   :  { %1108 = vmax.xlane.f32.xlu1 %v1107_v57 }
 0x431   :  { %1114 = vmax.xlane.f32.xlu1 %v1113_v9 }
 0x474   :  { %v1401_v59 = vpop.xlane.xlu2 %1400 }
 0x475   :  { %2515 = vrcp.f32 %v1401_v59  ;;  %v628_v59 = vld [vmem:[%s4358_s11] sm:$0xff] }
 0x47b   :  { %v2516_v10 = vpop.eup %2515 }
 0x47c   :  { %v1415_v12 = vmul.f32 %v2516_v10, %v2508_v18  ;;  %v1404_v13 = vpop.xlane.xlu2 %1403 }
 0x47d   :  { %2517 = vrcp.f32 %v1404_v13 }
 0x47e   :  { %2340 = vmatmul.msk.f32.vlgmr.msra.gmra.mxu1 %vm1374_vm10, %v1415_v12 }
 0x483   :  { %v2518_v4 = vpop.eup %2517 }
 0x484   :  { %v1094_v14 = vpop.xlane.xlu2 %1093  ;;  %v1407_v15 = vpop.xlane.xlu0 %1406  ;;  %v1416_v16 = vmul.f32 %v2518_v4, %v2510_v28 }
 0x485   :  { %v1116_v17 = vsub.f32 %v1068_v31, %v1094_v14  ;;  %2519 = vrcp.f32 %v1407_v15 }
 0x486   :  { %2341 = vmatmul.msk.f32.gmra.mxu1 %vm1374_vm10, %v1416_v16  ;;  %v629_v16 = vld [vmem:[%s4358_s11 + $0x8] sm:$0xff] }
 0x487   :  { %v1124_v6 = vmul.f32 1.442695, %v1116_v17 }
 0x489   :  { %2521 = vpow2.f32 %v1124_v6 }
 0x48b   :  { %v2520_v19 = vpop.eup %2519 }
 0x48c   :  { %v1410_v20 = vpop.xlane.xlu1 %1409  ;;  %v1097_v23 = vpop.xlane.xlu0 %1096  ;;  %v1417_v52 = vmul.f32 %v2520_v19, %v2512_v40 }
 0x48d   :  { %2523 = vrcp.f32 %v1410_v20  ;;  %v1117_v18 = vsub.f32 %v1071_v50, %v1097_v23 }
 0x48e   :  { %2342 = vmatmul.msk.f32.gmra.mxu1 %vm1374_vm10, %v1417_v52 }
 0x48f   :  { %v2522_v29 = vpop.eup %2521  ;;  %v1126_v30 = vmul.f32 1.442695, %v1117_v18  ;;  %v630_v18 = vld [vmem:[%s4358_s11 + $0x10] sm:$0xff] }
 0x490   :  { %v1140_v41 = vsel %vm1091_vm11, %v2522_v29, 0.0 }
 0x491   :  { %2525 = vpow2.f32 %v1126_v30  ;;  %1141 = vadd.xlane.f32.xlu0 %v1140_v41 }
 0x493   :  { %v2524_v28 = vpop.eup %2523 }
 0x494   :  { %v1100_v31 = vpop.xlane.xlu1 %1099  ;;  %v1418_v37 = vmul.f32 %v2524_v28, %v2514_v54  ;;  %v1106_v51 = vpop.xlane.xlu0 %1105 }
 0x495   :  { %v1118_v39 = vsub.f32 %v1074_v49, %v1100_v31  ;;  %v1120_v14 = vsub.f32 %v3948_v62, %v1106_v51 }
 0x496   :  { %2343 = vmatmul.msk.f32.gmra.mxu1 %vm1374_vm10, %v1418_v37 }
 0x497   :  { %v2526_v38 = vpop.eup %2525  ;;  %v1128_v46 = vmul.f32 1.442695, %v1118_v39  ;;  %v1132_v15 = vmul.f32 1.442695, %v1120_v14  ;;  %v631_v39 = vld [vmem:[%s4358_s11 + $0x18] sm:$0xff] }
 0x498   :  { %v1143_v40 = vsel %vm1091_vm11, %v2526_v38, 0.0 }
 0x499   :  { %2527 = vpow2.f32 %v1128_v46  ;;  %1144 = vadd.xlane.f32.xlu2 %v1143_v40 }
 0x49c   :  { %v1109_v50 = vpop.xlane.xlu1 %1108 }
 0x49d   :  { %v1121_v20 = vsub.f32 %v3959_v8, %v1109_v50 }
 0x49e   :  { %2350 = vmatmul.msk.f32.vlgmr.msrb.gmra.mxu1 %vm913_vm14, %v3841_v11  ;;  %v1103_v11 = vpop.xlane.xlu2 %1102 }
 0x49f   :  { %v2528_v47 = vpop.eup %2527  ;;  %v1119_v57 = vsub.f32 %v3938_v45, %v1103_v11  ;;  %v1134_v52 = vmul.f32 1.442695, %v1121_v20 }
 0x4a0   :  { %v1146_v48 = vsel %vm1091_vm11, %v2528_v47, 0.0 }
 0x4a1   :  { %1147 = vadd.xlane.f32.xlu1 %v1146_v48  ;;  %v1130_v9 = vmul.f32 1.442695, %v1119_v57 }
 0x4a4   :  { %v1115_v60 = vpop.xlane.xlu1 %1114 }
 0x4a6   :  { %2351 = vmatmul.msk.f32.gmra.mxu1 %vm913_vm14, %v3853_v22  ;;  %v1112_v54 = vpop.xlane.xlu2 %1111 }
 0x4a7   :  { %v1122_v28 = vsub.f32 %v3950_v63, %v1112_v54  ;;  %v1123_v63 = vsub.f32 %v3965_v5, %v1115_v60  ;;  %v634_v60 = vld [vmem:[%s4358_s11 + $0x30] sm:$0xff] }
 0x4a9   :  { %v1136_v37 = vmul.f32 1.442695, %v1122_v28  ;;  %v1138_v11 = vmul.f32 1.442695, %v1123_v63 }
 0x4ae   :  { %2352 = vmatmul.msk.f32.gmra.mxu1 %vm913_vm14, %v3863_v26 }
 0x4b6   :  { %2353 = vmatmul.msk.f32.gmra.mxu1 %vm913_vm14, %v3872_v25 }
 0x4be   :  { %2354 = vmatmul.msk.f32.gmra.mxu1 %vm913_vm14, %v3884_v42 }
 0x4c6   :  { %2355 = vmatmul.msk.f32.gmra.mxu1 %vm913_vm14, %v3891_v32 }
 0x4ce   :  { %2356 = vmatmul.msk.f32.gmra.mxu1 %vm913_vm14, %v3899_v35 }
 0x4d6   :  { %2357 = vmatmul.msk.f32.gmra.mxu1 %vm913_vm14, %v3904_v36 }
 0x4fb   :  { %v1448_v22 = vpop.f32.mrf.mxu1 }
 0x4fc   :  { %v1460_v25 = vmul.f32 %v3834_v7, %v1448_v22  ;;  %v632_v22 = vld [vmem:[%s4358_s11 + $0x20] sm:$0xff] }
 0x503   :  { %v1451_v26 = vpop.f32.mrf.mxu1 }
 0x504   :  { %v1461_v55 = vmul.f32 %v3850_v21, %v1451_v26  ;;  %v1142_v42 = vpop.xlane.xlu0 %1141 }
 0x505   :  { %2529 = vrcp.f32 %v1142_v42 }
 0x506   :  { %v1462_v56 = vadd.f32 %v1461_v55, %v1460_v25  ;;  %v633_v25 = vld [vmem:[%s4358_s11 + $0x28] sm:$0xff] }
 0x50b   :  { %v2530_v32 = vpop.eup %2529  ;;  %v1454_v58 = vpop.f32.mrf.mxu1 }
 0x50c   :  { %v1172_v35 = vmul.f32 %v2530_v32, %v2522_v29  ;;  %v1463_v36 = vmul.f32 %v3859_v24, %v1454_v58  ;;  %v1145_v61 = vpop.xlane.xlu2 %1144 }
 0x50d   :  { %2531 = vrcp.f32 %v1145_v61 }
 0x50e   :  { %v1464_v43 = vadd.f32 %v1463_v36, %v1462_v56  ;;  %2322 = vmatmul.msk.f32.vlgmr.msrb.gmra.mxu2 %vm1091_vm11, %v1172_v35 }
 0x513   :  { %v2532_v49 = vpop.eup %2531  ;;  %v1457_v0 = vpop.f32.mrf.mxu1 }
 0x514   :  { %v1465_v1 = vmul.f32 %v3869_v27, %v1457_v0  ;;  %v1148_v2 = vpop.xlane.xlu1 %1147  ;;  %v1173_v3 = vmul.f32 %v2532_v49, %v2526_v38 }
 0x515   :  { %2533 = vrcp.f32 %v1148_v2 }
 0x516   :  { %v3998_v44 = vadd.f32 %v1465_v1, %v1464_v43  ;;  %2323 = vmatmul.msk.f32.gmra.mxu2 %vm1091_vm11, %v1173_v3  ;;  %2535 = vpow2.f32 %v1130_v9  ;;  %v635_v43 = vld [vmem:[%s4358_s11 + $0x38] sm:$0xff] }
 0x517   :  { %2537 = vpow2.f32 %v1132_v15 }
 0x518   :  { %2539 = vpow2.f32 %v1134_v52 }
 0x519   :  { %2541 = vpow2.f32 %v1136_v37 }
 0x51a   :  { %2543 = vpow2.f32 %v1138_v11 }
 0x51b   :  { %v2534_v10 = vpop.eup %2533  ;;  %v1548_v12 = vpop.f32.mrf.mxu1 }
 0x51c   :  { %v4002_v13 = vadd.f32 %v1548_v12, %v628_v59  ;;  %v1174_v4 = vmul.f32 %v2534_v10, %v2528_v47  ;;  %v4009_v17 = vpop.eup %2535 }
 0x51d   :  { %v1149_v62 = vsel %vm1091_vm11, %v4009_v17, 0.0  ;;  %v4019_v29 = vpop.eup %2537 }
 0x51e   :  { %2324 = vmatmul.msk.f32.gmra.mxu2 %vm1091_vm11, %v1174_v4  ;;  %v1572_v45 = vsel %vm1374_vm10, %v4002_v13, -inf  ;;  %v1152_v31 = vsel %vm1091_vm11, %v4019_v29, 0.0  ;;  %v4029_v38 = vpop.eup %2539 }
 0x51f   :  { %1573 = vmax.xlane.f32.xlu0 %v1572_v45  ;;  %v1155_v47 = vsel %vm1091_vm11, %v4029_v38, 0.0  ;;  %v4039_v51 = vpop.eup %2541 }
 0x520   :  { %v1158_v5 = vsel %vm1091_vm11, %v4039_v51, 0.0  ;;  %v4048_v55 = vpop.eup %2543 }
 0x521   :  { %v1161_v58 = vsel %vm1091_vm11, %v4048_v55, 0.0 }
 0x523   :  { %v1551_v6 = vpop.f32.mrf.mxu1 }
 0x524   :  { %v4011_v19 = vadd.f32 %v1551_v6, %v629_v16 }
 0x526   :  { %v1575_v23 = vsel %vm1374_vm10, %v4011_v19, -inf }
 0x527   :  { %1150 = vadd.xlane.f32.xlu0 %v1149_v62  ;;  %1576 = vmax.xlane.f32.xlu2 %v1575_v23 }
 0x52b   :  { %v1554_v30 = vpop.f32.mrf.mxu1 }
 0x52c   :  { %v4021_v41 = vadd.f32 %v1554_v30, %v630_v18 }
 0x52e   :  { %v1578_v8 = vsel %vm1374_vm10, %v4021_v41, -inf }
 0x52f   :  { %1579 = vmax.xlane.f32.xlu1 %v1578_v8  ;;  %1153 = vadd.xlane.f32.xlu2 %v1152_v31 }
 0x533   :  { %v1557_v46 = vpop.f32.mrf.mxu1 }
 0x534   :  { %v4031_v40 = vadd.f32 %v1557_v46, %v631_v39 }
 0x536   :  { %v1581_v48 = vsel %vm1374_vm10, %v4031_v40, -inf }
 0x537   :  { %1156 = vadd.xlane.f32.xlu1 %v1155_v47  ;;  %1582 = vmax.xlane.f32.xlu0 %v1581_v48  ;;  %v3299_v48 = vmov 0  }
 0x538   :  { %2469 = vset.pattern.permute.xlu1 %v3299_v48  ;;  %2471 = vset.pattern.permute.xlu0 %v3299_v48 }
 0x539   :  { %2470 = vset.pattern.permute.xlu2 %v3299_v48  ;;  %v679_v48 = vld [vmem:[%s4362_s6 + $0x8] sm:$0xff] }
 0x53b   :  { %v1560_v50 = vpop.f32.mrf.mxu1 }
 0x53c   :  { %v4041_v26 = vadd.f32 %v1560_v50, %v632_v22 }
 0x53e   :  { %v1584_v54 = vsel %vm1374_vm10, %v4041_v26, -inf }
 0x53f   :  { %1159 = vadd.xlane.f32.xlu0 %v1158_v5  ;;  %1585 = vmax.xlane.f32.xlu2 %v1584_v54 }
 0x543   :  { %v1563_v42 = vpop.f32.mrf.mxu1 }
 0x544   :  { %v4050_v56 = vadd.f32 %v1563_v42, %v633_v25 }
 0x546   :  { %v1587_v32 = vsel %vm1374_vm10, %v4050_v56, -inf }
 0x547   :  { %1588 = vmax.xlane.f32.xlu1 %v1587_v32  ;;  %1162 = vadd.xlane.f32.xlu2 %v1161_v58 }
 0x54b   :  { %v1566_v35 = vpop.f32.mrf.mxu1 }
 0x54c   :  { %v4057_v36 = vadd.f32 %v1566_v35, %v634_v60 }
 0x54e   :  { %v1590_v61 = vsel %vm1374_vm10, %v4057_v36, -inf }
 0x54f   :  { %1591 = vmax.xlane.f32.xlu0 %v1590_v61 }
 0x553   :  { %v1569_v49 = vpop.f32.mrf.mxu1 }
 0x554   :  { %v4062_v0 = vadd.f32 %v1569_v49, %v635_v43 }
 0x556   :  { %v1593_v1 = vsel %vm1374_vm10, %v4062_v0, -inf }
 0x557   :  { %1594 = vmax.xlane.f32.xlu2 %v1593_v1 }
 0x592   :  { %v1574_v2 = vpop.xlane.xlu0 %1573 }
 0x593   :  { %v1596_v3 = vsub.f32 %v4002_v13, %v1574_v2 }
 0x595   :  { %v1604_v57 = vmul.f32 1.442695, %v1596_v3  ;;  %v621_v3 = vld [vmem:[%s4359_s5] sm:$0xff] }
 0x597   :  { %2545 = vpow2.f32 %v1604_v57  ;;  %v636_v57 = vld [vmem:[%s4360_s23] sm:$0xff] }
 0x59a   :  { %v1577_v9 = vpop.xlane.xlu2 %1576  ;;  %v1151_v59 = vpop.xlane.xlu0 %1150 }
 0x59b   :  { %v1597_v10 = vsub.f32 %v4011_v19, %v1577_v9  ;;  %2547 = vrcp.f32 %v1151_v59  ;;  %v627_v9 = vld [vmem:[%s4361_s28] sm:$0xff]  ;;  %v1221_v59 = vpop.f32.mrf.mxu2 }
 0x59d   :  { %v4068_v12 = vpop.eup %2545  ;;  %v1606_v4 = vmul.f32 1.442695, %v1597_v10 }
 0x59e   :  { %v1620_v14 = vsel %vm1374_vm10, %v4068_v12, 0.0 }
 0x59f   :  { %2549 = vpow2.f32 %v1606_v4  ;;  %1621 = vadd.xlane.f32.xlu1 %v1620_v14 }
 0x5a1   :  { %v2548_v45 = vpop.eup %2547 }
 0x5a2   :  { %v1580_v15 = vpop.xlane.xlu1 %1579  ;;  %v1154_v16 = vpop.xlane.xlu2 %1153  ;;  %v1175_v13 = vmul.f32 %v2548_v45, %v4009_v17 }
 0x5a3   :  { %v1598_v6 = vsub.f32 %v4021_v41, %v1580_v15  ;;  %2551 = vrcp.f32 %v1154_v16  ;;  %v1224_v4 = vpop.f32.mrf.mxu2 }
 0x5a4   :  { %2325 = vmatmul.msk.f32.gmra.mxu2 %vm1091_vm11, %v1175_v13 }
 0x5a5   :  { %v4075_v19 = vpop.eup %2549  ;;  %v1608_v20 = vmul.f32 1.442695, %v1598_v6 }
 0x5a6   :  { %v1623_v62 = vsel %vm1374_vm10, %v4075_v19, 0.0 }
 0x5a7   :  { %2553 = vpow2.f32 %v1608_v20  ;;  %1624 = vadd.xlane.f32.xlu0 %v1623_v62 }
 0x5a9   :  { %v2552_v23 = vpop.eup %2551 }
 0x5aa   :  { %v1157_v52 = vpop.xlane.xlu1 %1156  ;;  %v1583_v18 = vpop.xlane.xlu0 %1582  ;;  %v1176_v30 = vmul.f32 %v2552_v23, %v4019_v29  ;;  %v1246_v23 = vmul.f32 %v3834_v7, %v1224_v4  ;;  %v687_v4 = vld [vmem:[%s4363_s29 + $0x10] sm:$0xff] }
 0x5ab   :  { %2555 = vrcp.f32 %v1157_v52  ;;  %v1599_v17 = vsub.f32 %v4031_v40, %v1583_v18  ;;  %v1227_v16 = vpop.f32.mrf.mxu2 }
 0x5ac   :  { %2326 = vmatmul.msk.f32.gmra.mxu2 %vm1091_vm11, %v1176_v30 }
 0x5ad   :  { %v4082_v41 = vpop.eup %2553  ;;  %v1610_v28 = vmul.f32 1.442695, %v1599_v17 }
 0x5ae   :  { %v1626_v8 = vsel %vm1374_vm10, %v4082_v41, 0.0 }
 0x5af   :  { %2557 = vpow2.f32 %v1610_v28  ;;  %1627 = vadd.xlane.f32.xlu1 %v1626_v8  ;;  %v1247_v28 = vmul.f32 %v3850_v21, %v1227_v16 }
 0x5b1   :  { %v2556_v31 = vpop.eup %2555 }
 0x5b2   :  { %v1586_v37 = vpop.xlane.xlu2 %1585  ;;  %v1160_v39 = vpop.xlane.xlu0 %1159  ;;  %v1177_v46 = vmul.f32 %v2556_v31, %v4029_v38 }
 0x5b3   :  { %v1600_v29 = vsub.f32 %v4041_v26, %v1586_v37  ;;  %2559 = vrcp.f32 %v1160_v39 }
 0x5b4   :  { %2327 = vmatmul.msk.f32.gmra.mxu2 %vm1091_vm11, %v1177_v46 }
 0x5b5   :  { %v4089_v40 = vpop.eup %2557  ;;  %v1612_v63 = vmul.f32 1.442695, %v1600_v29 }
 0x5b6   :  { %v1629_v47 = vsel %vm1374_vm10, %v4089_v40, 0.0 }
 0x5b7   :  { %2561 = vpow2.f32 %v1612_v63  ;;  %1630 = vadd.xlane.f32.xlu2 %v1629_v47  ;;  %v680_v47 = vld [vmem:[%s4362_s6 + $0x10] sm:$0xff] }
 0x5b9   :  { %v2560_v11 = vpop.eup %2559 }
 0x5ba   :  { %v1589_v22 = vpop.xlane.xlu1 %1588  ;;  %v1163_v38 = vpop.xlane.xlu2 %1162  ;;  %v1178_v50 = vmul.f32 %v2560_v11, %v4039_v51 }
 0x5bb   :  { %v1601_v26 = vsub.f32 %v4050_v56, %v1589_v22  ;;  %2563 = vrcp.f32 %v1163_v38 }
 0x5bc   :  { %2328 = vmatmul.msk.f32.gmra.mxu2 %vm1091_vm11, %v1178_v50 }
 0x5bd   :  { %v4096_v5 = vpop.eup %2561  ;;  %v1614_v54 = vmul.f32 1.442695, %v1601_v26 }
 0x5be   :  { %v1632_v25 = vsel %vm1374_vm10, %v4096_v5, 0.0 }
 0x5bf   :  { %2565 = vpow2.f32 %v1614_v54  ;;  %1633 = vadd.xlane.f32.xlu0 %v1632_v25 }
 0x5c1   :  { %v2564_v42 = vpop.eup %2563 }
 0x5c2   :  { %v1592_v32 = vpop.xlane.xlu0 %1591  ;;  %v1179_v58 = vmul.f32 %v2564_v42, %v4048_v55 }
 0x5c3   :  { %v1602_v60 = vsub.f32 %v4057_v36, %v1592_v32  ;;  %v637_v32 = vld [vmem:[%s4360_s23 + $0x8] sm:$0xff] }
 0x5c4   :  { %2329 = vmatmul.msk.f32.gmra.mxu2 %vm1091_vm11, %v1179_v58 }
 0x5c5   :  { %v4103_v51 = vpop.eup %2565  ;;  %v1616_v56 = vmul.f32 1.442695, %v1602_v60 }
 0x5c6   :  { %v1635_v35 = vsel %vm1374_vm10, %v4103_v51, 0.0 }
 0x5c7   :  { %2567 = vpow2.f32 %v1616_v56  ;;  %1636 = vadd.xlane.f32.xlu1 %v1635_v35 }
 0x5ca   :  { %v1595_v61 = vpop.xlane.xlu2 %1594 }
 0x5cb   :  { %v1603_v43 = vsub.f32 %v4062_v0, %v1595_v61  ;;  %v622_v0 = vld [vmem:[%s4359_s5 + $0x8] sm:$0xff] }
 0x5cd   :  { %v4108_v55 = vpop.eup %2567  ;;  %v1618_v36 = vmul.f32 1.442695, %v1603_v43 }
 0x5ce   :  { %v1638_v49 = vsel %vm1374_vm10, %v4108_v55, 0.0 }
 0x5cf   :  { %2569 = vpow2.f32 %v1618_v36  ;;  %1639 = vadd.xlane.f32.xlu2 %v1638_v49 }
 0x5d5   :  { %v4112_v1 = vpop.eup %2569 }
 0x5d6   :  { %v1641_v2 = vsel %vm1374_vm10, %v4112_v1, 0.0 }
 0x5d7   :  { %1642 = vadd.xlane.f32.xlu0 %v1641_v2 }
 0x5e0   :  { %1261 = vperm.xlu1 %2469, %v621_v3  }
 0x5e7   :  { %1741 = vperm.xlu2 %2470, %v636_v57  }
 0x5e8   :  { %1746 = vperm.xlu1 %2469, %v637_v32  }
 0x5eb   :  { %1469 = vperm.xlu0 %2471, %v627_v9  }
 0x5ef   :  { %1266 = vperm.xlu2 %2470, %v622_v0  }
 0x612   :  { %v1622_v10 = vpop.xlane.xlu1 %1621 }
 0x613   :  { %2571 = vrcp.f32 %v1622_v10  ;;  %v688_v10 = vld [vmem:[%s4363_s29 + $0x18] sm:$0xff] }
 0x614   :  { %1841 = vmatpush.msrb.mxu3 %v688_v10 }
 0x616   :  { %1842 = vmatpush.msrb.mxu3 %v687_v4 }
 0x619   :  { %v2572_v14 = vpop.eup %2571 }
 0x61a   :  { %v1652_v45 = vmul.f32 %v2572_v14, %v4068_v12  ;;  %v1625_v15 = vpop.xlane.xlu0 %1624 }
 0x61b   :  { %2573 = vrcp.f32 %v1625_v15 }
 0x61c   :  { %2358 = vmatmul.msk.f32.vlgmr.msra.gmra.mxu2 %vm1374_vm10, %v1652_v45  ;;  %v686_v45 = vld [vmem:[%s4363_s29 + $0x8] sm:$0xff] }
 0x61d   :  { %1843 = vmatpush.msrb.mxu3 %v686_v45 }
 0x621   :  { %v2574_v13 = vpop.eup %2573 }
 0x622   :  { %v1628_v6 = vpop.xlane.xlu1 %1627  ;;  %v1653_v20 = vmul.f32 %v2574_v13, %v4075_v19  ;;  %v1245_v19 = vmul.f32 %v3834_v7, %v1221_v59 }
 0x623   :  { %2575 = vrcp.f32 %v1628_v6 }
 0x624   :  { %2359 = vmatmul.msk.f32.gmra.mxu2 %vm1374_vm10, %v1653_v20  ;;  %v1249_v31 = vadd.f32 %v1247_v28, %v1245_v19 }
 0x627   :  { %v1230_v62 = vpop.f32.mrf.mxu2 }
 0x628   :  { %v1248_v52 = vmul.f32 %v3850_v21, %v1230_v62 }
 0x629   :  { %v2576_v18 = vpop.eup %2575 }
 0x62a   :  { %v1250_v30 = vadd.f32 %v1248_v52, %v1246_v23  ;;  %v1631_v12 = vpop.xlane.xlu2 %1630  ;;  %v1654_v17 = vmul.f32 %v2576_v18, %v4082_v41  ;;  %v681_v41 = vld [vmem:[%s4362_s6 + $0x18] sm:$0xff] }
 0x62b   :  { %2577 = vrcp.f32 %v1631_v12  ;;  %1769 = vmatpush.msra.mxu0 %v681_v41 }
 0x62c   :  { %2360 = vmatmul.msk.f32.gmra.mxu2 %vm1374_vm10, %v1654_v17 }
 0x62d   :  { %1770 = vmatpush.msra.mxu0 %v680_v47 }
 0x62f   :  { %v1233_v8 = vpop.f32.mrf.mxu2  ;;  %1771 = vmatpush.msra.mxu0 %v679_v48 }
 0x630   :  { %v1251_v37 = vmul.f32 %v3859_v24, %v1233_v8 }
 0x631   :  { %v2578_v39 = vpop.eup %2577 }
 0x632   :  { %v1253_v46 = vadd.f32 %v1251_v37, %v1249_v31  ;;  %v1634_v29 = vpop.xlane.xlu0 %1633  ;;  %v1655_v63 = vmul.f32 %v2578_v39, %v4089_v40  ;;  %v678_v40 = vld [vmem:[%s4362_s6] sm:$0xff] }
 0x633   :  { %2579 = vrcp.f32 %v1634_v29  ;;  %1772 = vmatpush.msra.mxu0 %v678_v40 }
 0x634   :  { %2361 = vmatmul.msk.f32.gmra.mxu2 %vm1374_vm10, %v1655_v63 }
 0x637   :  { %v1236_v11 = vpop.f32.mrf.mxu2 }
 0x638   :  { %v1252_v22 = vmul.f32 %v3859_v24, %v1236_v11  ;;  %v2482_v11 = vld [vmem:[#allocation19] ss:$0 sm:$0xff] }
 0x639   :  { %v2580_v38 = vpop.eup %2579 }
 0x63a   :  { %v1254_v50 = vadd.f32 %v1252_v22, %v1250_v30  ;;  %v1637_v26 = vpop.xlane.xlu1 %1636  ;;  %v1656_v54 = vmul.f32 %v2580_v38, %v4096_v5 }
 0x63b   :  { %2581 = vrcp.f32 %v1637_v26 }
 0x63c   :  { %2362 = vmatmul.msk.f32.gmra.mxu2 %vm1374_vm10, %v1656_v54 }
 0x63f   :  { %v1239_v25 = vpop.f32.mrf.mxu2 }
 0x640   :  { %v1255_v42 = vmul.f32 %v3869_v27, %v1239_v25  ;;  %v1777_v25 = vmul.f32 0.26894143, %v3801_v33 }
 0x641   :  { %v2582_v58 = vpop.eup %2581 }
 0x642   :  { %v1640_v60 = vpop.xlane.xlu2 %1639  ;;  %v1657_v56 = vmul.f32 %v2582_v58, %v4103_v51  ;;  %v1257_v35 = vadd.f32 %v1255_v42, %v1253_v46 }
 0x643   :  { %2583 = vrcp.f32 %v1640_v60  ;;  %v3300_v60 = vmov 32.0  }
 0x644   :  { %2363 = vmatmul.msk.f32.gmra.mxu2 %vm1374_vm10, %v1657_v56 }
 0x647   :  { %v1242_v61 = vpop.f32.mrf.mxu2 }
 0x648   :  { %v1256_v5 = vmul.f32 %v3869_v27, %v1242_v61 }
 0x649   :  { %v2584_v43 = vpop.eup %2583 }
 0x64a   :  { %v1643_v36 = vpop.xlane.xlu0 %1642  ;;  %v1658_v49 = vmul.f32 %v2584_v43, %v4108_v55  ;;  %v1258_v2 = vadd.f32 %v1256_v5, %v1254_v50  ;;  %v1742_v62 = vpop.permute.xlu2 %1741 }
 0x64b   :  { %2585 = vrcp.f32 %v1643_v36 }
 0x64c   :  { %2364 = vmatmul.msk.f32.gmra.mxu2 %vm1374_vm10, %v1658_v49  ;;  %2587 = vrcp.f32 %v3300_v60  ;;  %v702_v60 = vld [vmem:[%s4366_s26] sm:$0xff] }
 0x651   :  { %v2586_v3 = vpop.eup %2585 }
 0x652   :  { %v1659_v51 = vmul.f32 %v2586_v3, %v4112_v1  ;;  %v685_v1 = vld [vmem:[%s4363_s29] sm:$0xff]  ;;  %v1262_v30 = vpop.permute.xlu1 %1261  ;;  %v1267_v47 = vpop.permute.xlu2 %1266  ;;  %v2483_v3 = vld [vmem:[#allocation23] ss:$0 sm:$0xff] }
 0x653   :  { %1844 = vmatpush.msrb.mxu3 %v685_v1  ;;  %v1269_v28 = vmul.f32 %v1262_v30, %v1257_v35  ;;  %v1270_v38 = vmul.f32 %v1267_v47, %v1258_v2  ;;  %v2588_v56 = vpop.eup %2587  ;;  %v1853_v1 = vmul.f32 0.26894143, %v3821_v53  ;;  %v2484_v47 = vld [vmem:[#allocation20] ss:$0 sm:$0xff] }
 0x654   :  { %2365 = vmatmul.msk.f32.gmra.mxu2 %vm1374_vm10, %v1659_v51  ;;  %v1783_v35 = vmul.f32 32.0, %v2588_v56  ;;  %vm1787_vm12 = vweird.f32 %v2588_v56 }
 0x656   :  { %v1784_v61 = vsub.f32 1.0, %v1783_v35 }
 0x658   :  { %v1785_v5 = vmul.f32 %v2588_v56, %v1784_v61 }
 0x65a   :  { %v1747_v22 = vpop.permute.xlu1 %1746  ;;  %v1786_v43 = vadd.f32 %v2588_v56, %v1785_v5 }
 0x65c   :  { %v4170_v36 = vsel %vm1787_vm12, %v2588_v56, %v1786_v43 }
 0x65d   :  { %v4149_v57 = vpop.permute.xlu0 %1469 }
 0x65e   :  { %v1472_v9 = vmul.f32 %v4149_v57, %v3998_v44 }
 0x660   :  { %2366 = vmatmul.msk.f32.vlgmr.msra.gmra.mxu0 %vm913_vm14, %v1472_v9 }
 0x69f   :  { %v1701_v0 = vpop.f32.mrf.mxu2 }
 0x6a0   :  { %v1725_v44 = vmul.f32 %v3834_v7, %v1701_v0 }
 0x6a7   :  { %v1704_v55 = vpop.f32.mrf.mxu2 }
 0x6a8   :  { %v1726_v19 = vmul.f32 %v3834_v7, %v1704_v55 }
 0x6af   :  { %v1707_v59 = vpop.f32.mrf.mxu2 }
 0x6b0   :  { %v1727_v13 = vmul.f32 %v3850_v21, %v1707_v59  ;;  %v1852_v59 = vmul.f32 0.26894143, %v3803_v34 }
 0x6b2   :  { %v1729_v20 = vadd.f32 %v1727_v13, %v1725_v44  ;;  %v695_v13 = vld [vmem:[%s4364_s14 + $0x18] sm:$0xff]  ;;  %v694_v44 = vld [vmem:[%s4364_s14 + $0x10] sm:$0xff] }
 0x6b3   :  { %1928 = vmatpush.msrb.mxu0 %v695_v13 }
 0x6b5   :  { %1929 = vmatpush.msrb.mxu0 %v694_v44 }
 0x6b7   :  { %v1710_v14 = vpop.f32.mrf.mxu2 }
 0x6b8   :  { %v1728_v12 = vmul.f32 %v3850_v21, %v1710_v14 }
 0x6ba   :  { %v1730_v37 = vadd.f32 %v1728_v12, %v1726_v19 }
 0x6bf   :  { %v1713_v15 = vpop.f32.mrf.mxu2 }
 0x6c0   :  { %v1731_v6 = vmul.f32 %v3859_v24, %v1713_v15 }
 0x6c2   :  { %v1733_v52 = vadd.f32 %v1731_v6, %v1729_v20  ;;  %v693_v6 = vld [vmem:[%s4364_s14 + $0x8] sm:$0xff]  ;;  %v692_v20 = vld [vmem:[%s4364_s14] sm:$0xff] }
 0x6c3   :  { %1930 = vmatpush.msrb.mxu0 %v693_v6 }
 0x6c5   :  { %1931 = vmatpush.msrb.mxu0 %v692_v20 }
 0x6c7   :  { %v1716_v16 = vpop.f32.mrf.mxu2 }
 0x6c8   :  { %v1732_v8 = vmul.f32 %v3859_v24, %v1716_v16 }
 0x6ca   :  { %v1734_v29 = vadd.f32 %v1732_v8, %v1730_v37 }
 0x6cf   :  { %v1719_v23 = vpop.f32.mrf.mxu2 }
 0x6d0   :  { %v1735_v18 = vmul.f32 %v3869_v27, %v1719_v23 }
 0x6d2   :  { %v1737_v17 = vadd.f32 %v1735_v18, %v1733_v52 }
 0x6d4   :  { %v1749_v31 = vmul.f32 %v1742_v62, %v1737_v17 }
 0x6d6   :  { %v1816_v39 = vadd.f32 %v1749_v31, %v1269_v28 }
 0x6d7   :  { %v1722_v46 = vpop.f32.mrf.mxu2 }
 0x6d8   :  { %v1818_v63 = vmul.f32 0.5, %v1816_v39  ;;  %v1736_v41 = vmul.f32 %v3869_v27, %v1722_v46 }
 0x6da   :  { %v1738_v48 = vadd.f32 %v1736_v41, %v1734_v29  ;;  %2367 = vmatmul.msk.f32.vlgmr.msrb.gmra.mxu3 %vm913_vm14, %v1818_v63 }
 0x6dc   :  { %v1750_v50 = vmul.f32 %v1747_v22, %v1738_v48  ;;  %v2485_v22 = vld [vmem:[#allocation22] ss:$0 sm:$0xff] }
 0x6dd   :  { %v1774_v26 = vpop.f32.mrf.mxu0 }
 0x6de   :  { %v1775_v54 = vadd.f32 %v2482_v11, %v1774_v26  ;;  %v1817_v40 = vadd.f32 %v1750_v50, %v1270_v38  ;;  %v700_v26 = vld [vmem:[%s4365_s24 + $0x18] sm:$0xff] }
 0x6df   :  { %1957 = vmatpush.msra.mxu0 %v700_v26 }
 0x6e0   :  { %v1819_v42 = vmul.f32 0.5, %v1817_v40  ;;  %v1778_v32 = vadd.f32 %v1777_v25, %v1775_v54  ;;  %v705_v54 = vld [vmem:[%s4366_s26 + $0x18] sm:$0xff]  ;;  %v699_v40 = vld [vmem:[%s4365_s24 + $0x10] sm:$0xff] }
 0x6e1   :  { %1983 = vmatpush.msra.mxu3 %v705_v54  ;;  %v704_v25 = vld [vmem:[%s4366_s26 + $0x10] sm:$0xff]  ;;  %1958 = vmatpush.msra.mxu0 %v699_v40  ;;  %v2614_v54 = vld [vmem:[%s4356_s20 + $0x8] sm:$0xff] }
 0x6e2   :  { %2368 = vmatmul.msk.f32.gmra.mxu3 %vm913_vm14, %v1819_v42  ;;  %v1779_v58 = vsel %vm913_vm14, %v1778_v32, 0.0  ;;  %v698_v42 = vld [vmem:[%s4365_s24 + $0x8] sm:$0xff] }
 0x6e3   :  { %1780 = vadd.xlane.f32.xlu2 %v1779_v58  ;;  %1984 = vmatpush.msra.mxu3 %v704_v25  ;;  %v697_v58 = vld [vmem:[%s4365_s24] sm:$0xff] }
 0x6e4   :  { %1959 = vmatpush.msra.mxu0 %v698_v42 }
 0x6e6   :  { %1960 = vmatpush.msra.mxu0 %v697_v58 }
 0x756   :  { %v1781_v49 = vpop.xlane.xlu2 %1780 }
 0x757   :  { %v1789_v33 = vmul.f32 %v4170_v36, %v1781_v49 }
 0x759   :  { %v1790_v2 = vsub.f32 %v1778_v32, %v1789_v33  ;;  %v703_v32 = vld [vmem:[%s4366_s26 + $0x8] sm:$0xff] }
 0x75a   :  { %1985 = vmatpush.msra.mxu3 %v703_v32  ;;  %v2615_v32 = vld [vmem:[%s4356_s20 + $0x10] sm:$0xff] }
 0x75b   :  { %v1791_v51 = vmul.f32 %v1790_v2, %v1790_v2 }
 0x75c   :  { %1986 = vmatpush.msra.mxu3 %v702_v60 }
 0x75d   :  { %v1846_v9 = vpop.f32.mrf.mxu3  ;;  %v1792_v0 = vsel %vm913_vm14, %v1791_v51, 0.0 }
 0x75e   :  { %v1847_v55 = vadd.f32 %v2483_v3, %v1846_v9  ;;  %1793 = vadd.xlane.f32.xlu2 %v1792_v0 }
 0x760   :  { %v1854_v10 = vadd.f32 %v1852_v59, %v1847_v55 }
 0x762   :  { %v1856_v4 = vsel %vm913_vm14, %v1854_v10, 0.0 }
 0x763   :  { %1857 = vadd.xlane.f32.xlu1 %v1856_v4 }
 0x765   :  { %v1849_v14 = vpop.f32.mrf.mxu3 }
 0x766   :  { %v1850_v45 = vadd.f32 %v2483_v3, %v1849_v14 }
 0x768   :  { %v1855_v15 = vadd.f32 %v1853_v1, %v1850_v45  ;;  %v2488_v1 = vld [vmem:[#allocation26] ss:$0 sm:$0xff] }
 0x76a   :  { %v1859_v16 = vsel %vm913_vm14, %v1855_v15, 0.0 }
 0x76b   :  { %1860 = vadd.xlane.f32.xlu0 %v1859_v16 }
 0x7d1   :  { %v1794_v34 = vpop.xlane.xlu2 %1793 }
 0x7d2   :  { %v1795_v62 = vmul.f32 %v1794_v34, %v4170_v36 }
 0x7d4   :  { %v1796_v23 = vadd.f32 1e-05, %v1795_v62 }
 0x7d6   :  { %2589 = vrsqrt.f32 %v1796_v23  ;;  %v1858_v52 = vpop.xlane.xlu1 %1857  ;;  %vm1803_vm15 = vweird.f32 %v1796_v23 }
 0x7d7   :  { %v1862_v53 = vmul.f32 %v1858_v52, %v4170_v36 }
 0x7d9   :  { %v4184_v18 = vsub.f32 %v1854_v10, %v1862_v53  ;;  %v2486_v10 = vld [vmem:[#allocation25] ss:$0 sm:$0xff] }
 0x7db   :  { %v1866_v30 = vmul.f32 %v4184_v18, %v4184_v18 }
 0x7dc   :  { %v2590_v12 = vpop.eup %2589 }
 0x7dd   :  { %v1798_v17 = vmul.f32 %v2590_v12, %v1796_v23  ;;  %v1868_v28 = vsel %vm913_vm14, %v1866_v30, 0.0  ;;  %vm1804_vm13 = vweird.f32 %v2590_v12  ;;  %v2489_v30 = vld [vmem:[%s4367_s1] ss:$0 sm:$0xff] }
 0x7de   :  { %1869 = vadd.xlane.f32.xlu1 %v1868_v28  ;;  %v1861_v19 = vpop.xlane.xlu0 %1860  ;;  %vm1805_vm0 = vmor %vm1803_vm15, %vm1804_vm13 }
 0x7df   :  { %v1799_v8 = vmul.f32 %v2590_v12, %v1798_v17  ;;  %v1863_v31 = vmul.f32 %v1861_v19, %v4170_v36 }
 0x7e1   :  { %v1800_v37 = vmul.f32 0.5, %v1799_v8  ;;  %v4190_v39 = vsub.f32 %v1855_v15, %v1863_v31  ;;  %v2490_v31 = vld [vmem:[%s4368_s2] ss:$0 sm:$0xff] }
 0x7e3   :  { %v1801_v46 = vsub.f32 1.5, %v1800_v37  ;;  %v1867_v29 = vmul.f32 %v4190_v39, %v4190_v39 }
 0x7e5   :  { %v1802_v63 = vmul.f32 %v2590_v12, %v1801_v46  ;;  %v1871_v41 = vsel %vm913_vm14, %v1867_v29, 0.0 }
 0x7e6   :  { %1872 = vadd.xlane.f32.xlu2 %v1871_v41 }
 0x7e7   :  { %v1806_v48 = vsel %vm1805_vm0, %v2590_v12, %v1802_v63  ;;  %v2487_v12 = vld [vmem:[#allocation28] ss:$0 sm:$0xff] }
 0x7e8   :  { %v1807_v11 = vmul.f32 %v1806_v48, %v1790_v2 }
 0x7ea   :  { %v1811_v38 = vmul.f32 %v2484_v47, %v1807_v11  ;;  %v2613_v11 = vld [vmem:[%s4356_s20] sm:$0xff] }
 0x7ec   :  { %v4195_v50 = vadd.f32 %v2485_v22, %v1811_v38 }
 0x7ee   :  { %2369 = vmatmul.msk.f32.vlgmr.msrb.gmra.mxu0 %vm913_vm14, %v4195_v50 }
 0x851   :  { %v1870_v56 = vpop.xlane.xlu1 %1869 }
 0x852   :  { %v1874_v35 = vmul.f32 %v1870_v56, %v4170_v36 }
 0x854   :  { %v1876_v61 = vadd.f32 1e-05, %v1874_v35  ;;  %v2616_v35 = vld [vmem:[%s4356_s20 + $0x18] sm:$0xff] }
 0x856   :  { %2591 = vrsqrt.f32 %v1876_v61  ;;  %vm1884_vm2 = vweird.f32 %v1876_v61 }
 0x859   :  { %v1873_v5 = vpop.xlane.xlu2 %1872 }
 0x85a   :  { %v1875_v43 = vmul.f32 %v1873_v5, %v4170_v36 }
 0x85c   :  { %v2592_v49 = vpop.eup %2591  ;;  %v1877_v33 = vadd.f32 1e-05, %v1875_v43 }
 0x85d   :  { %v1879_v2 = vmul.f32 %v2592_v49, %v1876_v61  ;;  %vm1885_vm1 = vweird.f32 %v2592_v49 }
 0x85e   :  { %2593 = vrsqrt.f32 %v1877_v33  ;;  %vm1886_vm3 = vmor %vm1884_vm2, %vm1885_vm1  ;;  %vm1894_vm5 = vweird.f32 %v1877_v33 }
 0x85f   :  { %v1880_v3 = vmul.f32 %v2592_v49, %v1879_v2 }
 0x861   :  { %v1881_v51 = vmul.f32 0.5, %v1880_v3 }
 0x863   :  { %v1882_v9 = vsub.f32 1.5, %v1881_v51 }
 0x864   :  { %v2594_v0 = vpop.eup %2593 }
 0x865   :  { %v1883_v55 = vmul.f32 %v2592_v49, %v1882_v9  ;;  %v1889_v59 = vmul.f32 %v2594_v0, %v1877_v33  ;;  %vm1895_vm4 = vweird.f32 %v2594_v0 }
 0x866   :  { %vm1896_vm6 = vmor %vm1894_vm5, %vm1895_vm4 }
 0x867   :  { %v1887_v4 = vsel %vm1886_vm3, %v2592_v49, %v1883_v55  ;;  %v1890_v14 = vmul.f32 %v2594_v0, %v1889_v59 }
 0x868   :  { %v1898_v45 = vmul.f32 %v1887_v4, %v4184_v18 }
 0x869   :  { %v1891_v15 = vmul.f32 0.5, %v1890_v14 }
 0x86a   :  { %v1903_v16 = vmul.f32 %v2486_v10, %v1898_v45 }
 0x86b   :  { %v1892_v13 = vsub.f32 1.5, %v1891_v15  ;;  %v1933_v52 = vpop.f32.mrf.mxu0 }
 0x86c   :  { %v1908_v44 = vadd.f32 %v2488_v1, %v1903_v16  ;;  %v1934_v19 = vadd.f32 %v2487_v12, %v1933_v52 }
 0x86d   :  { %v1893_v6 = vmul.f32 %v2594_v0, %v1892_v13 }
 0x86e   :  { %2370 = vmatmul.msk.f32.vlgmr.msra.gmra.mxu0 %vm913_vm14, %v1908_v44  ;;  %2372 = vmatmul.msk.f32.vlgmr.msra.gmra.mxu3 %vm913_vm14, %v1908_v44  ;;  %v1994_v46 = vmul.f32 %v3834_v7, %v1934_v19  ;;  %v1995_v63 = vmul.f32 %v3850_v21, %v1934_v19  ;;  %v1996_v41 = vmul.f32 %v3859_v24, %v1934_v19 }
 0x86f   :  { %v1897_v20 = vsel %vm1896_vm6, %v2594_v0, %v1893_v6  ;;  %v1997_v47 = vmul.f32 %v3869_v27, %v1934_v19 }
 0x870   :  { %v1899_v34 = vmul.f32 %v1897_v20, %v4190_v39 }
 0x872   :  { %v1904_v62 = vmul.f32 %v2486_v10, %v1899_v34  ;;  %v710_v34 = vld [vmem:[#allocation35 + $0x18] sm:$0xff] }
 0x873   :  { %2156 = vmatpush.msra.mxu1 %v710_v34 }
 0x874   :  { %v1909_v23 = vadd.f32 %v2488_v1, %v1904_v62  ;;  %v709_v62 = vld [vmem:[#allocation35 + $0x10] sm:$0xff] }
 0x875   :  { %2157 = vmatpush.msra.mxu1 %v709_v62 }
 0x876   :  { %2371 = vmatmul.msk.f32.gmra.mxu0 %vm913_vm14, %v1909_v23  ;;  %2373 = vmatmul.msk.f32.gmra.mxu3 %vm913_vm14, %v1909_v23 }
 0x8eb   :  { %v1962_v53 = vpop.f32.mrf.mxu0 }
 0x8ec   :  { %v1963_v8 = vadd.f32 %v2489_v30, %v1962_v53 }
 0x8f1   :  { %v1988_v18 = vpop.f32.mrf.mxu3 }
 0x8f2   :  { %v1989_v29 = vadd.f32 %v2490_v31, %v1988_v18 }
 0x8f3   :  { %v1965_v17 = vpop.f32.mrf.mxu0 }
 0x8f4   :  { %v1966_v28 = vadd.f32 %v2489_v30, %v1965_v17 }
 0x8f6   :  { %2374 = vmatpush.xpose.msk.msrb.mxu0 %vm913_vm14, %v1966_v28 }
 0x8f9   :  { %v1991_v37 = vpop.f32.mrf.mxu3 }
 0x8fa   :  { %v1992_v39 = vadd.f32 %v2490_v31, %v1991_v37  ;;  %2375 = vmatpush.xpose.msk.msrb.mxu0 %vm913_vm14, %v1963_v8  ;;  %v708_v37 = vld [vmem:[#allocation35 + $0x8] sm:$0xff] }
 0x8fb   :  { %2158 = vmatpush.msra.mxu1 %v708_v37 }
 0x8fc   :  { %2115 = vmatpush.msrb.mxu3 %v1992_v39  ;;  %v707_v39 = vld [vmem:[#allocation35] sm:$0xff] }
 0x8fd   :  { %2376 = vmatmul.msk.f32.vlgmr.msrb.gmra.mxu0 %vm913_vm14, %v1994_v46  ;;  %2159 = vmatpush.msra.mxu1 %v707_v39 }
 0x8fe   :  { %2116 = vmatpush.msrb.mxu3 %v1989_v29 }
 0x905   :  { %2377 = vmatmul.msk.f32.gmra.mxu0 %vm913_vm14, %v1995_v63 }
 0x90d   :  { %2378 = vmatmul.msk.f32.gmra.mxu0 %vm913_vm14, %v1996_v41 }
 0x915   :  { %2379 = vmatmul.msk.f32.gmra.mxu0 %vm913_vm14, %v1997_v47 }
 0x97a   :  { %v2033_v48 = vpop.f32.mrf.mxu0 }
 0x97b   :  { %v2034_v22 = vadd.f32 %v2613_v11, %v2033_v48 }
 0x97d   :  { %v2045_v38 = vsel %vm1374_vm10, %v2034_v22, -inf }
 0x97e   :  { %2046 = vmax.xlane.f32.xlu1 %v2045_v38 }
 0x982   :  { %v2036_v26 = vpop.f32.mrf.mxu0 }
 0x983   :  { %v2037_v40 = vadd.f32 %v2614_v54, %v2036_v26 }
 0x985   :  { %v2048_v25 = vsel %vm1374_vm10, %v2037_v40, -inf }
 0x986   :  { %2049 = vmax.xlane.f32.xlu2 %v2048_v25  ;;  %v2491_v25 = vld [vmem:[%s4369_s4] ss:$0 sm:$0xff] }
 0x98a   :  { %v2039_v42 = vpop.f32.mrf.mxu0 }
 0x98b   :  { %v2040_v58 = vadd.f32 %v2615_v32, %v2039_v42 }
 0x98d   :  { %v2051_v60 = vsel %vm1374_vm10, %v2040_v58, -inf }
 0x98e   :  { %2052 = vmax.xlane.f32.xlu0 %v2051_v60  ;;  %v716_v60 = vld [vmem:[%s3565_s30 + $0x10] sm:$0xff] }
 0x992   :  { %v2042_v56 = vpop.f32.mrf.mxu0 }
 0x993   :  { %v2043_v61 = vadd.f32 %v2616_v35, %v2042_v56 }
 0x995   :  { %v2054_v5 = vsel %vm1374_vm10, %v2043_v61, -inf }
 0x996   :  { %2055 = vmax.xlane.f32.xlu1 %v2054_v5  ;;  %v715_v5 = vld [vmem:[%s3565_s30 + $0x8] sm:$0xff] }
 0x9f1   :  { %v2047_v43 = vpop.xlane.xlu1 %2046 }
 0x9f2   :  { %v2057_v49 = vsub.f32 %v2034_v22, %v2047_v43  ;;  %v714_v43 = vld [vmem:[%s3565_s30] sm:$0xff] }
 0x9f4   :  { %v2061_v33 = vmul.f32 1.442695, %v2057_v49 }
 0x9f6   :  { %2595 = vpow2.f32 %v2061_v33 }
 0x9f9   :  { %v2050_v2 = vpop.xlane.xlu2 %2049 }
 0x9fa   :  { %v2058_v3 = vsub.f32 %v2037_v40, %v2050_v2 }
 0x9fc   :  { %v2596_v51 = vpop.eup %2595  ;;  %v2063_v9 = vmul.f32 1.442695, %v2058_v3 }
 0x9fd   :  { %v2069_v0 = vsel %vm1374_vm10, %v2596_v51, 0.0 }
 0x9fe   :  { %2597 = vpow2.f32 %v2063_v9  ;;  %2070 = vadd.xlane.f32.xlu2 %v2069_v0 }
 0xa01   :  { %v2053_v55 = vpop.xlane.xlu0 %2052 }
 0xa02   :  { %v2059_v59 = vsub.f32 %v2040_v58, %v2053_v55  ;;  %v717_v58 = vld [vmem:[%s3565_s30 + $0x18] sm:$0xff]  ;;  %s3301_s30 = smov [#allocation38]  }
 0xa03   :  { %2214 = vmatpush.msrb.mxu2 %v717_v58  ;;  %s2228_s19 = sshll.u32 %s3301_s30, 4  ;;  %s2229_s19 = int_to_ptr.vmem [resolvable:$true] %s2228_s19 }
 0xa04   :  { %v2598_v10 = vpop.eup %2597  ;;  %v2065_v4 = vmul.f32 1.442695, %v2059_v59  ;;  %v2492_v59 = vld [vmem:[%s4370_s7] ss:$0 sm:$0xff] }
 0xa05   :  { %v2072_v14 = vsel %vm1374_vm10, %v2598_v10, 0.0  ;;  %2215 = vmatpush.msrb.mxu2 %v716_v60 }
 0xa06   :  { %2599 = vpow2.f32 %v2065_v4  ;;  %2073 = vadd.xlane.f32.xlu0 %v2072_v14  ;;  %v2493_v14 = vld [vmem:[%s4371_s17] ss:$0 sm:$0xff] }
 0xa07   :  { %2216 = vmatpush.msrb.mxu2 %v715_v5 }
 0xa09   :  { %v2056_v45 = vpop.xlane.xlu1 %2055  ;;  %2217 = vmatpush.msrb.mxu2 %v714_v43 }
 0xa0a   :  { %v2060_v1 = vsub.f32 %v2043_v61, %v2056_v45 }
 0xa0c   :  { %v2600_v15 = vpop.eup %2599  ;;  %v2067_v16 = vmul.f32 1.442695, %v2060_v1  ;;  %v2494_v1 = vld [vmem:[%s3570_s27] ss:$0 sm:$0xff] }
 0xa0d   :  { %v2075_v13 = vsel %vm1374_vm10, %v2600_v15, 0.0 }
 0xa0e   :  { %2601 = vpow2.f32 %v2067_v16  ;;  %2076 = vadd.xlane.f32.xlu1 %v2075_v13 }
 0xa14   :  { %v2602_v44 = vpop.eup %2601 }
 0xa15   :  { %v2078_v6 = vsel %vm1374_vm10, %v2602_v44, 0.0 }
 0xa16   :  { %2079 = vadd.xlane.f32.xlu2 %v2078_v6 }
 0xa71   :  { %v2071_v20 = vpop.xlane.xlu2 %2070 }
 0xa72   :  { %2603 = vrcp.f32 %v2071_v20 }
 0xa78   :  { %v2604_v23 = vpop.eup %2603 }
 0xa79   :  { %v2085_v52 = vmul.f32 %v2604_v23, %v2596_v51  ;;  %v2074_v53 = vpop.xlane.xlu0 %2073 }
 0xa7a   :  { %2605 = vrcp.f32 %v2074_v53 }
 0xa7b   :  { %2380 = vmatmul.msk.f32.vlgmr.msrb.gmra.mxu3 %vm1374_vm10, %v2085_v52 }
 0xa80   :  { %v2606_v18 = vpop.eup %2605 }
 0xa81   :  { %v2077_v30 = vpop.xlane.xlu1 %2076  ;;  %v2086_v12 = vmul.f32 %v2606_v18, %v2598_v10 }
 0xa82   :  { %2607 = vrcp.f32 %v2077_v30 }
 0xa83   :  { %2381 = vmatmul.msk.f32.gmra.mxu3 %vm1374_vm10, %v2086_v12 }
 0xa88   :  { %v2608_v17 = vpop.eup %2607 }
 0xa89   :  { %v2080_v28 = vpop.xlane.xlu2 %2079  ;;  %v2087_v19 = vmul.f32 %v2608_v17, %v2600_v15 }
 0xa8a   :  { %2609 = vrcp.f32 %v2080_v28 }
 0xa8b   :  { %2382 = vmatmul.msk.f32.gmra.mxu3 %vm1374_vm10, %v2087_v19 }
 0xa90   :  { %v2610_v8 = vpop.eup %2609 }
 0xa91   :  { %v2088_v31 = vmul.f32 %v2610_v8, %v2602_v44 }
 0xa93   :  { %2383 = vmatmul.msk.f32.gmra.mxu3 %vm1374_vm10, %v2088_v31 }
 0xafe   :  { %v2118_v46 = vpop.f32.mrf.mxu3 }
 0xaff   :  { %v2130_v47 = vmul.f32 %v3834_v7, %v2118_v46  ;;  %v2164_v7 = vmul.f32 0.26894143, %v4195_v50 }
 0xb06   :  { %v2121_v29 = vpop.f32.mrf.mxu3 }
 0xb07   :  { %v2131_v41 = vmul.f32 %v3850_v21, %v2121_v29 }
 0xb09   :  { %v2132_v11 = vadd.f32 %v2131_v41, %v2130_v47 }
 0xb0e   :  { %v2124_v63 = vpop.f32.mrf.mxu3 }
 0xb0f   :  { %v2133_v48 = vmul.f32 %v3859_v24, %v2124_v63 }
 0xb11   :  { %v2134_v38 = vadd.f32 %v2133_v48, %v2132_v11 }
 0xb16   :  { %v2127_v22 = vpop.f32.mrf.mxu3 }
 0xb17   :  { %v2135_v26 = vmul.f32 %v3869_v27, %v2127_v22 }
 0xb19   :  { %v2136_v54 = vadd.f32 %v2135_v26, %v2134_v38 }
 0xb1b   :  { %v2137_v40 = vmul.f32 %v2136_v54, %v4149_v57 }
 0xb1d   :  { %2384 = vmatmul.msk.f32.vlgmr.msra.gmra.mxu1 %vm913_vm14, %v2137_v40 }
 0xb9a   :  { %v2161_v42 = vpop.f32.mrf.mxu1 }
 0xb9b   :  { %v2162_v21 = vadd.f32 %v2491_v25, %v2161_v42 }
 0xb9d   :  { %v2165_v32 = vadd.f32 %v2164_v7, %v2162_v21 }
 0xb9f   :  { %v2166_v24 = vsel %vm913_vm14, %v2165_v32, 0.0 }
 0xba0   :  { %2167 = vadd.xlane.f32.xlu0 %v2166_v24 }
 0xc13   :  { %v2168_v27 = vpop.xlane.xlu0 %2167 }
 0xc14   :  { %v2169_v57 = vmul.f32 %v2168_v27, %v4170_v36 }
 0xc16   :  { %v2170_v56 = vsub.f32 %v2165_v32, %v2169_v57 }
 0xc18   :  { %v2171_v35 = vmul.f32 %v2170_v56, %v2170_v56 }
 0xc1a   :  { %v2172_v61 = vsel %vm913_vm14, %v2171_v35, 0.0 }
 0xc1b   :  { %2173 = vadd.xlane.f32.xlu1 %v2172_v61 }
 0xc8e   :  { %v2174_v50 = vpop.xlane.xlu1 %2173 }
 0xc8f   :  { %v2175_v49 = vmul.f32 %v2174_v50, %v4170_v36 }
 0xc91   :  { %v2176_v33 = vadd.f32 1e-05, %v2175_v49 }
 0xc93   :  { %2611 = vrsqrt.f32 %v2176_v33  ;;  %vm2183_vm8 = vweird.f32 %v2176_v33 }
 0xc99   :  { %v2612_v2 = vpop.eup %2611 }
 0xc9a   :  { %v2178_v3 = vmul.f32 %v2612_v2, %v2176_v33  ;;  %vm2184_vm7 = vweird.f32 %v2612_v2 }
 0xc9b   :  { %vm2185_vm9 = vmor %vm2183_vm8, %vm2184_vm7 }
 0xc9c   :  { %v2179_v51 = vmul.f32 %v2612_v2, %v2178_v3 }
 0xc9e   :  { %v2180_v9 = vmul.f32 0.5, %v2179_v51 }
 0xca0   :  { %v2181_v0 = vsub.f32 1.5, %v2180_v9 }
 0xca2   :  { %v2182_v55 = vmul.f32 %v2612_v2, %v2181_v0 }
 0xca4   :  { %v2186_v10 = vsel %vm2185_vm9, %v2612_v2, %v2182_v55 }
 0xca5   :  { %v2187_v4 = vmul.f32 %v2186_v10, %v2170_v56 }
 0xca7   :  { %v2191_v45 = vmul.f32 %v2492_v59, %v2187_v4 }
 0xca9   :  { %v2195_v36 = vadd.f32 %v2493_v14, %v2191_v45 }
 0xcab   :  { %2385 = vmatmul.msk.f32.vlgmr.msrb.gmra.mxu2 %vm913_vm14, %v2195_v36 }
 0xd2e   :  { %v2219_v15 = vpop.f32.mrf.mxu2 }
 0xd2f   :  { %v2220_v16 = vadd.f32 %v2494_v1, %v2219_v15 }
 0xd31   :  { %2222 = vst.msk [vmem:[#allocation38] sm:$0xff] %vm1091_vm11, %v2220_v16 }
 0xd32   :  { %3192 = shalt.err (!%p3189_p7)
}
 0xd33   :  { %2233 = dma.vmem_to_hbm [thread:$0]  %s2229_s19, 128, %s2231_s18, [#allocation4]  }
 0xd34   :  { %3217 = dma.done.wait [#allocation4], 128  }
 0xd35   :  { %3218 = vsyncadd [#allocation4], 4294967168 }
 0xd36   :  { %2238 = vsyncpa [#allocation3], 1 }
 0xd37   :  { %2239 = vsyncpa [#allocation6], 1 }
 0xd38   :  { %2240 = vsyncpa [#allocation9], 1 }
 0xd39   :  { %2241 = vsyncpa [#allocation12], 1 }
 0xd3a   :  { %2242 = vsyncpa [#allocation15], 1 }
 0xd3b   :  { %2243 = vsyncpa [#allocation18], 1 }
 0xd3c   :  { %2244 = vsyncpa [#allocation21], 1 }
 0xd3d   :  { %2245 = vsyncpa [#allocation24], 1 }
 0xd3e   :  { %2246 = vsyncpa [#allocation27], 1 }
 0xd3f   :  { %2247 = vsyncpa [#allocation30], 1 }
 0xd40   :  { %2248 = vsyncpa [#allocation33], 1 }
 0xd41   :  { %2249 = vsyncpa [#allocation36], 1 }
 0xd42   :  { %2250 = vsyncpa [#allocation4], 1 }

</bundles_post_ra>
